<compile_context>
chip_gen: v5e
topology: v5e:2x2
jax: 0.10.0
libtpu: 0.0.40
codegen_flags: <defaults>
</compile_context>

<pallas_src>
import jax
import jax.numpy as jnp
import numpy as np
from jax.experimental import pallas as pl
from jax.experimental.pallas import tpu as pltpu


def _round_up(v, m):
    return -(-v // m) * m


def _tpu_vmem_capacity_bytes():
    try:
        return int(pltpu.get_tpu_info().vmem_capacity_bytes)
    except Exception:
        return 64 * 1024 * 1024  # v7x per-TensorCore capacity (smallest current gen)


def _pick_tn(n, per_row_bytes, step_budget_bytes):
    """Packed rows (images) per grid step.

    Fill the per-step budget, keep at least min(n, 8) grid steps so the DMA
    pipeline stays deep and both v7x TensorCores get work, and prefer a nearby
    exact divisor of n (no ragged last block) when one exists within 2x.
    """
    tn = max(1, min(n, step_budget_bytes // max(per_row_bytes, 1)))
    target_steps = min(n, 8)
    tn = min(tn, max(1, n // target_steps))
    for cand in range(tn, max(1, tn // 2) - 1, -1):
        if n % cand == 0:
            return cand
    return tn  # ragged last block handled by the cdiv grid (OOB writes dropped)


def _iwt_kernel(x_ref, o_ref):
    """x_ref: (TN, 4, H, W) wavelet bands; o_ref: (TN, H, 4W).

    o_ref's lane dim packs output rows 2h (first 2W lanes) and 2h+1 (last 2W
    lanes) of super-row h; the column interleave lives entirely in the lane
    dim, so no sublane interleave is ever materialized in VMEM.
    """
    f32 = jnp.float32
    x1 = x_ref[:, 0].astype(f32)
    x2 = x_ref[:, 1].astype(f32)
    x3 = x_ref[:, 2].astype(f32)
    x4 = x_ref[:, 3].astype(f32)

    # Factored form of (x1 +/- x2 +/- x3 +/- x4) / 2 (12 vector ops, not 16).
    a = 0.5 * (x1 - x3)
    b = 0.5 * (x2 - x4)
    c = 0.5 * (x1 + x3)
    d = 0.5 * (x2 + x4)
    e00 = a - b   # out rows 0::2, cols 0::2
    e01 = a + b   # out rows 0::2, cols 1::2
    e10 = c - d   # out rows 1::2, cols 0::2
    e11 = c + d   # out rows 1::2, cols 1::2

    tn, hh, w = e00.shape
    # Column interleave within the lane dim: (.., W, 2) -> (.., 2W).
    even = jnp.stack([e00, e01], axis=-1).reshape(tn, hh, 2 * w)   # output row 2h
    odd = jnp.stack([e10, e11], axis=-1).reshape(tn, hh, 2 * w)    # output row 2h+1
    # Two static-lane-range stores; no concat / sublane shuffle needed.
    o_ref[:, :, : 2 * w] = even
    o_ref[:, :, 2 * w:] = odd


@jax.jit
def iwt(x):
    """x: (B, T, C, 4, H, W) -> (B, T, C, 2H, 2W) float32."""
    B, T, C, F, H, W = x.shape
    assert F == 4, "frequency axis must have size 4"
    N = B * T * C

    xr = x.reshape(N, 4, H, W)          # pure metadata (no HBM pass)
    in_itemsize = jnp.dtype(x.dtype).itemsize

    # --- VMEM accounting (padded (sublane=8, lane=128) layouts, per image) ---
    in_row = 4 * _round_up(H, 8) * _round_up(W, 128) * in_itemsize
    out_row = _round_up(H, 8) * _round_up(4 * W, 128) * 4            # f32 output
    # f32 band copies + factored terms + even/odd interleave temporaries.
    tmp_row = (8 * _round_up(H, 8) * _round_up(W, 128) * 4
               + 2 * _round_up(H, 8) * _round_up(2 * W, 128) * 4
               + out_row)
    # Double-buffered input and output + temporaries.
    per_row = 2 * in_row + 2 * out_row + tmp_row

    vmem_cap = _tpu_vmem_capacity_bytes()
    step_budget = min(vmem_cap // 10, 10 * 1024 * 1024)   # ~6 MiB on v7x, 10 MiB on v5e/v6e
    tn = _pick_tn(N, per_row, step_budget)
    steps = pl.cdiv(N, tn)
    vmem_limit = int(min(vmem_cap * 3 // 4,
                         max(32 * 1024 * 1024, 2 * per_row * tn)))

    out = pl.pallas_call(
        _iwt_kernel,
        out_shape=jax.ShapeDtypeStruct((N, H, 4 * W), jnp.float32),
        grid_spec=pltpu.PrefetchScalarGridSpec(
            num_scalar_prefetch=0,
            grid=(steps,),
            in_specs=[pl.BlockSpec((tn, 4, H, W), lambda i: (i, 0, 0, 0))],
            out_specs=pl.BlockSpec((tn, H, 4 * W), lambda i: (i, 0, 0)),
        ),
        compiler_params=pltpu.CompilerParams(
            dimension_semantics=("parallel",),   # shard grid across v7x's two TCs
            vmem_limit_bytes=vmem_limit,
        ),
        cost_estimate=pl.CostEstimate(
            flops=12 * N * H * W,
            transcendentals=0,
            bytes_accessed=N * 4 * H * W * in_itemsize + N * 4 * H * W * 4,
        ),
    )(xr)

    # (N, H, 4W) and (B, T, C, 2H, 2W) share the same linear layout
    # (super-row h = output rows 2h, 2h+1), so this reshape is free.
    return out.reshape(B, T, C, 2 * H, 2 * W)


def iwt_ref_numpy(x):
    """Pure numpy reference mirroring the PyTorch iwt_init."""
    x = np.asarray(x, dtype=np.float32)
    B, T, C, _, H, W = x.shape
    x1 = x[:, :, :, 0] / 2
    x2 = x[:, :, :, 1] / 2
    x3 = x[:, :, :, 2] / 2
    x4 = x[:, :, :, 3] / 2
    h = np.zeros((B, T, C, 2 * H, 2 * W), dtype=np.float32)
    h[:, :, :, 0::2, 0::2] = x1 - x2 - x3 + x4
    h[:, :, :, 1::2, 0::2] = x1 - x2 + x3 - x4
    h[:, :, :, 0::2, 1::2] = x1 + x2 - x3 - x4
    h[:, :, :, 1::2, 1::2] = x1 + x2 + x3 + x4
    return h


if __name__ == "__main__":
    key = jax.random.PRNGKey(0)
    # batch=2, time=2, channels=4, freq=4 (fixed), spatial 16x16 -> out 32x32
    x = jax.random.normal(key, (2, 2, 4, 4, 16, 16), dtype=jnp.float32)

    y = jax.block_until_ready(iwt(x))

    y_ref = iwt_ref_numpy(np.asarray(x))
    assert y.shape == (2, 2, 4, 32, 32) and y.dtype == jnp.float32
    np.testing.assert_allclose(np.asarray(y), y_ref, rtol=1e-6, atol=1e-6)
    print("KERNEL_OK")
</pallas_src>

<mosaic_0001>
module attributes {stable_mosaic.version = 11 : i64} {
  func.func @_iwt_kernel(%arg0: i32, %arg1: memref<2x4x16x16xf32, #tpu.memory_space<vmem>>, %arg2: memref<2x16x64xf32, #tpu.memory_space<vmem>>) attributes {dimension_semantics = [#tpu.dimension_semantics<parallel>], iteration_bounds = array<i64: 8>, scalar_prefetch = 0 : i64, scratch_operands = 0 : i64, tpu.core_type = #tpu.core_type<tc>, window_params = [{transform_indices = @transform_0, window_bounds = array<i64: 2, 4, 16, 16>}, {transform_indices = @transform_1, window_bounds = array<i64: 2, 16, 64>}]} {
    %c0 = arith.constant 0 : index
    %c0_0 = arith.constant 0 : index
    %c0_1 = arith.constant 0 : index
    %c0_2 = arith.constant 0 : index
    %0 = vector.load %arg1[%c0, %c0_0, %c0_1, %c0_2] : memref<2x4x16x16xf32, #tpu.memory_space<vmem>>, vector<2x1x16x16xf32>
    %1 = vector.shape_cast %0 : vector<2x1x16x16xf32> to vector<2x16x16xf32>
    %c0_3 = arith.constant 0 : index
    %c1 = arith.constant 1 : index
    %c0_4 = arith.constant 0 : index
    %c0_5 = arith.constant 0 : index
    %2 = vector.load %arg1[%c0_3, %c1, %c0_4, %c0_5] : memref<2x4x16x16xf32, #tpu.memory_space<vmem>>, vector<2x1x16x16xf32>
    %3 = vector.shape_cast %2 : vector<2x1x16x16xf32> to vector<2x16x16xf32>
    %c0_6 = arith.constant 0 : index
    %c2 = arith.constant 2 : index
    %c0_7 = arith.constant 0 : index
    %c0_8 = arith.constant 0 : index
    %4 = vector.load %arg1[%c0_6, %c2, %c0_7, %c0_8] : memref<2x4x16x16xf32, #tpu.memory_space<vmem>>, vector<2x1x16x16xf32>
    %5 = vector.shape_cast %4 : vector<2x1x16x16xf32> to vector<2x16x16xf32>
    %c0_9 = arith.constant 0 : index
    %c3 = arith.constant 3 : index
    %c0_10 = arith.constant 0 : index
    %c0_11 = arith.constant 0 : index
    %6 = vector.load %arg1[%c0_9, %c3, %c0_10, %c0_11] : memref<2x4x16x16xf32, #tpu.memory_space<vmem>>, vector<2x1x16x16xf32>
    %7 = vector.shape_cast %6 : vector<2x1x16x16xf32> to vector<2x16x16xf32>
    %8 = arith.subf %1, %5 : vector<2x16x16xf32>
    %cst = arith.constant 5.000000e-01 : f32
    %9 = vector.broadcast %cst : f32 to vector<2x16x16xf32>
    %10 = arith.mulf %9, %8 : vector<2x16x16xf32>
    %11 = arith.subf %3, %7 : vector<2x16x16xf32>
    %cst_12 = arith.constant 5.000000e-01 : f32
    %12 = vector.broadcast %cst_12 : f32 to vector<2x16x16xf32>
    %13 = arith.mulf %12, %11 : vector<2x16x16xf32>
    %14 = arith.addf %1, %5 : vector<2x16x16xf32>
    %cst_13 = arith.constant 5.000000e-01 : f32
    %15 = vector.broadcast %cst_13 : f32 to vector<2x16x16xf32>
    %16 = arith.mulf %15, %14 : vector<2x16x16xf32>
    %17 = arith.addf %3, %7 : vector<2x16x16xf32>
    %cst_14 = arith.constant 5.000000e-01 : f32
    %18 = vector.broadcast %cst_14 : f32 to vector<2x16x16xf32>
    %19 = arith.mulf %18, %17 : vector<2x16x16xf32>
    %20 = arith.subf %10, %13 : vector<2x16x16xf32>
    %21 = arith.addf %10, %13 : vector<2x16x16xf32>
    %22 = arith.subf %16, %19 : vector<2x16x16xf32>
    %23 = arith.addf %16, %19 : vector<2x16x16xf32>
    %24 = vector.shape_cast %20 : vector<2x16x16xf32> to vector<2x16x16x1xf32>
    %25 = vector.shape_cast %21 : vector<2x16x16xf32> to vector<2x16x16x1xf32>
    %26 = tpu.concatenate %24, %25 in 3 : vector<2x16x16x1xf32>, vector<2x16x16x1xf32> -> vector<2x16x16x2xf32>
    %27 = vector.shape_cast %26 : vector<2x16x16x2xf32> to vector<2x16x32xf32>
    %28 = vector.shape_cast %22 : vector<2x16x16xf32> to vector<2x16x16x1xf32>
    %29 = vector.shape_cast %23 : vector<2x16x16xf32> to vector<2x16x16x1xf32>
    %30 = tpu.concatenate %28, %29 in 3 : vector<2x16x16x1xf32>, vector<2x16x16x1xf32> -> vector<2x16x16x2xf32>
    %31 = vector.shape_cast %30 : vector<2x16x16x2xf32> to vector<2x16x32xf32>
    %c0_15 = arith.constant 0 : index
    %c0_16 = arith.constant 0 : index
    %c0_17 = arith.constant 0 : index
    %32 = vector.load %arg2[%c0_15, %c0_16, %c0_17] : memref<2x16x64xf32, #tpu.memory_space<vmem>>, vector<2x16x32xf32>
    tpu.vector_store %arg2[%c0_15, %c0_16, %c0_17], %27 {strides = array<i32>} : memref<2x16x64xf32, #tpu.memory_space<vmem>>, vector<2x16x32xf32>,
    %c0_18 = arith.constant 0 : index
    %c0_19 = arith.constant 0 : index
    %c32 = arith.constant 32 : index
    %33 = vector.load %arg2[%c0_18, %c0_19, %c32] : memref<2x16x64xf32, #tpu.memory_space<vmem>>, vector<2x16x32xf32>
    tpu.vector_store %arg2[%c0_18, %c0_19, %c32], %31 {strides = array<i32>} : memref<2x16x64xf32, #tpu.memory_space<vmem>>, vector<2x16x32xf32>,
    return
  }
  func.func @transform_0(%arg0: i32) -> (i32, i32, i32, i32) {
    %c0_i32 = arith.constant 0 : i32
    %c0_i32_0 = arith.constant 0 : i32
    %c0_i32_1 = arith.constant 0 : i32
    %c0_i32_2 = arith.constant 0 : i32
    return %arg0, %c0_i32, %c0_i32_0, %c0_i32_1 : i32, i32, i32, i32
  }
  func.func @transform_1(%arg0: i32) -> (i32, i32, i32) {
    %c0_i32 = arith.constant 0 : i32
    %c0_i32_0 = arith.constant 0 : i32
    %c0_i32_1 = arith.constant 0 : i32
    return %arg0, %c0_i32, %c0_i32_0 : i32, i32, i32
  }
}

</mosaic_0001>

<bundles_post_ra>
// kernel: iwt.1
= control target key start
LH: loop header
LB: loop body
LE: loop exit
PB: predicated region body
PF: predicated region fallthrough
CT: control target
= control target key end

     0   :  { %6 = vsyncpa [#allocation3], 0  ;;  %s7709_s0 = inlined_call_operand.hbm [shape: f32[16,4,16,16], index: 0, kind: input, shape index: {}]   ;;  %s7710_s1 = inlined_call_operand.vmem [shape: f32[16,16,64], index: 1, kind: output, shape index: {}]  }
   0x1   :  { %8 = vsyncpa [#allocation3 + $0x1], 0  ;;  %s4804_s6 = smov 0   ;;  %s4806_s7 = smov 0  }
   0x2   :  { %s4808_s8 = smov 0   ;;  %s4810_s9 = smov 0  }
   0x3 LB: > { %s4507_s10 = sadd.s32 4294967295, %s4772_s9   ;;  %s4824_s11 = sadd.s32 1, %s4772_s9   ;;  %s4772_s9 = sphi %s4810_s9, %s7998_s9   ;;  %s4768_s8 = sphi %s4808_s8, %s7997_s8   ;;  %s4764_s7 = sphi %s4806_s7, %s7996_s7   ;;  %s4760_s6 = sphi %s4804_s6, %s7995_s6  }
   0x4   : > { %s18_s12 = ssub.s32 %s4772_s9, %s4824_s11  ;;  %s21_s13 = sadd.s32 1, %s4768_s8 }
   0x5   : > { %p19_p0 = scmp.eq.s32.totalorder %s18_s12, 0  ;;  %p28_p1 = scmp.ne.s32.totalorder %s4768_s8, %s4764_s7 }
   0x6   : > { %p29_p2 = scmp.eq.s32.totalorder %s4772_s9, 0  ;;  %p34_p3 = scmp.ne.s32.totalorder %s4764_s7, %s4760_s6 }
   0x7   : > { %s4834_s14 = scalar_select %p19_p0, %s4768_s8, %s21_s13  }
   0x8   : > { %p4836_p4 = por %p29_p2, %p28_p1  ;;  %p35_p5 = scmp.eq.s32.totalorder %s4507_s10, 0 }
   0x9   : > { %p4543_p6 = scmp.lt.s32.totalorder %s4772_s9, 8  ;;  %s84_s17 = sand.u32 1, %s4768_s8  }
   0xa   : > { %p4843_p7 = por %p35_p5, %p34_p3  ;;  %s4511_s18 = sshll.u32 %s84_s17, 7 }
   0xb   : > { %s4535_s19 = sshll.u32 %s4772_s9, 7  ;;  %s88_s23 = scalar_lea.vmem [#allocation2], %s4511_s18 }
   0xc   : > { %s94_s22 = scalar_lea.hbm %s7709_s0, %s4535_s19  ;;  %s97_s24 = sshll.u32 %s88_s23, 4  ;;  %s98_s24 = int_to_ptr.vmem [resolvable:$true] %s97_s24 }
   0xd   : > { %s95_s25 = sshll.u32 %s94_s22, 4  ;;  %p4854_p8 = pnand %p4543_p6, %p4836_p4  ;;  %s96_s25 = int_to_ptr.hbm [resolvable:$true] %s95_s25 }
   0xe   : > { %p4515_p9 = scmp.ge.s32.totalorder %s4772_s9, 1  ;;  %s85_s27 = scalar_lea.sflag [#allocation3], %s84_s17 }
   0xf   : > { %s4708_s28 = sshra.s32 %s96_s25, 4  ;;  %p4712_p11 = pneg %p4854_p8  ;;  %s4709_s28 = int_to_ptr.hbm [resolvable:$true] %s4708_s28 }
  0x10   : > { %s4710_s29 = scalar_lea.hbm %s4709_s28, 128  ;;  %s4715_s3 = scalar_lea.hbm %s7709_s0, 1024 }
  0x11   : > { %p4711_p10 = scmp.ne.s32.totalorder %s4709_s28, %s4710_s29  ;;  %p4716_p0 = scmp.lt.s32.totalorder %s4709_s28, %s7709_s0 }
  0x12   : > { %p4717_p1 = scmp.lt.s32.totalorder %s4715_s3, %s4710_s29 }
  0x13   : > { %p4713_p12 = pnand %p4712_p11, %p4711_p10 }
  0x14   : > { %p4718_p2 = por %p4717_p1, %p4716_p0 }
  0x15   : > { %p4714_p13 = pneg %p4713_p12 }
  0x17   : > { %p4719_p3 = pnand %p4718_p2, %p4714_p13 }
  0x19   : > { %4722 = shalt.err (!%p4719_p3)
}
  0x1a   : > { %s4774_s6 = smov 128   ;;  %s4775_s12 = smov 8  }
  0x1b   : > { %4542 = dma.hbm_to_vmem [thread:$0]  (!%p4854_p8), %s96_s25, 2048, %s98_s24, %s85_s27, %s4774_s6, %s4774_s6, %s4775_s12  }
  0x1c   : > { %p105_p4 = scmp.lt.s32.totalorder %s4772_s9, 9 }
  0x1e   : > { %p106_p5 = pnand %p4515_p9, %p105_p4 }
  0x20   : > { %109 = sbr.rel (%p106_p5) target bundleno = 2028 (0x7ec), region = 24 }
  0x25   : > { %s111_s13 = sand.u32 1, %s4764_s7  }
  0x26   : > { %s4516_s15 = sshll.u32 %s111_s13, 7  ;;  %s112_s17 = scalar_lea.sflag [#allocation3], %s111_s13 }
  0x27   : > { %s4873_s18 = scalar_lea.vmem [#allocation2], %s4516_s15 }
  0x28   : > { %4755 = dma.done.wait (%p4843_p7), %s112_s17, 2048  }
  0x29   : > { %4757 = vsyncadd (%p4843_p7), %s112_s17, 4294965248  ;;  %v212_v0 = vlaneseq  ;;  %v144_v3 = vld [vmem:[%s4873_s18] sm:$0xff]  ;;  %v4520_v4 = vld [vmem:[%s4873_s18 + $0x10] sm:$0xff]  ;;  %vm1043_vm0 = vcmask 7168   ;;  %vm1109_vm1 = vcmask 1047556   ;;  %s4778_s16 = smov 2  }
  0x2a   : > { %v4524_v5 = vld [vmem:[%s4873_s18 + $0x20] sm:$0xff]  ;;  %v4528_v6 = vld [vmem:[%s4873_s18 + $0x30] sm:$0xff]  ;;  %v145_v20 = vld [vmem:[%s4873_s18 + $0x8] sm:$0xff]  ;;  %s4779_s19 = smov 4   ;;  %s4780_s20 = smov 6   ;;  %vm2245_vm2 = vcmask 15360  }
  0x2b   : > { %v4879_v1 = vshrl.u32 %v212_v0, 7  ;;  %v163_v7 = vsub.f32 %v144_v3, %v4524_v5  ;;  %v4891_v8 = vadd.f32 %v4524_v5, %v144_v3  ;;  %v171_v9 = vsub.f32 %v4520_v4, %v4528_v6  ;;  %v146_v12 = vld [vmem:[%s4873_s18 + $0x40] sm:$0xff]  ;;  %v4522_v14 = vld [vmem:[%s4873_s18 + $0x50] sm:$0xff]  ;;  %v4521_v24 = vld [vmem:[%s4873_s18 + $0x18] sm:$0xff]  ;;  %s4781_s21 = smov 8   ;;  %s4782_s22 = smov 10  }
  0x2c   : > { %v4893_v10 = vadd.f32 %v4528_v6, %v4520_v4  ;;  %v4526_v15 = vld [vmem:[%s4873_s18 + $0x60] sm:$0xff]  ;;  %v4530_v16 = vld [vmem:[%s4873_s18 + $0x70] sm:$0xff]  ;;  %v4525_v25 = vld [vmem:[%s4873_s18 + $0x28] sm:$0xff]  ;;  %s4783_s23 = smov 12   ;;  %s4784_s24 = smov 14   ;;  %vm7742_vm3 = vcmask 48128  }
  0x2d   : > { %7758 = vst [vmem:[#allocation5_spill] sm:$0xff] %v4879_v1  ;;  %4599 = vset.pattern.permute.xlu2 %v4879_v1  ;;  %4597 = vset.pattern.permute.xlu1 %v4879_v1  ;;  %v4884_v2 = vadd.s32 8, %v4879_v1  ;;  %v4895_v11 = vmul.f32 0.5, %v163_v7  ;;  %v4898_v13 = vmul.f32 0.5, %v171_v9  ;;  %v4903_v17 = vadd.f32 %v4526_v15, %v146_v12  ;;  %v4529_v26 = vld [vmem:[%s4873_s18 + $0x38] sm:$0xff]  ;;  %v147_v32 = vld [vmem:[%s4873_s18 + $0x48] sm:$0xff] }
  0x2e   : > { %7760 = vst [vmem:[#allocation7_spill] sm:$0xff] %v4891_v8  ;;  %v4905_v18 = vadd.f32 %v4530_v16, %v4522_v14  ;;  %v164_v27 = vsub.f32 %v145_v20, %v4525_v25  ;;  %v172_v28 = vsub.f32 %v4521_v24, %v4529_v26  ;;  %v4523_v33 = vld [vmem:[%s4873_s18 + $0x58] sm:$0xff]  ;;  %v4527_v34 = vld [vmem:[%s4873_s18 + $0x68] sm:$0xff]  ;;  %v165_v39 = vsub.f32 %v146_v12, %v4526_v15  ;;  %s4785_s25 = smov 16   ;;  %s4786_s26 = smov 18  }
  0x2f   : > { %7759 = vst [vmem:[#allocation6_spill] sm:$0xff] %v4884_v2  ;;  %4596 = vset.pattern.permute.xlu0 %v4884_v2  ;;  %v4909_v19 = vsub.f32 %v4895_v11, %v4898_v13  ;;  %v4531_v35 = vld [vmem:[%s4873_s18 + $0x78] sm:$0xff]  ;;  %v4927_v36 = vadd.f32 %v4527_v34, %v147_v32  ;;  %v173_v40 = vsub.f32 %v4522_v14, %v4530_v16  ;;  %s4787_s27 = smov 20   ;;  %s4788_s28 = smov 22   ;;  %vm2250_vm4 = vcmask 31744  }
  0x30   : > { %7761 = vst [vmem:[#allocation8_spill] sm:$0xff] %v4893_v10  ;;  %v168_v30 = vmul.f32 0.5, %v164_v27  ;;  %v176_v31 = vmul.f32 0.5, %v172_v28  ;;  %v4929_v37 = vadd.f32 %v4531_v35, %v4523_v33  ;;  %v169_v42 = vmul.f32 0.5, %v165_v39  ;;  %s4789_s29 = smov 24   ;;  %s4790_s30 = smov 26  }
  0x31   : > { %7762 = vst [vmem:[#allocation9_spill] sm:$0xff] %v4903_v17  ;;  %v237_v21 = vperm.slane %v4909_v19, 2  ;;  %v224_v22 = vperm.slane %v4909_v19, 1  ;;  %v211_v23 = vperm.slane %v4909_v19, 0  ;;  %v289_v29 = vperm.slane %v4909_v19, 6  ;;  %s4791_s2 = smov 28  }
  0x32   : > { %7763 = vst [vmem:[#allocation10_spill] sm:$0xff] %v4905_v18  ;;  %v4931_v38 = vsub.f32 %v168_v30, %v176_v31  ;;  %v177_v43 = vmul.f32 0.5, %v173_v40  ;;  %v250_v45 = vperm.slane %v4909_v19, 3  ;;  %v166_v47 = vsub.f32 %v147_v32, %v4527_v34  ;;  %s4792_s3 = smov 30   ;;  %s4517_s4 = sshll.u32 %s4507_s10, 1 }
  0x33   : > { %7764 = vst [vmem:[#allocation11_spill] sm:$0xff] %v4927_v36  ;;  %v174_v48 = vsub.f32 %v4523_v33, %v4531_v35  ;;  %v276_v53 = vperm.slane %v4909_v19, 5  ;;  %v263_v55 = vperm.slane %v4909_v19, 4  ;;  %v4958_v57 = vadd.f32 %v4898_v13, %v4895_v11  ;;  %p138_p6 = scmp.lt.s32.totalorder %s4517_s4, 15  ;;  %s4793_s12 = smov 32  }
  0x34   : > { %7765 = vst [vmem:[#allocation12_spill] sm:$0xff] %v4929_v37  ;;  %v354_v41 = vperm.slane %v4931_v38, 3  ;;  %v4934_v44 = vsub.f32 %v169_v42, %v177_v43  ;;  %v170_v50 = vmul.f32 0.5, %v166_v47  ;;  %v4964_v59 = vadd.f32 %v176_v31, %v168_v30 }
  0x35   : > { %242 = vperm.xlu2 %4599, %v237_v21   ;;  %229 = vperm.xlu1 %4597, %v224_v22   ;;  %v178_v51 = vmul.f32 0.5, %v174_v48  ;;  %v679_v58 = vperm.slane %v4958_v57, 4  ;;  %v302_v60 = vperm.slane %v4909_v19, 7  ;;  %v315_v62 = vperm.slane %v4931_v38, 0  ;;  %s8000_s4 = smov (!%p138_p6, %s4517_s4), 15 }
  0x36   : > { %v419_v46 = vperm.slane %v4934_v44, 0  ;;  %v484_v49 = vperm.slane %v4934_v44, 5  ;;  %v7720_v61 = vperm.slane %v4964_v59, 1  ;;  %v7718_v63 = vperm.slane %v4964_v59, 6  ;;  %s4536_s9 = sshll.u32 %s8000_s4, 4 }
  0x37   : > { %222 = vperm.xlu0 %4596, %v211_v23   ;;  %v4945_v52 = vsub.f32 %v170_v50, %v178_v51  ;;  %v4975_v0 = vadd.f32 %v177_v43, %v169_v42  ;;  %v4981_v4 = vadd.f32 %v178_v51, %v170_v50  ;;  %v341_v5 = vperm.slane %v4931_v38, 2  ;;  %s6478_s6 = scalar_lea.vmem %s7710_s1, %s4536_s9 }
  0x38   : > { %v328_v7 = vperm.slane %v4931_v38, 1  ;;  %v367_v11 = vperm.slane %v4931_v38, 4  ;;  %v380_v12 = vperm.slane %v4931_v38, 5  ;;  %v406_v13 = vperm.slane %v4931_v38, 7 }
  0x39   : > { %v549_v54 = vperm.slane %v4945_v52, 2  ;;  %v614_v56 = vperm.slane %v4945_v52, 7  ;;  %v7716_v3 = vperm.slane %v4975_v0, 3  ;;  %v7714_v6 = vperm.slane %v4981_v4, 0 }
  0x3a   : > { %v7712_v9 = vperm.slane %v4981_v4, 5  ;;  %v393_v14 = vperm.slane %v4931_v38, 6  ;;  %v458_v15 = vperm.slane %v4934_v44, 3  ;;  %v523_v16 = vperm.slane %v4945_v52, 0 }
  0x3b   : > { %v432_v19 = vperm.slane %v4934_v44, 1  ;;  %v588_v20 = vperm.slane %v4945_v52, 5  ;;  %v7719_v24 = vperm.slane %v4958_v57, 7  ;;  %v471_v25 = vperm.slane %v4934_v44, 4 }
  0x3c   : > { %v7717_v26 = vperm.slane %v4964_v59, 4  ;;  %v7715_v28 = vperm.slane %v4975_v0, 1  ;;  %v7713_v30 = vperm.slane %v4975_v0, 6  ;;  %v497_v33 = vperm.slane %v4934_v44, 6 }
  0x3d   : > { %4600 = vset.pattern.permute.xlu2 %v4884_v2  ;;  %4598 = vset.pattern.permute.xlu1 %v4884_v2  ;;  %v510_v38 = vperm.slane %v4934_v44, 7  ;;  %v692_v37 = vperm.slane %v4958_v57, 5  ;;  %vm7743_vm5 = vcmask 64512   ;;  %vm2265_vm6 = vcmask 80896  }
  0x3e   : > { %vm2270_vm7 = vcmask 97280   ;;  %vm2275_vm8 = vcmask 113664   ;;  %vm2280_vm9 = vcmask 130048   ;;  %vm2285_vm10 = vcmask 146432  }
  0x3f   : > { %300 = vperm.xlu0 %4596, %v289_v29   ;;  %vm2290_vm11 = vcmask 162816   ;;  %vm2295_vm12 = vcmask 179200   ;;  %vm2300_vm13 = vcmask 195584   ;;  %vm2305_vm14 = vcmask 211968  }
  0x40   : > { %vm7754_vm15 = vcmask 244736  }
  0x45   : > { %248 = vperm.xlu2 %4600, %v237_v21   ;;  %235 = vperm.xlu1 %4598, %v224_v22   ;;  %v445_v21 = vperm.slane %v4934_v44, 2  ;;  %v653_v22 = vperm.slane %v4958_v57, 2 }
  0x47   : > { %365 = vperm.xlu0 %4596, %v354_v41  }
  0x4d   : > { %261 = vperm.xlu2 %4600, %v250_v45   ;;  %4601 = vset.pattern.permute.xlu1 %v4879_v1 }
  0x4f   : > { %430 = vperm.xlu0 %4596, %v419_v46  }
  0x55   : > { %4603 = vset.pattern.permute.xlu2 %v4879_v1  ;;  %255 = vperm.xlu1 %4601, %v250_v45   ;;  %v536_v45 = vperm.slane %v4945_v52, 1 }
  0x57   : > { %495 = vperm.xlu0 %4596, %v484_v49  }
  0x5d   : > { %281 = vperm.xlu2 %4603, %v276_v53   ;;  %4602 = vset.pattern.permute.xlu1 %v4884_v2 }
  0x5f   : > { %560 = vperm.xlu0 %4596, %v549_v54  }
  0x65   : > { %294 = vperm.xlu2 %4603, %v289_v29   ;;  %274 = vperm.xlu1 %4602, %v263_v55  }
  0x67   : > { %625 = vperm.xlu0 %4596, %v614_v56  }
  0x6d   : > { %4605 = vset.pattern.permute.xlu2 %v4884_v2  ;;  %287 = vperm.xlu1 %4602, %v276_v53   ;;  %v562_v53 = vperm.slane %v4945_v52, 3 }
  0x6f   : > { %690 = vperm.xlu0 %4596, %v679_v58  }
  0x75   : > { %313 = vperm.xlu2 %4605, %v302_v60   ;;  %4604 = vset.pattern.permute.xlu1 %v4879_v1 }
  0x77   : > { %755 = vperm.xlu0 %4596, %v7720_v61  }
  0x7d   : > { %326 = vperm.xlu2 %4605, %v315_v62   ;;  %307 = vperm.xlu1 %4604, %v302_v60  }
  0x7f   : > { %820 = vperm.xlu0 %4596, %v7718_v63  }
  0x85   : > { %4607 = vset.pattern.permute.xlu2 %v4879_v1  ;;  %320 = vperm.xlu1 %4604, %v315_v62  }
  0x87   : > { %885 = vperm.xlu0 %4596, %v7716_v3  }
  0x8d   : > { %346 = vperm.xlu2 %4607, %v341_v5   ;;  %4606 = vset.pattern.permute.xlu1 %v4884_v2 }
  0x8f   : > { %950 = vperm.xlu0 %4596, %v7714_v6  }
  0x95   : > { %359 = vperm.xlu2 %4607, %v354_v41   ;;  %339 = vperm.xlu1 %4606, %v328_v7  }
  0x97   : > { %1015 = vperm.xlu0 %4596, %v7712_v9  }
  0x9d   : > { %4609 = vset.pattern.permute.xlu2 %v4884_v2  ;;  %352 = vperm.xlu1 %4606, %v341_v5  }
  0x9f   : > { %4648 = vset.pattern.permute.xlu0 %v4879_v1 }
  0xa5   : > { %378 = vperm.xlu2 %4609, %v367_v11   ;;  %4608 = vset.pattern.permute.xlu1 %v4879_v1 }
  0xa7   : > { %216 = vperm.xlu0 %4648, %v211_v23   ;;  %v5017_v23 = vpop.permute.xlu2 %242  ;;  %v5043_v32 = vpop.permute.xlu1 %229 }
  0xa9   : > { %v5056_v41 = vpop.permute.xlu0 %222 }
  0xaa   : > { %7770 = vst [vmem:[#allocation17_spill] sm:$0xff] %v5056_v41  ;;  %v796_v41 = vperm.slane %v4964_v59, 5 }
  0xad   : > { %391 = vperm.xlu2 %4609, %v380_v12   ;;  %372 = vperm.xlu1 %4608, %v367_v11  }
  0xaf   : > { %268 = vperm.xlu0 %4648, %v263_v55   ;;  %v5025_v27 = vpop.permute.xlu2 %248 }
  0xb0   : > { %7766 = vst [vmem:[#allocation13_spill] sm:$0xff] %v5025_v27 }
  0xb1   : > { %v5066_v44 = vpop.permute.xlu0 %300 }
  0xb2   : > { %7772 = vst [vmem:[#allocation19_spill] sm:$0xff] %v5066_v44 }
  0xb5   : > { %4611 = vset.pattern.permute.xlu2 %v4879_v1  ;;  %385 = vperm.xlu1 %4608, %v380_v12  }
  0xb7   : > { %333 = vperm.xlu0 %4648, %v328_v7   ;;  %v5031_v29 = vpop.permute.xlu2 %261  ;;  %v5049_v35 = vpop.permute.xlu1 %235 }
  0xb8   : > { %7767 = vst [vmem:[#allocation14_spill] sm:$0xff] %v5031_v29 }
  0xb9   : > { %7768 = vst [vmem:[#allocation15_spill] sm:$0xff] %v5049_v35 }
  0xbd   : > { %411 = vperm.xlu2 %4611, %v406_v13   ;;  %4610 = vset.pattern.permute.xlu1 %v4884_v2 }
  0xbf   : > { %398 = vperm.xlu0 %4648, %v393_v14   ;;  %v5038_v31 = vpop.permute.xlu2 %281 }
  0xc5   : > { %424 = vperm.xlu2 %4611, %v419_v46   ;;  %404 = vperm.xlu1 %4610, %v393_v14   ;;  %v7711_v46 = vperm.slane %v4981_v4, 3 }
  0xc7   : > { %463 = vperm.xlu0 %4648, %v458_v15   ;;  %v5047_v34 = vpop.permute.xlu2 %294  ;;  %v5054_v40 = vpop.permute.xlu1 %255 }
  0xcd   : > { %4613 = vset.pattern.permute.xlu2 %v4884_v2  ;;  %417 = vperm.xlu1 %4610, %v406_v13  }
  0xcf   : > { %528 = vperm.xlu0 %4648, %v523_v16   ;;  %v5052_v39 = vpop.permute.xlu2 %313 }
  0xd0   : > { %7769 = vst [vmem:[#allocation16_spill] sm:$0xff] %v5052_v39 }
  0xd5   : > { %443 = vperm.xlu2 %4613, %v432_v19   ;;  %4612 = vset.pattern.permute.xlu1 %v4879_v1 }
  0xd7   : > { %593 = vperm.xlu0 %4648, %v588_v20   ;;  %v5059_v42 = vpop.permute.xlu1 %274  ;;  %v5061_v43 = vpop.permute.xlu2 %326 }
  0xd8   : > { %7771 = vst [vmem:[#allocation18_spill] sm:$0xff] %v5059_v42 }
  0xdd   : > { %456 = vperm.xlu2 %4613, %v445_v21   ;;  %437 = vperm.xlu1 %4612, %v432_v19  }
  0xdf   : > { %658 = vperm.xlu0 %4648, %v653_v22   ;;  %v5072_v48 = vpop.permute.xlu1 %287 }
  0xe0   : > { %7773 = vst [vmem:[#allocation20_spill] sm:$0xff] %v5072_v48 }
  0xe5   : > { %4615 = vset.pattern.permute.xlu2 %v4879_v1  ;;  %450 = vperm.xlu1 %4612, %v445_v21  }
  0xe7   : > { %723 = vperm.xlu0 %4648, %v7719_v24   ;;  %v5070_v47 = vpop.permute.xlu2 %346 }
  0xed   : > { %476 = vperm.xlu2 %4615, %v471_v25   ;;  %4614 = vset.pattern.permute.xlu1 %v4884_v2 }
  0xef   : > { %788 = vperm.xlu0 %4648, %v7717_v26   ;;  %v5078_v50 = vpop.permute.xlu1 %307  ;;  %v5080_v51 = vpop.permute.xlu2 %359 }
  0xf5   : > { %489 = vperm.xlu2 %4615, %v484_v49   ;;  %469 = vperm.xlu1 %4614, %v458_v15   ;;  %v5076_v49 = vpop.permute.xlu0 %365  ;;  %v601_v15 = vperm.slane %v4945_v52, 6 }
  0xf7   : > { %853 = vperm.xlu0 %4648, %v7715_v28   ;;  %v5088_v62 = vpop.permute.xlu1 %320  ;;  %v666_v28 = vperm.slane %v4958_v57, 3 }
  0xfd   : > { %4617 = vset.pattern.permute.xlu2 %v4884_v2  ;;  %482 = vperm.xlu1 %4614, %v471_v25   ;;  %v5084_v55 = vpop.permute.xlu0 %430 }
  0xfe   : > { %7774 = vst [vmem:[#allocation21_spill] sm:$0xff] %v5084_v55 }
  0xff   : > { %918 = vperm.xlu0 %4648, %v7713_v30   ;;  %v5086_v60 = vpop.permute.xlu2 %378 }
 0x105   : > { %508 = vperm.xlu2 %4617, %v497_v33   ;;  %4616 = vset.pattern.permute.xlu1 %v4879_v1  ;;  %v5092_v5 = vpop.permute.xlu0 %495 }
 0x106   : > { %7775 = vst [vmem:[#allocation22_spill] sm:$0xff] %v5092_v5  ;;  %v731_v5 = vperm.slane %v4964_v59, 0 }
 0x107   : > { %983 = vperm.xlu0 %4648, %v7711_v46   ;;  %v5094_v7 = vpop.permute.xlu1 %339  ;;  %v5096_v11 = vpop.permute.xlu2 %391 }
 0x10d   : > { %521 = vperm.xlu2 %4617, %v510_v38   ;;  %502 = vperm.xlu1 %4616, %v497_v33   ;;  %v5101_v13 = vpop.permute.xlu0 %560 }
 0x10e   : > { %7776 = vst [vmem:[#allocation23_spill] sm:$0xff] %v5101_v13 }
 0x10f   : > { %v5103_v14 = vpop.permute.xlu1 %352 }
 0x115   : > { %4619 = vset.pattern.permute.xlu2 %v4879_v1  ;;  %515 = vperm.xlu1 %4616, %v510_v38   ;;  %v5111_v21 = vpop.permute.xlu0 %625 }
 0x116   : > { %7777 = vst [vmem:[#allocation24_spill] sm:$0xff] %v5111_v21 }
 0x117   : > { %v5099_v12 = vpop.permute.xlu2 %411 }
 0x11d   : > { %541 = vperm.xlu2 %4619, %v536_v45   ;;  %4618 = vset.pattern.permute.xlu1 %v4884_v2  ;;  %v5121_v38 = vpop.permute.xlu0 %690 }
 0x11e   : > { %7779 = vst [vmem:[#allocation26_spill] sm:$0xff] %v5121_v38 }
 0x11f   : > { %v5109_v19 = vpop.permute.xlu2 %424 }
 0x125   : > { %554 = vperm.xlu2 %4619, %v549_v54   ;;  %534 = vperm.xlu1 %4618, %v523_v16   ;;  %v575_v54 = vperm.slane %v4945_v52, 4  ;;  %v5107_v16 = vpop.permute.xlu1 %372  ;;  %v5129_v46 = vpop.permute.xlu0 %755  ;;  %v640_v52 = vperm.slane %v4958_v57, 1 }
 0x12d   : > { %4621 = vset.pattern.permute.xlu2 %v4884_v2  ;;  %547 = vperm.xlu1 %4618, %v536_v45   ;;  %v5119_v33 = vpop.permute.xlu1 %385  ;;  %v5137_v9 = vpop.permute.xlu0 %820 }
 0x12f   : > { %v5117_v25 = vpop.permute.xlu2 %443 }
 0x130   : > { %7778 = vst [vmem:[#allocation25_spill] sm:$0xff] %v5117_v25 }
 0x135   : > { %573 = vperm.xlu2 %4621, %v562_v53   ;;  %4620 = vset.pattern.permute.xlu1 %v4879_v1  ;;  %v5144_v6 = vpop.permute.xlu0 %885 }
 0x136   : > { %7781 = vst [vmem:[#allocation28_spill] sm:$0xff] %v5144_v6  ;;  %v7792_v6 = vperm.slane %v4964_v59, 1 }
 0x137   : > { %v5124_v45 = vpop.permute.xlu1 %404 }
 0x13d   : > { %586 = vperm.xlu2 %4621, %v575_v54   ;;  %567 = vperm.xlu1 %4620, %v562_v53   ;;  %v627_v53 = vperm.slane %v4958_v57, 0  ;;  %v5152_v63 = vpop.permute.xlu0 %950 }
 0x13e   : > { %7783 = vst [vmem:[#allocation30_spill] sm:$0xff] %v5152_v63 }
 0x145   : > { %4623 = vset.pattern.permute.xlu2 %v4879_v1  ;;  %580 = vperm.xlu1 %4620, %v575_v54   ;;  %v5127_v54 = vpop.permute.xlu2 %456  ;;  %v5162_v24 = vpop.permute.xlu0 %1015 }
 0x146   : > { %7780 = vst [vmem:[#allocation27_spill] sm:$0xff] %v5127_v54 }
 0x147   : > { %7786 = vst [vmem:[#allocation33_spill] sm:$0xff] %v5162_v24 }
 0x14d   : > { %606 = vperm.xlu2 %4623, %v601_v15   ;;  %4622 = vset.pattern.permute.xlu1 %v4884_v2  ;;  %v217_v18 = vpop.permute.xlu0 %216 }
 0x155   : > { %619 = vperm.xlu2 %4623, %v614_v56   ;;  %599 = vperm.xlu1 %4622, %v588_v20   ;;  %v5133_v56 = vpop.permute.xlu1 %417  ;;  %v5135_v20 = vpop.permute.xlu2 %476 }
 0x156   : > { %v5176_v10 = vpop.permute.xlu0 %268 }
 0x15d   : > { %4625 = vset.pattern.permute.xlu2 %v4884_v2  ;;  %612 = vperm.xlu1 %4622, %v601_v15   ;;  %v5139_v15 = vpop.permute.xlu1 %437  ;;  %v5142_v30 = vpop.permute.xlu2 %489 }
 0x15e   : > { %v5183_v55 = vpop.permute.xlu0 %333 }
 0x165   : > { %638 = vperm.xlu2 %4625, %v627_v53   ;;  %4624 = vset.pattern.permute.xlu1 %v4879_v1  ;;  %v5147_v3 = vpop.permute.xlu1 %450  ;;  %v5150_v26 = vpop.permute.xlu2 %508 }
 0x166   : > { %7782 = vst [vmem:[#allocation29_spill] sm:$0xff] %v5150_v26 }
 0x16d   : > { %651 = vperm.xlu2 %4625, %v640_v52   ;;  %632 = vperm.xlu1 %4624, %v627_v53   ;;  %v5154_v53 = vpop.permute.xlu1 %469 }
 0x16e   : > { %7784 = vst [vmem:[#allocation31_spill] sm:$0xff] %v5154_v53 }
 0x175   : > { %4627 = vset.pattern.permute.xlu2 %v4879_v1  ;;  %645 = vperm.xlu1 %4624, %v640_v52   ;;  %v5160_v52 = vpop.permute.xlu2 %521  ;;  %v5165_v61 = vpop.permute.xlu1 %482 }
 0x176   : > { %7785 = vst [vmem:[#allocation32_spill] sm:$0xff] %v5160_v52 }
 0x177   : > { %7787 = vst [vmem:[#allocation34_spill] sm:$0xff] %v5165_v61 }
 0x17d   : > { %671 = vperm.xlu2 %4627, %v666_v28   ;;  %4626 = vset.pattern.permute.xlu1 %v4884_v2  ;;  %v5168_v36 = vpop.permute.xlu2 %541 }
 0x185   : > { %684 = vperm.xlu2 %4627, %v679_v58   ;;  %664 = vperm.xlu1 %4626, %v653_v22   ;;  %v5171_v58 = vpop.permute.xlu1 %502  ;;  %v705_v22 = vperm.slane %v4958_v57, 6  ;;  %v5174_v17 = vpop.permute.xlu2 %554 }
 0x18d   : > { %4629 = vset.pattern.permute.xlu2 %v4884_v2  ;;  %677 = vperm.xlu1 %4626, %v666_v28   ;;  %v5178_v28 = vpop.permute.xlu1 %515 }
 0x18f   : > { %v5181_v8 = vpop.permute.xlu2 %573 }
 0x190   : > { %7788 = vst [vmem:[#allocation35_spill] sm:$0xff] %v5181_v8 }
 0x195   : > { %703 = vperm.xlu2 %4629, %v692_v37   ;;  %4628 = vset.pattern.permute.xlu1 %v4879_v1 }
 0x197   : > { %v5185_v25 = vpop.permute.xlu1 %534  ;;  %v5189_v61 = vpop.permute.xlu2 %586 }
 0x198   : > { %7789 = vst [vmem:[#allocation36_spill] sm:$0xff] %v5185_v25 }
 0x199   : > { %7790 = vst [vmem:[#allocation37_spill] sm:$0xff] %v5189_v61  ;;  %v757_v61 = vperm.slane %v4964_v59, 2 }
 0x19d   : > { %716 = vperm.xlu2 %4629, %v705_v22   ;;  %697 = vperm.xlu1 %4628, %v692_v37   ;;  %v5191_v37 = vpop.permute.xlu0 %398 }
 0x19f   : > { %v5193_v53 = vpop.permute.xlu1 %547 }
 0x1a0   : > { %7791 = vst [vmem:[#allocation38_spill] sm:$0xff] %v5193_v53 }
 0x1a5   : > { %4631 = vset.pattern.permute.xlu2 %v4879_v1  ;;  %710 = vperm.xlu1 %4628, %v705_v22   ;;  %v7793_v22 = vperm.slane %v4958_v57, 7  ;;  %v5203_v63 = vpop.permute.xlu0 %463 }
 0x1a7   : > { %v5199_v54 = vpop.permute.xlu2 %606 }
 0x1ad   : > { %736 = vperm.xlu2 %4631, %v731_v5   ;;  %4630 = vset.pattern.permute.xlu1 %v4884_v2  ;;  %v5212_v57 = vpop.permute.xlu0 %528 }
 0x1af   : > { %v5201_v25 = vpop.permute.xlu1 %567  ;;  %v5207_v52 = vpop.permute.xlu2 %619 }
 0x1b0   : > { %7794 = vst [vmem:[#allocation39_spill] sm:$0xff] %v5207_v52 }
 0x1b5   : > { %749 = vperm.xlu2 %4631, %v7792_v6   ;;  %729 = vperm.xlu1 %4630, %v7793_v22   ;;  %v770_v6 = vperm.slane %v4964_v59, 3 }
 0x1b7   : > { %v5209_v26 = vpop.permute.xlu1 %580 }
 0x1b8   : > { %7795 = vst [vmem:[#allocation40_spill] sm:$0xff] %v5209_v26 }
 0x1bd   : > { %4633 = vset.pattern.permute.xlu2 %v4884_v2  ;;  %742 = vperm.xlu1 %4630, %v731_v5   ;;  %v5219_v5 = vpop.permute.xlu0 %593 }
 0x1be   : > { %7798 = vst [vmem:[#allocation43_spill] sm:$0xff] %v5219_v5 }
 0x1bf   : > { %v5217_v24 = vpop.permute.xlu2 %638 }
 0x1c0   : > { %7797 = vst [vmem:[#allocation42_spill] sm:$0xff] %v5217_v24 }
 0x1c5   : > { %768 = vperm.xlu2 %4633, %v757_v61   ;;  %4632 = vset.pattern.permute.xlu1 %v4879_v1  ;;  %v659_v42 = vpop.permute.xlu0 %658 }
 0x1c7   : > { %v5215_v22 = vpop.permute.xlu1 %599  ;;  %v5224_v53 = vpop.permute.xlu2 %651 }
 0x1c8   : > { %7796 = vst [vmem:[#allocation41_spill] sm:$0xff] %v5215_v22  ;;  %v4776_v22 = vmov 1983009808  }
 0x1c9   : > { %7800 = vst [vmem:[#allocation45_spill] sm:$0xff] %v5224_v53  ;;  %v1114_v24 = vunpack.c.l.s4 %v4776_v22 }
 0x1cb   : > { %v5231_v27 = vunpack.c.0.s8 %v1114_v24 }
 0x1cd   : > { %781 = vperm.xlu2 %4633, %v770_v6   ;;  %762 = vperm.xlu1 %4632, %v757_v61   ;;  %v1048_v61 = vsel %vm1043_vm0, %v5017_v23, %v659_v42  ;;  %7801 = vst [vmem:[#allocation46_spill] sm:$0xff] %v5231_v27  ;;  %v7802_v23 = vperm.slane %v4964_v59, 6  ;;  %v7803_v42 = vperm.slane %v4964_v59, 4 }
 0x1ce   : > { %v1108_v21 = vrot.slane %v1048_v61, 4 }
 0x1cf   : > { %v5222_v13 = vpop.permute.xlu1 %612 }
 0x1d0   : > { %7799 = vst [vmem:[#allocation44_spill] sm:$0xff] %v5222_v13 }
 0x1d5   : > { %4635 = vset.pattern.permute.xlu2 %v4879_v1  ;;  %775 = vperm.xlu1 %4632, %v770_v6  }
 0x1d7   : > { %v672_v13 = vpop.permute.xlu2 %671 }
 0x1d8   : > { %v1050_v48 = vsel %vm1043_vm0, %v5054_v40, %v672_v13 }
 0x1dd   : > { %801 = vperm.xlu2 %4635, %v796_v41   ;;  %4634 = vset.pattern.permute.xlu1 %v4884_v2 }
 0x1df   : > { %v633_v38 = vpop.permute.xlu1 %632 }
 0x1e0   : > { %v1044_v6 = vsel %vm1043_vm0, %v217_v18, %v633_v38  ;;  %v1121_v38 = vrot.slane %v1050_v48, 4 }
 0x1e1   : > { %v1111_v8 = vrot.slane %v1044_v6, 4  ;;  %v1110_v44 = vsel %vm1109_vm1, %v1108_v21, %v1044_v6 }
 0x1e2   : > { %v1116_v18 = vperm.slane %v1110_v44, %v5231_v27 }
 0x1e3   : > { %v1112_v35 = vsel %vm1109_vm1, %v1048_v61, %v1111_v8 }
 0x1e4   : > { %v1120_v24 = vperm.slane %v1112_v35, %v5231_v27  ;;  %v1159_v13 = vrot.slane %v1116_v18, 4 }
 0x1e5   : > { %814 = vperm.xlu2 %4635, %v7802_v23   ;;  %794 = vperm.xlu1 %4634, %v7803_v42  }
 0x1e6   : > { %v1171_v23 = vrot.slane %v1120_v24, 4 }
 0x1e7   : > { %v646_v22 = vpop.permute.xlu1 %645 }
 0x1e8   : > { %v1046_v21 = vsel %vm1043_vm0, %v5043_v32, %v646_v22  ;;  %v822_v22 = vperm.slane %v4964_v59, 7  ;;  %v861_v59 = vperm.slane %v4975_v0, 2 }
 0x1e9   : > { %v1122_v6 = vsel %vm1109_vm1, %v1121_v38, %v1046_v21  ;;  %v1123_v40 = vrot.slane %v1046_v21, 4  ;;  %v685_v38 = vpop.permute.xlu2 %684 }
 0x1ea   : > { %v1128_v8 = vperm.slane %v1122_v6, %v5231_v27  ;;  %v1052_v39 = vsel %vm1043_vm0, %v5176_v10, %v685_v38 }
 0x1eb   : > { %v1124_v61 = vsel %vm1109_vm1, %v1050_v48, %v1123_v40  ;;  %v835_v48 = vperm.slane %v4975_v0, 0  ;;  %v724_v40 = vpop.permute.xlu0 %723 }
 0x1ec   : > { %v1132_v42 = vperm.slane %v1124_v61, %v5231_v27  ;;  %v1160_v44 = vsel %vm1109_vm1, %v1128_v8, %v1159_v13 }
 0x1ed   : > { %4637 = vset.pattern.permute.xlu2 %v4884_v2  ;;  %807 = vperm.xlu1 %4634, %v796_v41  }
 0x1ee   : > { %v1169_v35 = vrot.slane %v1132_v42, 4  ;;  %v1172_v53 = vsel %vm1109_vm1, %v1132_v42, %v1171_v23  ;;  %v1058_v23 = vsel %vm1043_vm0, %v5078_v50, %v724_v40  ;;  %v7809_v50 = vperm.slane %v4975_v0, 1 }
 0x1f0   : > { %v1170_v32 = vsel %vm1109_vm1, %v1169_v35, %v1120_v24 }
 0x1f1   : > { %v5256_v21 = vpop.permute.xlu2 %703 }
 0x1f2   : > { %7804 = vst [vmem:[#allocation47_spill] sm:$0xff] %v5256_v21 }
 0x1f5   : > { %833 = vperm.xlu2 %4637, %v822_v22   ;;  %4636 = vset.pattern.permute.xlu1 %v4879_v1 }
 0x1f7   : > { %v5258_v6 = vpop.permute.xlu1 %664 }
 0x1f8   : > { %7805 = vst [vmem:[#allocation48_spill] sm:$0xff] %v5258_v6 }
 0x1f9   : > { %v5260_v41 = vpop.permute.xlu2 %716 }
 0x1fa   : > { %7806 = vst [vmem:[#allocation49_spill] sm:$0xff] %v5260_v41  ;;  %v4777_v41 = vmov 1934713408  }
 0x1fb   : > { %v1162_v21 = vunpack.c.l.s4 %v4777_v41 }
 0x1fd   : > { %846 = vperm.xlu2 %4637, %v835_v48   ;;  %827 = vperm.xlu1 %4636, %v822_v22   ;;  %v1145_v22 = vrot.slane %v1058_v23, 4  ;;  %v5285_v41 = vunpack.c.0.s8 %v1162_v21 }
 0x1ff   : > { %v5263_v24 = vpop.permute.xlu1 %677  ;;  %7810 = vst [vmem:[#allocation51_spill] sm:$0xff] %v5285_v41  ;;  %v1180_v21 = vperm.slane %v1172_v53, %v5285_v41 }
 0x200   : > { %7807 = vst [vmem:[#allocation50_spill] sm:$0xff] %v5263_v24  ;;  %v7808_v24 = vperm.slane %v4975_v0, 3 }
 0x205   : > { %4639 = vset.pattern.permute.xlu2 %v4879_v1  ;;  %840 = vperm.xlu1 %4636, %v835_v48   ;;  %v1157_v48 = vrot.slane %v1128_v8, 4  ;;  %v1135_v8 = vrot.slane %v1052_v39, 4 }
 0x207   : > { %v5266_v13 = vpop.permute.xlu2 %736 }
 0x20d   : > { %866 = vperm.xlu2 %4639, %v861_v59   ;;  %4638 = vset.pattern.permute.xlu1 %v4884_v2 }
 0x20f   : > { %v698_v61 = vpop.permute.xlu1 %697  ;;  %v5281_v40 = vpop.permute.xlu2 %749 }
 0x210   : > { %v1054_v42 = vsel %vm1043_vm0, %v5038_v31, %v698_v61 }
 0x211   : > { %v1147_v35 = vrot.slane %v1054_v42, 4  ;;  %v1146_v29 = vsel %vm1109_vm1, %v1145_v22, %v1054_v42 }
 0x212   : > { %v1152_v10 = vperm.slane %v1146_v29, %v5231_v27 }
 0x213   : > { %v1148_v6 = vsel %vm1109_vm1, %v1058_v23, %v1147_v35  ;;  %v1158_v23 = vsel %vm1109_vm1, %v1157_v48, %v1116_v18  ;;  %v1176_v35 = vperm.slane %v1170_v32, %v5285_v41  ;;  %v1168_v18 = vperm.slane %v1160_v44, %v5285_v41 }
 0x214   : > { %v1156_v31 = vperm.slane %v1148_v6, %v5231_v27  ;;  %v1164_v6 = vperm.slane %v1158_v23, %v5285_v41  ;;  %v1181_v29 = vrot.slane %v1152_v10, 4 }
 0x215   : > { %879 = vperm.xlu2 %4639, %v7808_v24   ;;  %859 = vperm.xlu1 %4638, %v7809_v50  }
 0x216   : > { %v1193_v22 = vrot.slane %v1156_v31, 4 }
 0x217   : > { %v711_v61 = vpop.permute.xlu1 %710 }
 0x218   : > { %v1056_v38 = vsel %vm1043_vm0, %v5047_v34, %v711_v61 }
 0x219   : > { %v1133_v42 = vrot.slane %v1056_v38, 4  ;;  %v1136_v24 = vsel %vm1109_vm1, %v1056_v38, %v1135_v8  ;;  %v1215_v8 = vrot.slane %v1176_v35, 4 }
 0x21a   : > { %v1144_v50 = vperm.slane %v1136_v24, %v5231_v27 }
 0x21b   : > { %v1134_v5 = vsel %vm1109_vm1, %v1133_v42, %v1052_v39  ;;  %v1207_v39 = vrot.slane %v1164_v6, 4 }
 0x21c   : > { %v1140_v48 = vperm.slane %v1134_v5, %v5231_v27  ;;  %v1195_v34 = vrot.slane %v1144_v50, 4  ;;  %v1194_v61 = vsel %vm1109_vm1, %v1193_v22, %v1144_v50  ;;  %v1211_v50 = vrot.slane %v1168_v18, 4 }
 0x21d   : > { %4641 = vset.pattern.permute.xlu2 %v4884_v2  ;;  %872 = vperm.xlu1 %4638, %v861_v59   ;;  %v1200_v32 = vperm.slane %v1194_v61, %v5285_v41  ;;  %v1219_v61 = vrot.slane %v1180_v21, 4 }
 0x21e   : > { %v1183_v38 = vrot.slane %v1140_v48, 4  ;;  %v1182_v23 = vsel %vm1109_vm1, %v1181_v29, %v1140_v48  ;;  %v1196_v44 = vsel %vm1109_vm1, %v1156_v31, %v1195_v34  ;;  %v887_v29 = vperm.slane %v4975_v0, 4 }
 0x21f   : > { %v769_v42 = vpop.permute.xlu2 %768  ;;  %v1188_v53 = vperm.slane %v1182_v23, %v5285_v41  ;;  %v1204_v5 = vperm.slane %v1196_v44, %v5285_v41  ;;  %v5306_v24 = vsel %vm1109_vm1, %v1200_v32, %v1215_v8  ;;  %v1213_v22 = vrot.slane %v1200_v32, 4 }
 0x220   : > { %v1184_v59 = vsel %vm1109_vm1, %v1152_v10, %v1183_v38 }
 0x221   : > { %v1208_v52 = vsel %vm1109_vm1, %v1188_v53, %v1207_v39  ;;  %v1205_v26 = vrot.slane %v1188_v53, 4  ;;  %v1192_v31 = vperm.slane %v1184_v59, %v5285_v41  ;;  %v1217_v48 = vrot.slane %v1204_v5, 4 }
 0x222   : > { %2009 = vrot.lane.b32.xlu0 %v1208_v52, %s4778_s16  ;;  %v5314_v34 = vsel %vm1109_vm1, %v1213_v22, %v1176_v35  ;;  %v5317_v32 = vsel %vm1109_vm1, %v1204_v5, %v1219_v61 }
 0x223   : > { %v5320_v10 = vsel %vm1109_vm1, %v1205_v26, %v1164_v6  ;;  %v1209_v8 = vrot.slane %v1192_v31, 4  ;;  %v5323_v38 = vsel %vm1109_vm1, %v1192_v31, %v1211_v50  ;;  %v5326_v23 = vsel %vm1109_vm1, %v1217_v48, %v1180_v21 }
 0x224   : > { %7811 = vst [vmem:[#allocation52_spill] sm:$0xff] %v5320_v10  ;;  %v5337_v26 = vsel %vm1043_vm0, %v5094_v7, %v5129_v46  ;;  %v900_v6 = vperm.slane %v4975_v0, 5  ;;  %v926_v31 = vperm.slane %v4975_v0, 7 }
 0x225   : > { %898 = vperm.xlu2 %4641, %v887_v29   ;;  %4640 = vset.pattern.permute.xlu1 %v4879_v1  ;;  %v5330_v52 = vsel %vm1109_vm1, %v1209_v8, %v1168_v18  ;;  %v1459_v44 = vrot.slane %v5337_v26, 4 }
 0x227   : > { %v782_v35 = vpop.permute.xlu2 %781  ;;  %v5332_v39 = vpop.permute.xlu1 %729 }
 0x228   : > { %v5342_v21 = vsel %vm1043_vm0, %v5076_v49, %v782_v35  ;;  %v5355_v49 = vsel %vm1043_vm0, %v5103_v14, %v769_v42  ;;  %v1060_v14 = vsel %vm1043_vm0, %v5088_v62, %v5266_v13  ;;  %v7813_v62 = vperm.slane %v4975_v0, 6 }
 0x229   : > { %v1460_v18 = vsel %vm1109_vm1, %v5342_v21, %v1459_v44  ;;  %v1223_v42 = vrot.slane %v1060_v14, 4  ;;  %v1062_v44 = vsel %vm1043_vm0, %v5183_v55, %v5281_v40 }
 0x22a   : > { %v1468_v5 = vperm.slane %v1460_v18, %v5231_v27  ;;  %v7812_v18 = vperm.slane %v4981_v4, 0 }
 0x22c   : > { %v1505_v59 = vrot.slane %v1468_v5, 4 }
 0x22d   : > { %911 = vperm.xlu2 %4641, %v900_v6   ;;  %892 = vperm.xlu1 %4640, %v887_v29  }
 0x22f   : > { %v743_v53 = vpop.permute.xlu1 %742 }
 0x230   : > { %v5350_v46 = vsel %vm1043_vm0, %v5061_v43, %v743_v53  ;;  %v1235_v53 = vrot.slane %v1062_v44, 4 }
 0x231   : > { %v1447_v7 = vrot.slane %v5350_v46, 4 }
 0x233   : > { %v1448_v22 = vsel %vm1109_vm1, %v5355_v49, %v1447_v7 }
 0x234   : > { %v1456_v50 = vperm.slane %v1448_v22, %v5231_v27 }
 0x235   : > { %4643 = vset.pattern.permute.xlu2 %v4879_v1  ;;  %905 = vperm.xlu1 %4640, %v900_v6  }
 0x236   : > { %v1507_v61 = vrot.slane %v1456_v50, 4  ;;  %v1506_v29 = vsel %vm1109_vm1, %v1505_v59, %v1456_v50 }
 0x237   : > { %v5371_v6 = vpop.permute.xlu2 %801 }
 0x238   : > { %v1508_v43 = vsel %vm1109_vm1, %v1468_v5, %v1507_v61  ;;  %v952_v61 = vperm.slane %v4981_v4, 1 }
 0x23d   : > { %931 = vperm.xlu2 %4643, %v926_v31   ;;  %4642 = vset.pattern.permute.xlu1 %v4884_v2 }
 0x23f   : > { %v763_v48 = vpop.permute.xlu1 %762  ;;  %v815_v40 = vpop.permute.xlu2 %814 }
 0x240   : > { %v1064_v8 = vsel %vm1043_vm0, %v5070_v47, %v763_v48 }
 0x241   : > { %v1224_v35 = vsel %vm1109_vm1, %v1064_v8, %v1223_v42 }
 0x242   : > { %v1232_v13 = vperm.slane %v1224_v35, %v5231_v27 }
 0x244   : > { %v1283_v22 = vrot.slane %v1232_v13, 4 }
 0x245   : > { %944 = vperm.xlu2 %4643, %v7812_v18   ;;  %924 = vperm.xlu1 %4642, %v7813_v62   ;;  %v965_v18 = vperm.slane %v4981_v4, 2 }
 0x247   : > { %v776_v5 = vpop.permute.xlu1 %775 }
 0x248   : > { %v1066_v47 = vsel %vm1043_vm0, %v5080_v51, %v776_v5 }
 0x249   : > { %v1236_v7 = vsel %vm1109_vm1, %v1066_v47, %v1235_v53 }
 0x24a   : > { %v1244_v59 = vperm.slane %v1236_v7, %v5231_v27 }
 0x24c   : > { %v1281_v50 = vrot.slane %v1244_v59, 4  ;;  %v5386_v55 = vsel %vm1109_vm1, %v1244_v59, %v1283_v22  ;;  %v789_v22 = vpop.permute.xlu0 %788 }
 0x24d   : > { %4645 = vset.pattern.permute.xlu2 %v4884_v2  ;;  %937 = vperm.xlu1 %4642, %v926_v31   ;;  %v5403_v31 = vsel %vm1043_vm0, %v5124_v45, %v5137_v9  ;;  %v1221_v45 = vrot.slane %v1064_v8, 4 }
 0x24e   : > { %v5390_v0 = vsel %vm1109_vm1, %v1281_v50, %v1232_v13  ;;  %v1072_v50 = vsel %vm1043_vm0, %v5191_v37, %v815_v40 }
 0x24f   : > { %v834_v42 = vpop.permute.xlu2 %833  ;;  %v1222_v37 = vsel %vm1109_vm1, %v1221_v45, %v1060_v14  ;;  %v1070_v14 = vsel %vm1043_vm0, %v5119_v33, %v5371_v6 }
 0x250   : > { %v5417_v9 = vsel %vm1043_vm0, %v5133_v56, %v834_v42  ;;  %v1068_v56 = vsel %vm1043_vm0, %v5107_v16, %v789_v22  ;;  %v1228_v16 = vperm.slane %v1222_v37, %v5231_v27 }
 0x252   : > { %v1271_v33 = vrot.slane %v1228_v16, 4 }
 0x255   : > { %963 = vperm.xlu2 %4645, %v952_v61   ;;  %4644 = vset.pattern.permute.xlu1 %v4879_v1 }
 0x257   : > { %v795_v51 = vpop.permute.xlu1 %794  ;;  %v5407_v13 = vpop.permute.xlu2 %846 }
 0x258   : > { %v5396_v48 = vsel %vm1043_vm0, %v5086_v60, %v795_v51 }
 0x259   : > { %v1471_v35 = vrot.slane %v5396_v48, 4 }
 0x25b   : > { %v1472_v62 = vsel %vm1109_vm1, %v5403_v31, %v1471_v35  ;;  %v1233_v35 = vrot.slane %v1066_v47, 4 }
 0x25c   : > { %v1480_v60 = vperm.slane %v1472_v62, %v5231_v27  ;;  %v1512_v62 = vperm.slane %v1506_v29, %v5285_v41  ;;  %v7721_v29 = vperm.slane %v4981_v4, 4 }
 0x25d   : > { %976 = vperm.xlu2 %4645, %v965_v18   ;;  %957 = vperm.xlu1 %4644, %v952_v61  }
 0x25e   : > { %v1531_v61 = vrot.slane %v1480_v60, 4  ;;  %v1551_v10 = vrot.slane %v1512_v62, 4 }
 0x25f   : > { %v808_v53 = vpop.permute.xlu1 %807 }
 0x260   : > { %v5412_v5 = vsel %vm1043_vm0, %v5096_v11, %v808_v53  ;;  %v1516_v11 = vperm.slane %v1508_v43, %v5285_v41  ;;  %v1245_v53 = vrot.slane %v1072_v50, 4 }
 0x261   : > { %v1483_v7 = vrot.slane %v5412_v5, 4 }
 0x262   : > { %v1555_v47 = vrot.slane %v1516_v11, 4 }
 0x263   : > { %v1484_v59 = vsel %vm1109_vm1, %v5417_v9, %v1483_v7 }
 0x264   : > { %v1492_v51 = vperm.slane %v1484_v59, %v5231_v27  ;;  %v1247_v59 = vrot.slane %v1068_v56, 4 }
 0x265   : > { %4647 = vset.pattern.permute.xlu2 %v4879_v1  ;;  %970 = vperm.xlu1 %4644, %v965_v18   ;;  %v1234_v18 = vsel %vm1109_vm1, %v1233_v35, %v1062_v44  ;;  %v854_v44 = vpop.permute.xlu0 %853 }
 0x266   : > { %v1529_v8 = vrot.slane %v1492_v51, 4  ;;  %v1532_v42 = vsel %vm1109_vm1, %v1492_v51, %v1531_v61  ;;  %v1248_v45 = vsel %vm1109_vm1, %v1072_v50, %v1247_v59  ;;  %v1240_v35 = vperm.slane %v1234_v18, %v5231_v27 }
 0x267   : > { %v867_v40 = vpop.permute.xlu2 %866  ;;  %v1540_v7 = vperm.slane %v1532_v42, %v5285_v41  ;;  %v1078_v50 = vsel %vm1043_vm0, %v5139_v15, %v854_v44  ;;  %v1292_v59 = vperm.slane %v5386_v55, %v5285_v41 }
 0x268   : > { %v1530_v43 = vsel %vm1109_vm1, %v1529_v8, %v1480_v60  ;;  %v1246_v60 = vsel %vm1109_vm1, %v1245_v53, %v1068_v56  ;;  %v1259_v56 = vrot.slane %v1070_v14, 4  ;;  %v1256_v53 = vperm.slane %v1248_v45, %v5231_v27 }
 0x269   : > { %v1553_v22 = vrot.slane %v1540_v7, 4  ;;  %v1536_v61 = vperm.slane %v1530_v43, %v5285_v41  ;;  %v5438_v51 = vsel %vm1109_vm1, %v1540_v7, %v1555_v47  ;;  %v1272_v47 = vsel %vm1109_vm1, %v1240_v35, %v1271_v33 }
 0x26a   : > { %7814 = vst [vmem:[#allocation53_spill] sm:$0xff] %v5438_v51  ;;  %v1288_v45 = vperm.slane %v5390_v0, %v5285_v41  ;;  %v5475_v33 = vperm.slane %v1272_v47, %v5285_v41  ;;  %v1080_v55 = vsel %vm1043_vm0, %v5147_v3, %v867_v40  ;;  %v7818_v0 = vperm.slane %v4981_v4, 3 }
 0x26b   : > { %v5447_v8 = vsel %vm1109_vm1, %v1553_v22, %v1516_v11  ;;  %v5450_v42 = vsel %vm1109_vm1, %v1536_v61, %v1551_v10  ;;  %v1549_v37 = vrot.slane %v1536_v61, 4  ;;  %v1252_v11 = vperm.slane %v1246_v60, %v5231_v27 }
 0x26c   : > { %7815 = vst [vmem:[#allocation54_spill] sm:$0xff] %v5450_v42  ;;  %v1571_v61 = vrot.slane %v1078_v50, 4  ;;  %v1331_v47 = vrot.slane %v1292_v59, 4 }
 0x26d   : > { %996 = vperm.xlu2 %4647, %v7721_v29   ;;  %4646 = vset.pattern.permute.xlu1 %v4884_v2  ;;  %v5456_v6 = vsel %vm1109_vm1, %v1549_v37, %v1512_v62  ;;  %v1269_v62 = vrot.slane %v1240_v35, 4  ;;  %v1295_v44 = vrot.slane %v1252_v11, 4 }
 0x26e   : > { %7816 = vst [vmem:[#allocation55_spill] sm:$0xff] %v5456_v6 }
 0x26f   : > { %v880_v10 = vpop.permute.xlu2 %879  ;;  %v828_v7 = vpop.permute.xlu1 %827 }
 0x270   : > { %v1074_v43 = vsel %vm1043_vm0, %v5099_v12, %v828_v7  ;;  %v1082_v18 = vsel %vm1043_vm0, %v5203_v63, %v880_v10  ;;  %v1307_v12 = vrot.slane %v1256_v53, 4  ;;  %v7817_v7 = vperm.slane %v4981_v4, 5 }
 0x271   : > { %v1257_v15 = vrot.slane %v1074_v43, 4  ;;  %v1260_v22 = vsel %vm1109_vm1, %v1074_v43, %v1259_v56  ;;  %v1569_v63 = vrot.slane %v1082_v18, 4  ;;  %v1572_v10 = vsel %vm1109_vm1, %v1082_v18, %v1571_v61 }
 0x272   : > { %v1268_v60 = vperm.slane %v1260_v22, %v5231_v27  ;;  %v1327_v22 = vrot.slane %v1288_v45, 4 }
 0x273   : > { %v1258_v37 = vsel %vm1109_vm1, %v1257_v15, %v1070_v14  ;;  %v1270_v14 = vsel %vm1109_vm1, %v1269_v62, %v1228_v16  ;;  %v1570_v16 = vsel %vm1109_vm1, %v1569_v63, %v1078_v50  ;;  %v1580_v62 = vperm.slane %v1572_v10, %v5231_v27 }
 0x274   : > { %v1264_v35 = vperm.slane %v1258_v37, %v5231_v27  ;;  %v1305_v56 = vrot.slane %v1268_v60, 4  ;;  %v1308_v43 = vsel %vm1109_vm1, %v1268_v60, %v1307_v12  ;;  %v1557_v37 = vrot.slane %v1080_v55, 4 }
 0x275   : > { %1009 = vperm.xlu2 %4647, %v7817_v7   ;;  %989 = vperm.xlu1 %4646, %v7818_v0   ;;  %v1323_v7 = vrot.slane %v5475_v33, 4 }
 0x276   : > { %v1293_v15 = vrot.slane %v1264_v35, 4  ;;  %v1296_v3 = vsel %vm1109_vm1, %v1264_v35, %v1295_v44  ;;  %v1306_v40 = vsel %vm1109_vm1, %v1305_v56, %v1256_v53  ;;  %v1316_v56 = vperm.slane %v1308_v43, %v5285_v41 }
 0x277   : > { %v841_v29 = vpop.permute.xlu1 %840  ;;  %v5490_v18 = vperm.slane %v1296_v3, %v5285_v41  ;;  %v1312_v61 = vperm.slane %v1306_v40, %v5285_v41 }
 0x278   : > { %v1076_v60 = vsel %vm1043_vm0, %v5109_v19, %v841_v29  ;;  %v1294_v44 = vsel %vm1109_vm1, %v1293_v15, %v1252_v11  ;;  %v1576_v19 = vperm.slane %v1570_v16, %v5231_v27  ;;  %v1276_v11 = vperm.slane %v1270_v14, %v5285_v41 }
 0x279   : > { %v1558_v53 = vsel %vm1109_vm1, %v1557_v37, %v1076_v60  ;;  %v1559_v12 = vrot.slane %v1076_v60, 4  ;;  %v1300_v35 = vperm.slane %v1294_v44, %v5285_v41  ;;  %v5504_v3 = vsel %vm1109_vm1, %v1312_v61, %v1327_v22 }
 0x27a   : > { %v1564_v0 = vperm.slane %v1558_v53, %v5231_v27  ;;  %v1325_v50 = vrot.slane %v1312_v61, 4  ;;  %v5508_v63 = vsel %vm1109_vm1, %v5490_v18, %v1323_v7  ;;  %v1617_v15 = vrot.slane %v1580_v62, 4 }
 0x27b   : > { %v1560_v29 = vsel %vm1109_vm1, %v1080_v55, %v1559_v12  ;;  %v1317_v10 = vrot.slane %v1300_v35, 4  ;;  %v7819_v22 = vperm.slane %v4981_v4, 4  ;;  %v5524_v55 = vsel %vm1109_vm1, %v1316_v56, %v1331_v47 }
 0x27c   : > { %v1568_v43 = vperm.slane %v1560_v29, %v5231_v27  ;;  %v1607_v40 = vrot.slane %v1564_v0, 4  ;;  %v5515_v37 = vsel %vm1109_vm1, %v1325_v50, %v1288_v45  ;;  %v1329_v14 = vrot.slane %v1316_v56, 4  ;;  %v919_v29 = vpop.permute.xlu0 %918 }
 0x27d   : > { %4650 = vset.pattern.permute.xlu2 %v4884_v2  ;;  %1002 = vperm.xlu1 %4646, %v7819_v22   ;;  %v5521_v61 = vsel %vm1109_vm1, %v1317_v10, %v1276_v11  ;;  %v1017_v53 = vperm.slane %v4981_v4, 6  ;;  %v1030_v12 = vperm.slane %v4981_v4, 7  ;;  %v1088_v4 = vsel %vm1043_vm0, %v5171_v58, %v919_v29 }
 0x27e   : > { %7820 = vst [vmem:[#allocation56_spill] sm:$0xff] %v5521_v61  ;;  %v1619_v7 = vrot.slane %v1568_v43, 4  ;;  %v1618_v16 = vsel %vm1109_vm1, %v1617_v15, %v1568_v43  ;;  %v1608_v60 = vsel %vm1109_vm1, %v1576_v19, %v1607_v40  ;;  %v5529_v45 = vsel %vm1109_vm1, %v1329_v14, %v1292_v59 }
 0x27f   : > { %v5537_v56 = vpop.permute.xlu2 %898  ;;  %v1581_v40 = vrot.slane %v1088_v4, 4 }
 0x280   : > { %v1620_v44 = vsel %vm1109_vm1, %v1580_v62, %v1619_v7  ;;  %v1319_v62 = vrot.slane %v1276_v11, 4 }
 0x282   : > { %v1320_v10 = vsel %vm1109_vm1, %v1300_v35, %v1319_v62  ;;  %v1605_v35 = vrot.slane %v1576_v19, 4 }
 0x285   : > { %1028 = vperm.xlu2 %4650, %v1017_v53   ;;  %4649 = vset.pattern.permute.xlu1 %v4879_v1 }
 0x287   : > { %v5535_v47 = vpop.permute.xlu1 %859  ;;  %v5542_v50 = vpop.permute.xlu2 %911 }
 0x28d   : > { %1041 = vperm.xlu2 %4650, %v1030_v12   ;;  %1022 = vperm.xlu1 %4649, %v1017_v53  }
 0x28f   : > { %v5540_v59 = vpop.permute.xlu1 %872 }
 0x295   : > { %1035 = vperm.xlu1 %4649, %v1030_v12   ;;  %4652 = vset.pattern.permute.xlu2 %v4879_v1  ;;  %v1606_v12 = vsel %vm1109_vm1, %v1605_v35, %v1564_v0  ;;  %v1628_v0 = vperm.slane %v1620_v44, %v5285_v41  ;;  %v1624_v35 = vperm.slane %v1618_v16, %v5285_v41 }
 0x297   : > { %v932_v22 = vpop.permute.xlu2 %931  ;;  %v1667_v16 = vrot.slane %v1628_v0, 4 }
 0x298   : > { %v1090_v11 = vsel %vm1043_vm0, %v5178_v28, %v932_v22 }
 0x29d   : > { %2011 = vrot.lane.b32.xlu1 %v1320_v10, %s4778_s16 }
 0x29e   : > { %4651 = vset.pattern.permute.xlu1 %v4884_v2 }
 0x29f   : > { %v893_v15 = vpop.permute.xlu1 %892 }
 0x2a0   : > { %v1084_v43 = vsel %vm1043_vm0, %v5135_v20, %v893_v15  ;;  %v1593_v20 = vrot.slane %v1090_v11, 4 }
 0x2a1   : > { %v1583_v14 = vrot.slane %v1084_v43, 4  ;;  %v1582_v7 = vsel %vm1109_vm1, %v1581_v40, %v1084_v43 }
 0x2a2   : > { %v1588_v58 = vperm.slane %v1582_v7, %v5231_v27 }
 0x2a3   : > { %v1584_v53 = vsel %vm1109_vm1, %v1088_v4, %v1583_v14  ;;  %v1616_v4 = vperm.slane %v1608_v60, %v5285_v41 }
 0x2a4   : > { %v1592_v29 = vperm.slane %v1584_v53, %v5231_v27  ;;  %v1631_v15 = vrot.slane %v1588_v58, 4 }
 0x2a5   : > { %2025 = vrot.lane.b32.xlu1 %v5330_v52, %s4779_s19  ;;  %v1612_v52 = vperm.slane %v1606_v12, %v5285_v41  ;;  %v1659_v60 = vrot.slane %v1616_v4, 4 }
 0x2a6   : > { %v1643_v22 = vrot.slane %v1592_v29, 4 }
 0x2a7   : > { %v906_v62 = vpop.permute.xlu1 %905 }
 0x2a8   : > { %v1086_v10 = vsel %vm1043_vm0, %v5142_v30, %v906_v62 }
 0x2a9   : > { %v1594_v28 = vsel %vm1109_vm1, %v1593_v20, %v1086_v10  ;;  %v1595_v19 = vrot.slane %v1086_v10, 4  ;;  %v1655_v10 = vrot.slane %v1612_v52, 4 }
 0x2aa   : > { %v1600_v43 = vperm.slane %v1594_v28, %v5231_v27 }
 0x2ab   : > { %v1596_v40 = vsel %vm1109_vm1, %v1090_v11, %v1595_v19 }
 0x2ac   : > { %v1604_v14 = vperm.slane %v1596_v40, %v5231_v27  ;;  %v1629_v7 = vrot.slane %v1600_v43, 4  ;;  %v1632_v30 = vsel %vm1109_vm1, %v1600_v43, %v1631_v15 }
 0x2ad   : > { %v1640_v53 = vperm.slane %v1632_v30, %v5285_v41 }
 0x2ae   : > { %v1641_v20 = vrot.slane %v1604_v14, 4  ;;  %v1630_v62 = vsel %vm1109_vm1, %v1629_v7, %v1588_v58  ;;  %v1644_v12 = vsel %vm1109_vm1, %v1604_v14, %v1643_v22  ;;  %v1663_v58 = vrot.slane %v1624_v35, 4 }
 0x2af   : > { %v1636_v11 = vperm.slane %v1630_v62, %v5285_v41  ;;  %v5576_v44 = vsel %vm1109_vm1, %v1640_v53, %v1659_v60  ;;  %v1657_v28 = vrot.slane %v1640_v53, 4  ;;  %v1652_v19 = vperm.slane %v1644_v12, %v5285_v41 }
 0x2b0   : > { %v1642_v15 = vsel %vm1109_vm1, %v1641_v20, %v1592_v29  ;;  %v1321_v62 = vrot.slane %v5490_v18, 4 }
 0x2b1   : > { %v1656_v43 = vsel %vm1109_vm1, %v1636_v11, %v1655_v10  ;;  %v1653_v40 = vrot.slane %v1636_v11, 4  ;;  %v1648_v30 = vperm.slane %v1642_v15, %v5285_v41  ;;  %v5584_v22 = vsel %vm1109_vm1, %v1657_v28, %v1616_v4  ;;  %v945_v11 = vpop.permute.xlu2 %944 }
 0x2b2   : > { %2013 = vrot.lane.b32.xlu2 %v1656_v43, %s4778_s16  ;;  %v5587_v14 = vsel %vm1109_vm1, %v1652_v19, %v1667_v16  ;;  %v1665_v7 = vrot.slane %v1652_v19, 4  ;;  %v1322_v4 = vsel %vm1109_vm1, %v1321_v62, %v5475_v33 }
 0x2b3   : > { %v5590_v53 = vsel %vm1109_vm1, %v1653_v40, %v1612_v52  ;;  %v1661_v29 = vrot.slane %v1648_v30, 4  ;;  %v5593_v60 = vsel %vm1109_vm1, %v1648_v30, %v1663_v58  ;;  %v1092_v40 = vsel %vm1043_vm0, %v5212_v57, %v945_v11 }
 0x2b4   : > { %7821 = vst [vmem:[#allocation57_spill] sm:$0xff] %v5590_v53  ;;  %v5596_v20 = vsel %vm1109_vm1, %v1665_v7, %v1628_v0 }
 0x2b5   : > { %v5600_v10 = vsel %vm1109_vm1, %v1661_v29, %v1624_v35 }
 0x2b7   : > { %v5607_v52 = vpop.permute.xlu1 %924 }
 0x2b9   : > { %v5611_v18 = vpop.permute.xlu2 %963 }
 0x2ba   : > { %2027 = vrot.lane.b32.xlu2 %v1322_v4, %s4779_s19 }
 0x2bf   : > { %v5609_v12 = vpop.permute.xlu1 %937 }
 0x2c1   : > { %v5615_v19 = vpop.permute.xlu2 %976 }
 0x2c2   : > { %2041 = vrot.lane.b32.xlu2 %v5323_v38, %s4780_s20  ;;  %v984_v38 = vpop.permute.xlu0 %983 }
 0x2c3   : > { %v1098_v43 = vsel %vm1043_vm0, %v5201_v25, %v984_v38  ;;  %v7822_v25 = vld [vmem:[#allocation40_spill] sm:$0xff] }
 0x2c4   : > { %v1681_v29 = vrot.slane %v1098_v43, 4 }
 0x2c9   : > { %v997_v30 = vpop.permute.xlu2 %996 }
 0x2ca   : > { %v1100_v38 = vsel %vm1043_vm0, %v7822_v25, %v997_v30 }
 0x2cf   : > { %v958_v0 = vpop.permute.xlu1 %957 }
 0x2d0   : > { %v1094_v7 = vsel %vm1043_vm0, %v5168_v36, %v958_v0 }
 0x2d1   : > { %v1010_v53 = vpop.permute.xlu2 %1009 }
 0x2d7   : > { %v971_v28 = vpop.permute.xlu1 %970 }
 0x2d8   : > { %v5619_v33 = vsel %vm1043_vm0, %v5174_v17, %v971_v28  ;;  %v1682_v28 = vsel %vm1109_vm1, %v1681_v29, %v1094_v7 }
 0x2d9   : > { %v1669_v16 = vrot.slane %v5619_v33, 4  ;;  %v1688_v57 = vperm.slane %v1682_v28, %v5231_v27 }
 0x2db   : > { %v1670_v58 = vsel %vm1109_vm1, %v1669_v16, %v1092_v40  ;;  %v1717_v0 = vrot.slane %v1688_v57, 4 }
 0x2dc   : > { %v1676_v62 = vperm.slane %v1670_v58, %v5231_v27  ;;  %v7823_v58 = vld [vmem:[#allocation39_spill] sm:$0xff] }
 0x2de   : > { %v1719_v11 = vrot.slane %v1676_v62, 4  ;;  %v1718_v30 = vsel %vm1109_vm1, %v1717_v0, %v1676_v62 }
 0x2e7   : > { %v5613_v35 = vpop.permute.xlu1 %989 }
 0x2ef   : > { %v5621_v15 = vpop.permute.xlu1 %1002 }
 0x2ff   : > { %v1023_v17 = vpop.permute.xlu1 %1022 }
 0x300   : > { %v1104_v4 = vsel %vm1043_vm0, %v5199_v54, %v1023_v17  ;;  %v1720_v54 = vsel %vm1109_vm1, %v1688_v57, %v1719_v11  ;;  %v7824_v17 = vld [vmem:[#allocation43_spill] sm:$0xff] }
 0x301   : > { %v1693_v61 = vrot.slane %v1104_v4, 4  ;;  %v1102_v51 = vsel %vm1043_vm0, %v7824_v17, %v1010_v53 }
 0x303   : > { %v1694_v16 = vsel %vm1109_vm1, %v1693_v61, %v1100_v38  ;;  %v1728_v61 = vperm.slane %v1720_v54, %v5285_v41 }
 0x304   : > { %v1700_v1 = vperm.slane %v1694_v16, %v5231_v27  ;;  %v1724_v16 = vperm.slane %v1718_v30, %v5285_v41 }
 0x305   : > { %v1771_v11 = vrot.slane %v1728_v61, 4 }
 0x306   : > { %v1743_v25 = vrot.slane %v1700_v1, 4 }
 0x307   : > { %v1036_v36 = vpop.permute.xlu1 %1035 }
 0x308   : > { %v1106_v2 = vsel %vm1043_vm0, %v7823_v58, %v1036_v36 }
 0x309   : > { %v1705_v29 = vrot.slane %v1106_v2, 4 }
 0x30b   : > { %v1706_v28 = vsel %vm1109_vm1, %v1705_v29, %v1102_v51  ;;  %v1767_v29 = vrot.slane %v1724_v16, 4 }
 0x30c   : > { %v1712_v6 = vperm.slane %v1706_v28, %v5231_v27  ;;  %v1683_v28 = vrot.slane %v1094_v7, 4 }
 0x30e   : > { %v1741_v42 = vrot.slane %v1712_v6, 4  ;;  %v1744_v36 = vsel %vm1109_vm1, %v1712_v6, %v1743_v25 }
 0x30f   : > { %v1752_v57 = vperm.slane %v1744_v36, %v5285_v41  ;;  %v1671_v36 = vrot.slane %v1092_v40, 4 }
 0x310   : > { %v1742_v58 = vsel %vm1109_vm1, %v1741_v42, %v1700_v1  ;;  %v1695_v1 = vrot.slane %v1100_v38, 4  ;;  %v1707_v42 = vrot.slane %v1102_v51, 4 }
 0x311   : > { %v1772_v53 = vsel %vm1109_vm1, %v1752_v57, %v1771_v11  ;;  %v1769_v62 = vrot.slane %v1752_v57, 4  ;;  %v1748_v0 = vperm.slane %v1742_v58, %v5285_v41  ;;  %v1672_v51 = vsel %vm1109_vm1, %v5619_v33, %v1671_v36 }
 0x312   : > { %2047 = vrot.lane.b32.xlu2 %v1772_v53, %s4780_s20  ;;  %v1708_v25 = vsel %vm1109_vm1, %v1106_v2, %v1707_v42  ;;  %v7825_v53 = vld [vmem:[#allocation50_spill] sm:$0xff]  ;;  %v7828_v42 = vld [vmem:[#allocation45_spill] sm:$0xff] }
 0x313   : > { %v1770_v54 = vsel %vm1109_vm1, %v1769_v62, %v1728_v61  ;;  %v1765_v17 = vrot.slane %v1748_v0, 4  ;;  %v1768_v30 = vsel %vm1109_vm1, %v1748_v0, %v1767_v29  ;;  %v1696_v61 = vsel %vm1109_vm1, %v1104_v4, %v1695_v1  ;;  %v7826_v62 = vld [vmem:[#allocation14_spill] sm:$0xff] }
 0x314   : > { %2031 = vrot.lane.b32.xlu1 %v1770_v54, %s4779_s19  ;;  %2015 = vrot.lane.b32.xlu0 %v1768_v30, %s4778_s16  ;;  %v1716_v57 = vperm.slane %v1708_v25, %v5231_v27  ;;  %v5704_v0 = vsel %vm1043_vm0, %v7826_v62, %v7825_v53  ;;  %v1457_v29 = vrot.slane %v5342_v21, 4  ;;  %v7827_v54 = vld [vmem:[#allocation16_spill] sm:$0xff]  ;;  %v7836_v62 = vld [vmem:[#allocation35_spill] sm:$0xff] }
 0x315   : > { %v5661_v6 = vsel %vm1109_vm1, %v1765_v17, %v1724_v16  ;;  %v1704_v16 = vperm.slane %v1696_v61, %v5231_v27  ;;  %v1469_v17 = vrot.slane %v5403_v31, 4  ;;  %v1345_v21 = vrot.slane %v5704_v0, 4 }
 0x316   : > { %v1753_v2 = vrot.slane %v1716_v57, 4 }
 0x317   : > { %v1755_v7 = vrot.slane %v1704_v16, 4 }
 0x318   : > { %v1754_v4 = vsel %vm1109_vm1, %v1753_v2, %v1704_v16  ;;  %v7830_v16 = vld [vmem:[#allocation47_spill] sm:$0xff] }
 0x319   : > { %v1760_v58 = vperm.slane %v1754_v4, %v5285_v41 }
 0x31a   : > { %2061 = vrot.lane.b32.xlu2 %v5600_v10, %s4781_s21  ;;  %v1684_v10 = vsel %vm1109_vm1, %v1098_v43, %v1683_v28  ;;  %v1756_v43 = vsel %vm1109_vm1, %v1716_v57, %v1755_v7  ;;  %v7829_v28 = vld [vmem:[#allocation15_spill] sm:$0xff]  ;;  %v7831_v57 = vld [vmem:[#allocation20_spill] sm:$0xff]  ;;  %v7832_v7 = vld [vmem:[#allocation49_spill] sm:$0xff] }
 0x31b   : > { %v5688_v38 = vperm.slane %v1756_v43, %v5285_v41  ;;  %v1773_v1 = vrot.slane %v1760_v58, 4  ;;  %v5724_v61 = vsel %vm1043_vm0, %v7829_v28, %v7828_v42  ;;  %v7834_v43 = vld [vmem:[#allocation48_spill] sm:$0xff]  ;;  %v7839_v28 = vld [vmem:[#allocation18_spill] sm:$0xff] }
 0x31c   : > { %2045 = vrot.lane.b32.xlu1 %v5576_v44, %s4780_s20  ;;  %2029 = vrot.lane.b32.xlu0 %v5584_v22, %s4779_s19  ;;  %v1692_v44 = vperm.slane %v1684_v10, %v5231_v27  ;;  %v1680_v22 = vperm.slane %v1672_v51, %v5231_v27  ;;  %v5735_v10 = vsel %vm1043_vm0, %v7831_v57, %v7830_v16  ;;  %v1445_v51 = vrot.slane %v5355_v49, 4  ;;  %v7841_v16 = vld [vmem:[#allocation17_spill] sm:$0xff] }
 0x31e   : > { %v1729_v40 = vrot.slane %v1692_v44, 4  ;;  %v1731_v33 = vrot.slane %v1680_v22, 4 }
 0x320   : > { %v1730_v11 = vsel %vm1109_vm1, %v1729_v40, %v1680_v22  ;;  %v7835_v40 = vld [vmem:[#allocation13_spill] sm:$0xff] }
 0x322   : > { %2075 = vrot.lane.b32.xlu2 %v5504_v3, %s4782_s22  ;;  %v1481_v3 = vrot.slane %v5417_v9, 4  ;;  %v1732_v9 = vsel %vm1109_vm1, %v1692_v44, %v1731_v33  ;;  %v1458_v44 = vsel %vm1109_vm1, %v1457_v29, %v5337_v26  ;;  %v5750_v33 = vsel %vm1043_vm0, %v7835_v40, %v7834_v43  ;;  %v7842_v40 = vld [vmem:[#allocation38_spill] sm:$0xff] }
 0x323   : > { %v5719_v30 = vperm.slane %v1732_v9, %v5285_v41  ;;  %v1346_v26 = vsel %vm1109_vm1, %v1345_v21, %v5724_v61 }
 0x324   : > { %2059 = vrot.lane.b32.xlu1 %v5515_v37, %s4781_s21  ;;  %2043 = vrot.lane.b32.xlu0 %v5508_v63, %s4780_s20  ;;  %v1482_v63 = vsel %vm1109_vm1, %v1481_v3, %v5412_v5  ;;  %v1029_v37 = vpop.permute.xlu2 %1028  ;;  %v1736_v5 = vperm.slane %v1730_v11, %v5285_v41  ;;  %v1446_v3 = vsel %vm1109_vm1, %v1445_v51, %v5350_v46 }
 0x325   : > { %v5772_v46 = vsel %vm1043_vm0, %v7836_v62, %v5613_v35  ;;  %v5778_v29 = vperm.slane %v1346_v26, %v5231_v27  ;;  %v7838_v35 = vld [vmem:[#allocation26_spill] sm:$0xff]  ;;  %v7844_v26 = vld [vmem:[#allocation44_spill] sm:$0xff] }
 0x326   : > { %v1775_v31 = vrot.slane %v1736_v5, 4  ;;  %v1774_v49 = vsel %vm1109_vm1, %v1773_v1, %v1736_v5  ;;  %v1333_v5 = vrot.slane %v5750_v33, 4  ;;  %v7837_v1 = vld [vmem:[#allocation24_spill] sm:$0xff]  ;;  %v5793_v21 = vsel %vm1043_vm0, %v7839_v28, %v7838_v35 }
 0x328   : > { %v1776_v4 = vsel %vm1109_vm1, %v1760_v58, %v1775_v31  ;;  %v7840_v31 = vld [vmem:[#allocation42_spill] sm:$0xff] }
 0x329   : > { %v5803_v57 = vsel %vm1043_vm0, %v7841_v16, %v7840_v31 }
 0x32a   : > { %2089 = vrot.lane.b32.xlu2 %v5326_v23, %s4783_s23  ;;  %v1777_v23 = vrot.slane %v5688_v38, 4 }
 0x32c   : > { %2073 = vrot.lane.b32.xlu1 %v5306_v24, %s4782_s22  ;;  %2057 = vrot.lane.b32.xlu0 %v5314_v34, %s4781_s21  ;;  %v5712_v24 = vsel %vm1043_vm0, %v7827_v54, %v5332_v39  ;;  %v5715_v34 = vperm.slane %v1482_v63, %v5231_v27  ;;  %v1470_v39 = vsel %vm1109_vm1, %v1469_v17, %v5396_v48  ;;  %v7833_v48 = vld [vmem:[#allocation19_spill] sm:$0xff]  ;;  %v1042_v9 = vpop.permute.xlu2 %1041 }
 0x32d   : > { %v1369_v25 = vrot.slane %v5712_v24, 4  ;;  %v1778_v36 = vsel %vm1109_vm1, %v1777_v23, %v5719_v30  ;;  %v5745_v2 = vsel %vm1043_vm0, %v7833_v48, %v7832_v7  ;;  %v5759_v11 = vperm.slane %v1470_v39, %v5231_v27 }
 0x32e   : > { %v1517_v22 = vrot.slane %v5715_v34, 4  ;;  %v5764_v63 = vperm.slane %v1458_v44, %v5231_v27  ;;  %v1357_v53 = vrot.slane %v5745_v2, 4  ;;  %v5781_v54 = vperm.slane %v1446_v3, %v5231_v27 }
 0x32f   : > { %v1370_v58 = vsel %vm1109_vm1, %v1369_v25, %v5735_v10  ;;  %v5788_v42 = vsel %vm1043_vm0, %v7837_v1, %v1042_v9  ;;  %v1905_v39 = vrot.slane %v5772_v46, 4  ;;  %v1334_v44 = vsel %vm1109_vm1, %v1333_v5, %v5803_v57  ;;  %v7846_v9 = vld [vmem:[#allocation41_spill] sm:$0xff] }
 0x330   : > { %v1518_v23 = vsel %vm1109_vm1, %v1517_v22, %v5759_v11  ;;  %v5784_v17 = vperm.slane %v1370_v58, %v5231_v27  ;;  %v1493_v25 = vrot.slane %v5764_v63, 4  ;;  %v1358_v51 = vsel %vm1109_vm1, %v1357_v53, %v5793_v21  ;;  %v7845_v58 = vld [vmem:[#allocation33_spill] sm:$0xff] }
 0x331   : > { %v1381_v22 = vrot.slane %v5778_v29, 4  ;;  %v1929_v7 = vrot.slane %v5788_v42, 4  ;;  %v5828_v3 = vsel %vm1043_vm0, %v7844_v26, %v1029_v37  ;;  %v5840_v53 = vperm.slane %v1358_v51, %v5231_v27  ;;  %v7849_v1 = vld [vmem:[#allocation37_spill] sm:$0xff] }
 0x332   : > { %2095 = vrot.lane.b32.xlu2 %v1778_v36, %s4783_s23  ;;  %v5798_v36 = vperm.slane %v1518_v23, %v5285_v41  ;;  %v1494_v48 = vsel %vm1109_vm1, %v1493_v25, %v5781_v54  ;;  %v1405_v43 = vrot.slane %v5784_v17, 4  ;;  %v5846_v62 = vperm.slane %v1334_v44, %v5231_v27  ;;  %v7848_v23 = vld [vmem:[#allocation32_spill] sm:$0xff] }
 0x333   : > { %v5856_v5 = vsel %vm1043_vm0, %v7848_v23, %v5609_v12  ;;  %v5861_v35 = vsel %vm1043_vm0, %v7849_v1, %v5621_v15  ;;  %v1917_v25 = vrot.slane %v5828_v3, 4 }
 0x334   : > { %2079 = vrot.lane.b32.xlu1 %v1776_v4, %s4782_s22  ;;  %2063 = vrot.lane.b32.xlu0 %v1774_v49, %s4781_s21  ;;  %v5819_v4 = vsel %vm1043_vm0, %v7842_v40, %v5611_v18  ;;  %v7843_v49 = vld [vmem:[#allocation23_spill] sm:$0xff]  ;;  %v5837_v18 = vsel %vm1043_vm0, %v7846_v9, %v7845_v58  ;;  %v1541_v37 = vrot.slane %v5798_v36, 4  ;;  %v1382_v12 = vsel %vm1109_vm1, %v1381_v22, %v5846_v62  ;;  %v7851_v40 = vld [vmem:[#allocation36_spill] sm:$0xff] }
 0x335   : > { %v1406_v15 = vsel %vm1109_vm1, %v1405_v43, %v5840_v53  ;;  %v1817_v51 = vrot.slane %v5856_v5, 4  ;;  %v1918_v44 = vsel %vm1109_vm1, %v1917_v25, %v5861_v35  ;;  %v7852_v22 = vld [vmem:[#allocation27_spill] sm:$0xff]  ;;  %v7853_v58 = vld [vmem:[#allocation28_spill] sm:$0xff]  ;;  %v7856_v25 = vld [vmem:[#allocation22_spill] sm:$0xff] }
 0x336   : > { %v5891_v26 = vsel %vm1043_vm0, %v7852_v22, %v5540_v59  ;;  %v7854_v9 = vld [vmem:[#allocation31_spill] sm:$0xff]  ;;  %v1412_v23 = vperm.slane %v1406_v15, %v5285_v41  ;;  %v7855_v59 = vld [vmem:[#allocation34_spill] sm:$0xff] }
 0x337   : > { %v5909_v1 = vsel %vm1043_vm0, %v7855_v59, %v5537_v56 }
 0x33a   : > { %2109 = vrot.lane.b32.xlu2 %v5587_v14, %s4784_s24  ;;  %v5824_v14 = vsel %vm1043_vm0, %v7843_v49, %v5615_v19  ;;  %v1906_v19 = vsel %vm1109_vm1, %v1905_v39, %v5819_v4  ;;  %v1930_v39 = vsel %vm1109_vm1, %v1929_v7, %v5837_v18 }
 0x33b   : > { %v1893_v28 = vrot.slane %v5824_v14, 4  ;;  %v5871_v31 = vperm.slane %v1906_v19, %v5231_v27  ;;  %v5894_v43 = vperm.slane %v1930_v39, %v5231_v27  ;;  %v5900_v19 = vsel %vm1043_vm0, %v7854_v9, %v7853_v58 }
 0x33c   : > { %2093 = vrot.lane.b32.xlu1 %v5596_v20, %s4783_s23  ;;  %2077 = vrot.lane.b32.xlu0 %v5593_v60, %s4782_s22  ;;  %v7847_v20 = vld [vmem:[#allocation29_spill] sm:$0xff]  ;;  %v5914_v39 = vsel %vm1043_vm0, %v7856_v25, %v5542_v50  ;;  %v1429_v58 = vrot.slane %v1412_v23, 4 }
 0x33d   : > { %v5851_v60 = vsel %vm1043_vm0, %v7847_v20, %v5607_v52  ;;  %v5868_v52 = vperm.slane %v1494_v48, %v5285_v41  ;;  %v7850_v48 = vld [vmem:[#allocation30_spill] sm:$0xff]  ;;  %v1388_v20 = vperm.slane %v1382_v12, %v5285_v41  ;;  %v1818_v50 = vsel %vm1109_vm1, %v1817_v51, %v5914_v39  ;;  %v7857_v12 = vld [vmem:[#allocation25_spill] sm:$0xff] }
 0x33e   : > { %v1805_v16 = vrot.slane %v5851_v60, 4  ;;  %v5886_v49 = vsel %vm1043_vm0, %v7851_v40, %v7850_v48  ;;  %v5918_v48 = vperm.slane %v1918_v44, %v5231_v27  ;;  %v5932_v15 = vsel %vm1043_vm0, %v7857_v12, %v5535_v47  ;;  %v7858_v40 = vld [vmem:[#allocation21_spill] sm:$0xff] }
 0x33f   : > { %v1542_v7 = vsel %vm1109_vm1, %v1541_v37, %v5868_v52  ;;  %v1894_v37 = vsel %vm1109_vm1, %v1893_v28, %v5886_v49  ;;  %v1781_v28 = vrot.slane %v5891_v26, 4  ;;  %v5942_v22 = vsel %vm1043_vm0, %v7858_v40, %v5407_v13 }
 0x340   : > { %v1806_v56 = vsel %vm1109_vm1, %v1805_v16, %v5909_v1  ;;  %v5935_v44 = vperm.slane %v1894_v37, %v5231_v27  ;;  %v1431_v16 = vrot.slane %v1388_v20, 4  ;;  %v1824_v9 = vperm.slane %v1818_v50, %v5231_v27 }
 0x341   : > { %v1812_v51 = vperm.slane %v1806_v56, %v5231_v27  ;;  %v1782_v25 = vsel %vm1109_vm1, %v1781_v28, %v5942_v22  ;;  %v1430_v56 = vsel %vm1109_vm1, %v1429_v58, %v1388_v20  ;;  %v1371_v20 = vrot.slane %v5735_v10, 4 }
 0x342   : > { %2123 = vrot.lane.b32.xlu2 %v1542_v7, %s4785_s25  ;;  %v1941_v7 = vrot.slane %v5871_v31, 4  ;;  %v1432_v13 = vsel %vm1109_vm1, %v1412_v23, %v1431_v16 }
 0x343   : > { %v1855_v40 = vrot.slane %v1812_v51, 4 }
 0x344   : > { %2107 = vrot.lane.b32.xlu1 %v5524_v55, %s4784_s24  ;;  %2091 = vrot.lane.b32.xlu0 %v5529_v45, %s4783_s23  ;;  %v1965_v55 = vrot.slane %v5894_v43, 4  ;;  %v1793_v45 = vrot.slane %v5900_v19, 4  ;;  %v1942_v47 = vsel %vm1109_vm1, %v1941_v7, %v5935_v44 }
 0x345   : > { %v1948_v50 = vperm.slane %v1942_v47, %v5285_v41  ;;  %v1856_v23 = vsel %vm1109_vm1, %v1824_v9, %v1855_v40 }
 0x346   : > { %v1966_v37 = vsel %vm1109_vm1, %v1965_v55, %v5918_v48  ;;  %v1794_v59 = vsel %vm1109_vm1, %v1793_v45, %v5932_v15  ;;  %v1788_v55 = vperm.slane %v1782_v25, %v5231_v27  ;;  %v1853_v45 = vrot.slane %v1824_v9, 4 }
 0x347   : > { %v1972_v7 = vperm.slane %v1966_v37, %v5285_v41  ;;  %v1800_v12 = vperm.slane %v1794_v59, %v5231_v27  ;;  %v1991_v28 = vrot.slane %v1948_v50, 4  ;;  %v5966_v37 = vpop.permute.xlu2 %2013  ;;  %v1495_v9 = vrot.slane %v5781_v54, 4 }
 0x348   : > { %v1831_v47 = vrot.slane %v1788_v55, 4  ;;  %v1854_v59 = vsel %vm1109_vm1, %v1853_v45, %v1812_v51  ;;  %v1359_v54 = vrot.slane %v5793_v21, 4  ;;  %v1335_v21 = vrot.slane %v5803_v57, 4 }
 0x349   : > { %v1989_v16 = vrot.slane %v1972_v7, 4  ;;  %v1829_v58 = vrot.slane %v1800_v12, 4  ;;  %v1992_v25 = vsel %vm1109_vm1, %v1972_v7, %v1991_v28  ;;  %v1860_v7 = vperm.slane %v1854_v59, %v5285_v41 }
 0x34a   : > { %2137 = vrot.lane.b32.xlu2 %v1432_v13, %s4786_s26  ;;  %v1779_v13 = vrot.slane %v5719_v30, 4  ;;  %v1832_v30 = vsel %vm1109_vm1, %v1800_v12, %v1831_v47 }
 0x34b   : > { %v1830_v10 = vsel %vm1109_vm1, %v1829_v58, %v1788_v55  ;;  %v1990_v40 = vsel %vm1109_vm1, %v1989_v16, %v1948_v50  ;;  %v5997_v28 = vperm.slane %v1832_v30, %v5285_v41  ;;  %v1877_v12 = vrot.slane %v1860_v7, 4 }
 0x34c   : > { %2121 = vrot.lane.b32.xlu1 %v1430_v56, %s4785_s25  ;;  %2105 = vrot.lane.b32.xlu0 %v5317_v32, %s4784_s24  ;;  %v5972_v56 = vperm.slane %v1856_v23, %v5285_v41  ;;  %v1372_v32 = vsel %vm1109_vm1, %v5712_v24, %v1371_v20  ;;  %v1780_v51 = vsel %vm1109_vm1, %v5688_v38, %v1779_v13  ;;  %v1347_v24 = vrot.slane %v5724_v61, 4 }
 0x34d   : > { %v1836_v55 = vperm.slane %v1830_v10, %v5285_v41  ;;  %v5991_v50 = vperm.slane %v1372_v32, %v5231_v27  ;;  %v1519_v38 = vrot.slane %v5759_v11, 4  ;;  %v1496_v61 = vsel %vm1109_vm1, %v5764_v63, %v1495_v9 }
 0x34e   : > { %v1881_v45 = vrot.slane %v5972_v56, 4  ;;  %v1348_v23 = vsel %vm1109_vm1, %v5704_v0, %v1347_v24  ;;  %v1360_v20 = vsel %vm1109_vm1, %v5745_v2, %v1359_v54  ;;  %v1931_v0 = vrot.slane %v5837_v18, 4 }
 0x34f   : > { %v1520_v16 = vsel %vm1109_vm1, %v5715_v34, %v1519_v38  ;;  %v1879_v58 = vrot.slane %v1836_v55, 4  ;;  %v6010_v47 = vperm.slane %v1348_v23, %v5231_v27  ;;  %v1417_v59 = vrot.slane %v5991_v50, 4  ;;  %v6013_v63 = vpop.permute.xlu2 %2027 }
 0x350   : > { %v1882_v11 = vsel %vm1109_vm1, %v1881_v45, %v5997_v28  ;;  %v1504_v34 = vperm.slane %v1496_v61, %v5285_v41  ;;  %v1919_v2 = vrot.slane %v5861_v35, 4  ;;  %v1528_v18 = vperm.slane %v1520_v16, %v5285_v41 }
 0x351   : > { %v1880_v57 = vsel %vm1109_vm1, %v1860_v7, %v1879_v58  ;;  %v6022_v13 = vperm.slane %v1360_v20, %v5231_v27  ;;  %v1407_v32 = vrot.slane %v5840_v53, 4  ;;  %v1383_v10 = vrot.slane %v5846_v62, 4 }
 0x352   : > { %2143 = vrot.lane.b32.xlu2 %v1992_v25, %s4786_s26  ;;  %v1878_v25 = vsel %vm1109_vm1, %v1877_v12, %v1836_v55  ;;  %v1336_v35 = vsel %vm1109_vm1, %v5750_v33, %v1335_v21  ;;  %v1932_v9 = vsel %vm1109_vm1, %v5788_v42, %v1931_v0  ;;  %v1907_v7 = vrot.slane %v5819_v4, 4 }
 0x353   : > { %v1384_v53 = vsel %vm1109_vm1, %v5778_v29, %v1383_v10  ;;  %v1408_v62 = vsel %vm1109_vm1, %v5784_v17, %v1407_v32  ;;  %v1920_v30 = vsel %vm1109_vm1, %v5828_v3, %v1919_v2  ;;  %v1547_v33 = vrot.slane %v1504_v34, 4 }
 0x354   : > { %2127 = vrot.lane.b32.xlu1 %v1990_v40, %s4785_s25  ;;  %2111 = vrot.lane.b32.xlu0 %v1780_v51, %s4784_s24  ;;  %v1393_v40 = vrot.slane %v6010_v47, 4  ;;  %v1418_v51 = vsel %vm1109_vm1, %v1417_v59, %v6022_v13  ;;  %v1545_v24 = vrot.slane %v1528_v18, 4  ;;  %v6043_v42 = vperm.slane %v1336_v35, %v5231_v27 }
 0x355   : > { %v6046_v45 = vperm.slane %v1932_v9, %v5231_v27  ;;  %v1908_v55 = vsel %vm1109_vm1, %v5772_v46, %v1907_v7  ;;  %v1548_v29 = vsel %vm1109_vm1, %v1528_v18, %v1547_v33  ;;  %v1543_v17 = vrot.slane %v5868_v52, 4 }
 0x356   : > { %v6053_v4 = vperm.slane %v1418_v51, %v5285_v41  ;;  %v6056_v3 = vperm.slane %v1920_v30, %v5231_v27  ;;  %v1394_v54 = vsel %vm1109_vm1, %v1393_v40, %v6043_v42  ;;  %v1392_v38 = vperm.slane %v1384_v53, %v5285_v41 }
 0x357   : > { %v1416_v46 = vperm.slane %v1408_v62, %v5285_v41  ;;  %v1819_v23 = vrot.slane %v5914_v39, 4  ;;  %v1795_v52 = vrot.slane %v5932_v15, 4  ;;  %v1546_v12 = vsel %vm1109_vm1, %v1545_v24, %v1504_v34 }
 0x358   : > { %v1544_v61 = vsel %vm1109_vm1, %v5798_v36, %v1543_v17  ;;  %v1977_v16 = vrot.slane %v6046_v45, 4  ;;  %v6070_v21 = vperm.slane %v1908_v55, %v5231_v27  ;;  %v1967_v20 = vrot.slane %v5918_v48, 4 }
 0x359   : > { %v1895_v39 = vrot.slane %v5886_v49, 4  ;;  %v1820_v15 = vsel %vm1109_vm1, %v5856_v5, %v1819_v23  ;;  %v1437_v36 = vrot.slane %v6053_v4, 4  ;;  %v6082_v58 = vperm.slane %v1394_v54, %v5285_v41 }
 0x35a   : > { %2157 = vrot.lane.b32.xlu2 %v1882_v11, %s4787_s27  ;;  %v6073_v11 = vpop.permute.xlu2 %2041  ;;  %v1435_v0 = vrot.slane %v1392_v38, 4  ;;  %v1978_v48 = vsel %vm1109_vm1, %v1977_v16, %v6056_v3  ;;  %v1783_v59 = vrot.slane %v5942_v22, 4  ;;  %v1796_v34 = vsel %vm1109_vm1, %v5900_v19, %v1795_v52 }
 0x35b   : > { %v1896_v49 = vsel %vm1109_vm1, %v5824_v14, %v1895_v39  ;;  %v1433_v2 = vrot.slane %v1416_v46, 4  ;;  %v1943_v5 = vrot.slane %v5935_v44, 4  ;;  %v1968_v18 = vsel %vm1109_vm1, %v5894_v43, %v1967_v20 }
 0x35c   : > { %2141 = vrot.lane.b32.xlu1 %v1880_v57, %s4786_s26  ;;  %2125 = vrot.lane.b32.xlu0 %v1878_v25, %s4785_s25  ;;  %v6093_v57 = vperm.slane %v1820_v15, %v5231_v27  ;;  %v1953_v25 = vrot.slane %v6070_v21, 4  ;;  %v1807_v32 = vrot.slane %v5909_v1, 4  ;;  %v1784_v22 = vsel %vm1109_vm1, %v5891_v26, %v1783_v59 }
 0x35d   : > { %v1438_v19 = vsel %vm1109_vm1, %v1437_v36, %v6082_v58  ;;  %v6104_v14 = vperm.slane %v1978_v48, %v5285_v41  ;;  %v6107_v44 = vperm.slane %v1796_v34, %v5231_v27  ;;  %v6110_v10 = vperm.slane %v1896_v49, %v5231_v27  ;;  %v6168_v49 = vpop.permute.xlu0 %2009 }
 0x35e   : > { %v1944_v43 = vsel %vm1109_vm1, %v5871_v31, %v1943_v5  ;;  %v1808_v26 = vsel %vm1109_vm1, %v5851_v60, %v1807_v32  ;;  %v1436_v1 = vsel %vm1109_vm1, %v1416_v46, %v1435_v0  ;;  %v1434_v35 = vsel %vm1109_vm1, %v1433_v2, %v1392_v38 }
 0x35f   : > { %v1976_v9 = vperm.slane %v1968_v18, %v5285_v41  ;;  %v6121_v40 = vperm.slane %v1784_v22, %v5231_v27  ;;  %v1865_v51 = vrot.slane %v6093_v57, 4  ;;  %v1954_v60 = vsel %vm1109_vm1, %v1953_v25, %v6110_v10  ;;  %v7859_v25 = vld [vmem:[#allocation54_spill] sm:$0xff]  ;;  %v7860_v18 = vld [vmem:[#allocation55_spill] sm:$0xff] }
 0x360   : > { %v1997_v31 = vrot.slane %v6104_v14, 4  ;;  %v1952_v62 = vperm.slane %v1944_v43, %v5285_v41  ;;  %v1841_v7 = vrot.slane %v6107_v44, 4  ;;  %v6134_v30 = vperm.slane %v1808_v26, %v5231_v27 }
 0x361   : > { %v6137_v33 = vperm.slane %v1954_v60, %v5285_v41  ;;  %v1993_v24 = vrot.slane %v1976_v9, 4  ;;  %v1883_v15 = vrot.slane %v5997_v28, 4  ;;  %v1419_v59 = vrot.slane %v6022_v13, 4 }
 0x362   : > { %2171 = vrot.lane.b32.xlu2 %v1548_v29, %s4788_s28  ;;  %v1842_v55 = vsel %vm1109_vm1, %v1841_v7, %v6121_v40  ;;  %v1866_v29 = vsel %vm1109_vm1, %v1865_v51, %v6134_v30  ;;  %v1995_v54 = vrot.slane %v1952_v62, 4  ;;  %v1395_v34 = vrot.slane %v6043_v42, 4 }
 0x363   : > { %v1998_v17 = vsel %vm1109_vm1, %v1997_v31, %v6137_v33  ;;  %v1994_v46 = vsel %vm1109_vm1, %v1993_v24, %v1952_v62  ;;  %v1848_v23 = vperm.slane %v1842_v55, %v5285_v41  ;;  %v1872_v52 = vperm.slane %v1866_v29, %v5285_v41 }
 0x364   : > { %2155 = vrot.lane.b32.xlu1 %v1546_v12, %s4787_s27  ;;  %2139 = vrot.lane.b32.xlu0 %v1544_v61, %s4786_s26  ;;  %v1996_v38 = vsel %vm1109_vm1, %v1976_v9, %v1995_v54  ;;  %v6150_v12 = vpop.permute.xlu1 %2011  ;;  %v1884_v0 = vsel %vm1109_vm1, %v5972_v56, %v1883_v15  ;;  %v1396_v2 = vsel %vm1109_vm1, %v6010_v47, %v1395_v34  ;;  %v1979_v42 = vrot.slane %v6056_v3, 4 }
 0x365   : > { %v1887_v16 = vrot.slane %v1848_v23, 4  ;;  %v1885_v20 = vrot.slane %v1872_v52, 4  ;;  %v1420_v56 = vsel %vm1109_vm1, %v5991_v50, %v1419_v59  ;;  %v1404_v5 = vperm.slane %v1396_v2, %v5285_v41 }
 0x366   : > { %v1428_v13 = vperm.slane %v1420_v56, %v5285_v41  ;;  %v1955_v50 = vrot.slane %v6110_v10, 4  ;;  %v1980_v3 = vsel %vm1109_vm1, %v6046_v45, %v1979_v42  ;;  %v7861_v45 = vld [vmem:[#allocation7_spill] sm:$0xff]  ;;  %v1843_v31 = vrot.slane %v6121_v40, 4 }
 0x367   : > { %v1888_v39 = vsel %vm1109_vm1, %v1872_v52, %v1887_v16  ;;  %v1886_v36 = vsel %vm1109_vm1, %v1885_v20, %v1848_v23  ;;  %v1988_v51 = vperm.slane %v1980_v3, %v5285_v41  ;;  %v1867_v62 = vrot.slane %v6134_v30, 4  ;;  %v4705_v3 = vld [vmem:[%s4873_s18 + $0x28] sm:$0xff] }
 0x368   : > { %v1956_v43 = vsel %vm1109_vm1, %v6070_v21, %v1955_v50  ;;  %v6207_v21 = vmul.f32 0.5, %v7861_v45  ;;  %v1844_v30 = vsel %vm1109_vm1, %v6107_v44, %v1843_v31  ;;  %v7865_v50 = vld [vmem:[#allocation10_spill] sm:$0xff] }
 0x369   : > { %v1964_v9 = vperm.slane %v1956_v43, %v5285_v41  ;;  %v2001_v29 = vrot.slane %v1988_v51, 4  ;;  %v4704_v43 = vld [vmem:[%s4873_s18 + $0x8] sm:$0xff] }
 0x36a   : > { %2185 = vrot.lane.b32.xlu2 %v1438_v19, %s4789_s29  ;;  %v1441_v19 = vrot.slane %v1428_v13, 4 }
 0x36b   : > { %v2003_v55 = vrot.slane %v1964_v9, 4 }
 0x36c   : > { %v6124_v53 = vpop.permute.xlu2 %2047  ;;  %2169 = vrot.lane.b32.xlu1 %v1436_v1, %s4788_s28  ;;  %2153 = vrot.lane.b32.xlu0 %v1434_v35, %s4787_s27  ;;  %v6170_v28 = vpop.permute.xlu1 %2025  ;;  %v1439_v1 = vrot.slane %v6082_v58, 4  ;;  %v1442_v10 = vsel %vm1109_vm1, %v1441_v19, %v1404_v5  ;;  %v7862_v58 = vld [vmem:[#allocation8_spill] sm:$0xff]  ;;  %v7866_v19 = vld [vmem:[#allocation6_spill] sm:$0xff] }
 0x36d   : > { %v6210_v60 = vmul.f32 0.5, %v7862_v58  ;;  %v2004_v54 = vsel %vm1109_vm1, %v1988_v51, %v2003_v55 }
 0x36e   : > { %v1440_v35 = vsel %vm1109_vm1, %v6053_v4, %v1439_v1  ;;  %v4706_v1 = vld [vmem:[%s4873_s18 + $0x18] sm:$0xff] }
 0x36f   : > { %v6227_v40 = vsub.f32 %v6207_v21, %v6210_v60 }
 0x371   : > { %v2333_v20 = vperm.slane %v6227_v40, 1  ;;  %v7730_v34 = vperm.slane %v6227_v40, 2  ;;  %v2320_v2 = vperm.slane %v6227_v40, 0  ;;  %v2359_v31 = vperm.slane %v6227_v40, 3 }
 0x372   : > { %2191 = vrot.lane.b32.xlu2 %v1998_v17, %s4789_s29  ;;  %v1868_v17 = vsel %vm1109_vm1, %v6093_v57, %v1867_v62  ;;  %v7867_v62 = vld [vmem:[#allocation11_spill] sm:$0xff] }
 0x373   : > { %v1876_v57 = vperm.slane %v1868_v17, %v5285_v41  ;;  %v6288_v55 = vmul.f32 0.5, %v7867_v62 }
 0x374   : > { %v6152_v61 = vpop.permute.xlu2 %2061  ;;  %2175 = vrot.lane.b32.xlu1 %v1996_v38, %s4788_s28  ;;  %2159 = vrot.lane.b32.xlu0 %v1994_v46, %s4787_s27  ;;  %v1999_v38 = vrot.slane %v6137_v33, 4  ;;  %v2002_v46 = vsel %vm1109_vm1, %v2001_v29, %v1964_v9  ;;  %v1852_v33 = vperm.slane %v1844_v30, %v5285_v41  ;;  %v7868_v29 = vld [vmem:[#allocation12_spill] sm:$0xff] }
 0x375   : > { %v1889_v44 = vrot.slane %v1876_v57, 4  ;;  %v6291_v17 = vmul.f32 0.5, %v7868_v29 }
 0x376   : > { %v2000_v23 = vsel %vm1109_vm1, %v6104_v14, %v1999_v38  ;;  %v1891_v15 = vrot.slane %v1852_v33, 4 }
 0x378   : > { %v1892_v14 = vsel %vm1109_vm1, %v1876_v57, %v1891_v15  ;;  %v6299_v57 = vsub.f32 %v6288_v55, %v6291_v17 }
 0x37a   : > { %2205 = vrot.lane.b32.xlu2 %v1888_v39, %s4790_s30  ;;  %7870 = vst [vmem:[#allocation40_spill] sm:$0xff] %v6299_v57  ;;  %v7728_v62 = vperm.slane %v6299_v57, 1 }
 0x37c   : > { %v6162_v48 = vpop.permute.xlu2 %2075  ;;  %2189 = vrot.lane.b32.xlu1 %v1886_v36, %s4789_s29  ;;  %2173 = vrot.lane.b32.xlu0 %v1884_v0, %s4788_s28  ;;  %v1890_v36 = vsel %vm1109_vm1, %v1889_v44, %v1852_v33  ;;  %v2372_v44 = vperm.slane %v6227_v40, 4 }
 0x382   : > { %2219 = vrot.lane.b32.xlu2 %v5447_v8, %s4791_s2  ;;  %v1443_v8 = vrot.slane %v1404_v5, 4  ;;  %v7863_v5 = vld [vmem:[#allocation53_spill] sm:$0xff] }
 0x384   : > { %2203 = vrot.lane.b32.xlu1 %v7859_v25, %s4790_s30  ;;  %2187 = vrot.lane.b32.xlu0 %v7860_v18, %s4789_s29  ;;  %v6185_v47 = vpop.permute.xlu2 %2089  ;;  %v1444_v26 = vsel %vm1109_vm1, %v1428_v13, %v1443_v8  ;;  %v7864_v25 = vld [vmem:[#allocation9_spill] sm:$0xff]  ;;  %v6269_v8 = vmul.f32 0.5, %v7865_v50 }
 0x385   : > { %v6266_v18 = vmul.f32 0.5, %v7864_v25 }
 0x386   : > { %v6188_v32 = vpop.permute.xlu1 %2031  ;;  %v6190_v22 = vpop.permute.xlu0 %2015 }
 0x387   : > { %v6278_v9 = vsub.f32 %v6266_v18, %v6269_v8 }
 0x38a   : > { %2233 = vrot.lane.b32.xlu2 %v1444_v26, %s4792_s3  ;;  %v180_v26 = vadd.f32 %v4705_v3, %v4704_v43  ;;  %v2398_v3 = vperm.slane %v6227_v40, 6 }
 0x38c   : > { %2217 = vrot.lane.b32.xlu1 %v1442_v10, %s4791_s2  ;;  %2201 = vrot.lane.b32.xlu0 %v1440_v35, %s4790_s30  ;;  %v6218_v24 = vpop.permute.xlu2 %2095  ;;  %v4707_v10 = vld [vmem:[%s4873_s18 + $0x38] sm:$0xff]  ;;  %v184_v38 = vmul.f32 0.5, %v180_v26  ;;  %v7726_v26 = vperm.slane %v6278_v9, 4 }
 0x38d   : > { %v188_v35 = vadd.f32 %v4707_v10, %v4706_v1 }
 0x38e   : > { %v6214_v7 = vpop.permute.xlu1 %2045  ;;  %v6216_v4 = vpop.permute.xlu0 %2029 }
 0x38f   : > { %v192_v30 = vmul.f32 0.5, %v188_v35 }
 0x392   : > { %2239 = vrot.lane.b32.xlu2 %v2004_v54, %s4792_s3  ;;  %v2385_v54 = vperm.slane %v6227_v40, 5 }
 0x394   : > { %2223 = vrot.lane.b32.xlu1 %v2002_v46, %s4791_s2  ;;  %2207 = vrot.lane.b32.xlu0 %v2000_v23, %s4790_s30  ;;  %v6243_v39 = vpop.permute.xlu2 %2109  ;;  %v7869_v46 = vld [vmem:[#allocation5_spill] sm:$0xff]  ;;  %v6295_v23 = vsub.f32 %v184_v38, %v192_v30 }
 0x396   : > { %v6238_v52 = vpop.permute.xlu1 %2059  ;;  %v6240_v16 = vpop.permute.xlu0 %2043 }
 0x39a   : > { %2338 = vperm.xlu2 %4652, %v2333_v20  }
 0x39c   : > { %2237 = vrot.lane.b32.xlu1 %v1892_v14, %s4792_s3  ;;  %2221 = vrot.lane.b32.xlu0 %v1890_v36, %s4791_s2  ;;  %v6257_v56 = vpop.permute.xlu2 %2123  ;;  %v7731_v14 = vperm.slane %v6295_v23, 2 }
 0x39e   : > { %v6249_v0 = vpop.permute.xlu1 %2073  ;;  %v6251_v59 = vpop.permute.xlu0 %2057 }
 0x3a2   : > { %2351 = vperm.xlu2 %4652, %v7730_v34  }
 0x3a4   : > { %2331 = vperm.xlu1 %4651, %v2320_v2   ;;  %2235 = vrot.lane.b32.xlu0 %v7863_v5, %s4792_s3  ;;  %v6280_v51 = vpop.permute.xlu2 %2137  ;;  %v7727_v5 = vperm.slane %v6295_v23, 7 }
 0x3a6   : > { %v6261_v13 = vpop.permute.xlu1 %2079  ;;  %v6263_v42 = vpop.permute.xlu0 %2063 }
 0x3aa   : > { %4654 = vset.pattern.permute.xlu2 %v7866_v19 }
 0x3ac   : > { %2344 = vperm.xlu1 %4651, %v2333_v20   ;;  %2325 = vperm.xlu0 %4648, %v2320_v2   ;;  %v6306_v15 = vpop.permute.xlu2 %2143 }
 0x3ae   : > { %v6282_v45 = vpop.permute.xlu1 %2093  ;;  %v6284_v58 = vpop.permute.xlu0 %2077 }
 0x3b2   : > { %2370 = vperm.xlu2 %4654, %v2359_v31  }
 0x3b4   : > { %4653 = vset.pattern.permute.xlu1 %v7869_v46  ;;  %2390 = vperm.xlu0 %4648, %v2385_v54   ;;  %v6316_v25 = vpop.permute.xlu2 %2157 }
 0x3b6   : > { %v6301_v33 = vpop.permute.xlu1 %2107  ;;  %v6303_v20 = vpop.permute.xlu0 %2091 }
 0x3ba   : > { %2383 = vperm.xlu2 %4654, %v2372_v44  }
 0x3bc   : > { %2364 = vperm.xlu1 %4653, %v2359_v31   ;;  %2455 = vperm.xlu0 %4648, %v7731_v14   ;;  %v6327_v1 = vpop.permute.xlu2 %2171  ;;  %v7729_v31 = vperm.slane %v6227_v40, 7  ;;  %v2424_v14 = vperm.slane %v6295_v23, 0 }
 0x3be   : > { %v6311_v36 = vpop.permute.xlu1 %2121  ;;  %v6313_v2 = vpop.permute.xlu0 %2105 }
 0x3c2   : > { %4656 = vset.pattern.permute.xlu2 %v7869_v46 }
 0x3c4   : > { %2377 = vperm.xlu1 %4653, %v2372_v44   ;;  %2520 = vperm.xlu0 %4648, %v7727_v5   ;;  %v6342_v29 = vpop.permute.xlu2 %2185  ;;  %v7734_v5 = vperm.slane %v6299_v57, 6 }
 0x3c6   : > { %v6321_v50 = vpop.permute.xlu1 %2127  ;;  %v6323_v43 = vpop.permute.xlu0 %2111 }
 0x3ca   : > { %2403 = vperm.xlu2 %4656, %v2398_v3  }
 0x3cc   : > { %4655 = vset.pattern.permute.xlu1 %v7866_v19  ;;  %2585 = vperm.xlu0 %4648, %v7726_v26   ;;  %v6363_v41 = vpop.permute.xlu2 %2191 }
 0x3ce   : > { %v6332_v10 = vpop.permute.xlu1 %2141  ;;  %v6334_v35 = vpop.permute.xlu0 %2125 }
 0x3d2   : > { %2416 = vperm.xlu2 %4656, %v7729_v31  }
 0x3d4   : > { %2396 = vperm.xlu1 %4655, %v2385_v54   ;;  %2650 = vperm.xlu0 %4648, %v7728_v62   ;;  %v6354_v54 = vadd.f32 %v6210_v60, %v6207_v21  ;;  %v6358_v62 = vadd.f32 %v6269_v8, %v6266_v18  ;;  %v6369_v21 = vadd.f32 %v192_v30, %v184_v38  ;;  %v2437_v8 = vperm.slane %v6295_v23, 1  ;;  %v6384_v30 = vpop.permute.xlu2 %2205 }
 0x3d6   : > { %v6344_v44 = vpop.permute.xlu1 %2155  ;;  %v6346_v26 = vpop.permute.xlu0 %2139  ;;  %7871 = vst [vmem:[#allocation39_spill] sm:$0xff] %v6354_v54 }
 0x3da   : > { %4658 = vset.pattern.permute.xlu2 %v7866_v19 }
 0x3dc   : > { %2409 = vperm.xlu1 %4655, %v2398_v3   ;;  %2715 = vperm.xlu0 %4648, %v7734_v5   ;;  %v7741_v3 = vperm.slane %v6354_v54, 3  ;;  %v7872_v5 = vld [vmem:[#allocation52_spill] sm:$0xff]  ;;  %v7752_v54 = vperm.slane %v6369_v21, 0 }
 0x3dd   : > { %v2246_v27 = vsel %vm2245_vm2, %v7872_v5, %v6168_v49  ;;  %v2249_v49 = vsel %vm2245_vm2, %v5661_v6, %v6190_v22  ;;  %v7750_v22 = vperm.slane %v6369_v21, 5  ;;  %v6422_v5 = vpop.permute.xlu2 %2219 }
 0x3de   : > { %v6360_v31 = vpop.permute.xlu1 %2169  ;;  %v2154_v34 = vpop.permute.xlu0 %2153  ;;  %v2251_v57 = vsel %vm2250_vm4, %v2246_v27, %v6170_v28  ;;  %v6395_v27 = vadd.f32 %v6291_v17, %v6288_v55  ;;  %v2254_v28 = vsel %vm2250_vm4, %v2249_v49, %v6188_v32  ;;  %v7873_v32 = vld [vmem:[#allocation57_spill] sm:$0xff] }
 0x3df   : > { %v2256_v38 = vsel %vm7742_vm3, %v2251_v57, %v6073_v11  ;;  %v2259_v55 = vsel %vm7742_vm3, %v2254_v28, %v6124_v53  ;;  %v2248_v17 = vsel %vm2245_vm2, %v7873_v32, %v5966_v37 }
 0x3e2   : > { %2435 = vperm.xlu2 %4658, %v2424_v14  }
 0x3e4   : > { %4657 = vset.pattern.permute.xlu1 %v7869_v46  ;;  %2780 = vperm.xlu0 %4648, %v7741_v3   ;;  %v2261_v3 = vsel %vm7743_vm5, %v2256_v38, %v6251_v59 }
 0x3e5   : > { %v2266_v11 = vsel %vm2265_vm6, %v2261_v3, %v6249_v0  ;;  %v2463_v3 = vperm.slane %v6295_v23, 3 }
 0x3e6   : > { %v6371_v60 = vpop.permute.xlu1 %2175  ;;  %v6373_v18 = vpop.permute.xlu0 %2159  ;;  %v2271_v6 = vsel %vm2270_vm7, %v2266_v11, %v6185_v47  ;;  %v2253_v47 = vsel %vm2250_vm4, %v2248_v17, %v6216_v4 }
 0x3e7   : > { %v2276_v0 = vsel %vm2275_vm8, %v2271_v6, %v6313_v2  ;;  %v2476_v6 = vperm.slane %v6295_v23, 4 }
 0x3e8   : > { %v2281_v53 = vsel %vm2280_vm9, %v2276_v0, %v6311_v36 }
 0x3e9   : > { %v2286_v36 = vsel %vm2285_vm10, %v2281_v53, %v6280_v51 }
 0x3ea   : > { %2448 = vperm.xlu2 %4658, %v2437_v8   ;;  %v2291_v49 = vsel %vm2290_vm11, %v2286_v36, %v2154_v34 }
 0x3eb   : > { %v2296_v34 = vsel %vm2295_vm12, %v2291_v49, %v6360_v31 }
 0x3ec   : > { %2429 = vperm.xlu1 %4657, %v2424_v14   ;;  %2845 = vperm.xlu0 %4648, %v7752_v54   ;;  %v2264_v14 = vsel %vm7743_vm5, %v2259_v55, %v6263_v42  ;;  %v2258_v42 = vsel %vm7742_vm3, %v2253_v47, %v6214_v7  ;;  %v7748_v7 = vperm.slane %v6358_v62, 2  ;;  %v2301_v31 = vsel %vm2300_vm13, %v2296_v34, %v6342_v29 }
 0x3ed   : > { %v2269_v37 = vsel %vm2265_vm6, %v2264_v14, %v6261_v13  ;;  %v2263_v28 = vsel %vm7743_vm5, %v2258_v42, %v6152_v61  ;;  %v2541_v34 = vperm.slane %v6278_v9, 1 }
 0x3ee   : > { %v6401_v59 = vpop.permute.xlu1 %2189  ;;  %v6403_v57 = vpop.permute.xlu0 %2173  ;;  %v2274_v13 = vsel %vm2270_vm7, %v2269_v37, %v6218_v24  ;;  %v2268_v24 = vsel %vm2265_vm6, %v2263_v28, %v6284_v58 }
 0x3ef   : > { %v2279_v51 = vsel %vm2275_vm8, %v2274_v13, %v6323_v43  ;;  %v2234_v58 = vpop.permute.xlu2 %2233 }
 0x3f2   : > { %4660 = vset.pattern.permute.xlu2 %v7869_v46 }
 0x3f4   : > { %2442 = vperm.xlu1 %4657, %v2437_v8   ;;  %2910 = vperm.xlu0 %4648, %v7750_v22   ;;  %v7874_v8 = vld [vmem:[#allocation56_spill] sm:$0xff] }
 0x3f5   : > { %v2247_v38 = vsel %vm2245_vm2, %v7874_v8, %v6150_v12 }
 0x3f6   : > { %v6432_v2 = vpop.permute.xlu1 %2203  ;;  %v6434_v4 = vpop.permute.xlu0 %2187  ;;  %v2252_v11 = vsel %vm2250_vm4, %v2247_v38, %v6013_v63  ;;  %v2284_v63 = vsel %vm2280_vm9, %v2279_v51, %v6321_v50 }
 0x3f7   : > { %v2257_v12 = vsel %vm7742_vm3, %v2252_v11, %v6240_v16  ;;  %v2273_v16 = vsel %vm2270_vm7, %v2268_v24, %v6282_v45  ;;  %v2289_v55 = vsel %vm2285_vm10, %v2284_v63, %v6306_v15  ;;  %vm2310_vm3 = vcmask 228352   ;;  %v2240_v36 = vpop.permute.xlu2 %2239 }
 0x3f8   : > { %v2262_v61 = vsel %vm7743_vm5, %v2257_v12, %v6238_v52  ;;  %vm4412_vm5 = vcmask 261120   ;;  %v2278_v52 = vsel %vm2275_vm8, %v2273_v16, %v6243_v39  ;;  %v2294_v45 = vsel %vm2290_vm11, %v2289_v55, %v6373_v18  ;;  %v7879_v16 = vld [vmem:[#allocation40_spill] sm:$0xff] }
 0x3f9   : > { %v7746_v15 = vperm.slane %v6358_v62, 7  ;;  %v2267_v32 = vsel %vm2265_vm6, %v2262_v61, %v6162_v48  ;;  %v2283_v17 = vsel %vm2280_vm9, %v2278_v52, %v6334_v35  ;;  %v2299_v39 = vsel %vm2295_vm12, %v2294_v45, %v6371_v60 }
 0x3fa   : > { %2468 = vperm.xlu2 %4660, %v2463_v3   ;;  %v2272_v47 = vsel %vm2270_vm7, %v2267_v32, %v6303_v20  ;;  %v2288_v18 = vsel %vm2285_vm10, %v2283_v17, %v6332_v10  ;;  %v7875_v48 = vperm.slane %v6295_v23, 2  ;;  %v2304_v53 = vsel %vm2300_vm13, %v2299_v39, %v6363_v41 }
 0x3fb   : > { %v2277_v20 = vsel %vm2275_vm8, %v2272_v47, %v6301_v33  ;;  %v2293_v60 = vsel %vm2290_vm11, %v2288_v18, %v6316_v25  ;;  %v7744_v33 = vperm.slane %v6395_v27, 4  ;;  %v2489_v11 = vperm.slane %v6295_v23, 5 }
 0x3fc   : > { %4659 = vset.pattern.permute.xlu1 %v7866_v19  ;;  %2975 = vperm.xlu0 %4648, %v7748_v7   ;;  %v2282_v42 = vsel %vm2280_vm9, %v2277_v20, %v6257_v56  ;;  %v2298_v8 = vsel %vm2295_vm12, %v2293_v60, %v6403_v57  ;;  %v2502_v12 = vperm.slane %v6295_v23, 6  ;;  %v7876_v24 = vperm.slane %v6227_v40, 2 }
 0x3fd   : > { %v2287_v41 = vsel %vm2285_vm10, %v2282_v42, %v6346_v26  ;;  %v2303_v56 = vsel %vm2300_vm13, %v2298_v8, %v6401_v59  ;;  %v7878_v63 = vperm.slane %v6295_v23, 7  ;;  %v2606_v61 = vperm.slane %v6278_v9, 6 }
 0x3fe   : > { %v2218_v43 = vpop.permute.xlu1 %2217  ;;  %v2202_v50 = vpop.permute.xlu0 %2201  ;;  %v2292_v25 = vsel %vm2290_vm11, %v2287_v41, %v6344_v44  ;;  %v2308_v57 = vsel %vm2305_vm14, %v2303_v56, %v6384_v30  ;;  %v2567_v23 = vperm.slane %v6278_v9, 3  ;;  %v2593_v52 = vperm.slane %v6278_v9, 5 }
 0x3ff   : > { %v2306_v0 = vsel %vm2305_vm14, %v2301_v31, %v2202_v50  ;;  %v2297_v59 = vsel %vm2295_vm12, %v2292_v25, %v6327_v1  ;;  %v7880_v31 = vld [vmem:[#allocation39_spill] sm:$0xff]  ;;  %v7753_v45 = vperm.slane %v6369_v21, 2  ;;  %v7751_v32 = vperm.slane %v6369_v21, 7 }
 0x400   : > { %v2311_v29 = vsel %vm2310_vm3, %v2306_v0, %v2218_v43  ;;  %v2302_v44 = vsel %vm2300_vm13, %v2297_v59, %v6434_v4  ;;  %v6569_v43 = vpop.permute.xlu2 %2338  ;;  %v2736_v50 = vperm.slane %v7880_v31, 0  ;;  %v2801_v55 = vperm.slane %v7880_v31, 5 }
 0x401   : > { %v2316_v14 = vsel %vm7754_vm15, %v2311_v29, %v2234_v58  ;;  %v2307_v30 = vsel %vm2305_vm14, %v2302_v44, %v6432_v2  ;;  %v7877_v2 = vperm.slane %v6227_v40, 7  ;;  %v2554_v40 = vperm.slane %v6278_v9, 2 }
 0x402   : > { %2481 = vperm.xlu2 %4660, %v2476_v6   ;;  %4413 = vst.msk [vmem:[%s6478_s6] sm:$0xff] %vm4412_vm5, %v2316_v14  ;;  %v2312_v1 = vsel %vm2310_vm3, %v2307_v30, %v6422_v5  ;;  %v2528_v5 = vperm.slane %v6278_v9, 0  ;;  %v2671_v58 = vperm.slane %v7879_v16, 3  ;;  %v7881_v14 = vperm.slane %v6278_v9, 4 }
 0x403   : > { %v7749_v39 = vperm.slane %v6358_v62, 4  ;;  %v2658_v42 = vperm.slane %v7879_v16, 2  ;;  %v7882_v41 = vperm.slane %v7879_v16, 1  ;;  %v2814_v7 = vperm.slane %v7880_v31, 6 }
 0x404   : > { %2461 = vperm.xlu1 %4659, %v7875_v48   ;;  %3040 = vperm.xlu0 %4648, %v7746_v15   ;;  %v2619_v48 = vperm.slane %v6278_v9, 7 }
 0x406   : > { %v2224_v35 = vpop.permute.xlu1 %2223  ;;  %v2208_v37 = vpop.permute.xlu0 %2207 }
 0x407   : > { %v2309_v10 = vsel %vm2305_vm14, %v2304_v53, %v2208_v37  ;;  %v2632_v37 = vperm.slane %v7879_v16, 0 }
 0x408   : > { %v2314_v38 = vsel %vm2310_vm3, %v2309_v10, %v2224_v35  ;;  %v7747_v35 = vperm.slane %v6395_v27, 1 }
 0x409   : > { %v2319_v13 = vsel %vm7754_vm15, %v2314_v38, %v2240_v36 }
 0x40a   : > { %4662 = vset.pattern.permute.xlu2 %v7866_v19  ;;  %4416 = vst.msk [vmem:[%s6478_s6 + $0x18] sm:$0xff] %vm4412_vm5, %v2319_v13 }
 0x40c   : > { %2474 = vperm.xlu1 %4659, %v2463_v3   ;;  %3105 = vperm.xlu0 %4648, %v7744_v33  }
 0x40e   : > { %v2238_v26 = vpop.permute.xlu1 %2237  ;;  %v2222_v49 = vpop.permute.xlu0 %2221 }
 0x40f   : > { %v2313_v28 = vsel %vm2310_vm3, %v2308_v57, %v2222_v49  ;;  %v2684_v57 = vperm.slane %v7879_v16, 4 }
 0x410   : > { %v2318_v3 = vsel %vm7754_vm15, %v2313_v28, %v2238_v26  ;;  %v2697_v28 = vperm.slane %v7879_v16, 5 }
 0x411   : > { %4415 = vst.msk [vmem:[%s6478_s6 + $0x10] sm:$0xff] %vm4412_vm5, %v2318_v3 }
 0x412   : > { %2500 = vperm.xlu2 %4662, %v2489_v11  }
 0x414   : > { %4661 = vset.pattern.permute.xlu1 %v7869_v46  ;;  %4699 = vset.pattern.permute.xlu0 %v7866_v19 }
 0x416   : > { %v2236_v51 = vpop.permute.xlu0 %2235  ;;  %v6592_v17 = vpop.permute.xlu1 %2331 }
 0x417   : > { %v2317_v4 = vsel %vm7754_vm15, %v2312_v1, %v2236_v51 }
 0x418   : > { %4414 = vst.msk [vmem:[%s6478_s6 + $0x8] sm:$0xff] %vm4412_vm5, %v2317_v4  ;;  %vm7981_vm5 = vcmask 64512  }
 0x419   : > { %vm7984_vm15 = vmmov %vm7981_vm5 }
 0x41a   : > { %2513 = vperm.xlu2 %4662, %v2502_v12  }
 0x41c   : > { %2494 = vperm.xlu1 %4661, %v2489_v11   ;;  %2357 = vperm.xlu0 %4699, %v7876_v24   ;;  %v7745_v11 = vperm.slane %v6395_v27, 6 }
 0x41e   : > { %v6604_v18 = vpop.permute.xlu1 %2344  ;;  %v6638_v25 = vpop.permute.xlu0 %2325 }
 0x422   : > { %4664 = vset.pattern.permute.xlu2 %v7869_v46 }
 0x424   : > { %2507 = vperm.xlu1 %4661, %v2502_v12   ;;  %2422 = vperm.xlu0 %4699, %v7877_v2   ;;  %v2723_v12 = vperm.slane %v7879_v16, 7 }
 0x426   : > { %v6647_v59 = vpop.permute.xlu0 %2390 }
 0x42a   : > { %2533 = vperm.xlu2 %4664, %v2528_v5  }
 0x42c   : > { %4663 = vset.pattern.permute.xlu1 %v7866_v19  ;;  %2487 = vperm.xlu0 %4699, %v2476_v6   ;;  %v6576_v6 = vpop.permute.xlu2 %2351 }
 0x42e   : > { %v6611_v53 = vpop.permute.xlu1 %2364  ;;  %v6656_v30 = vpop.permute.xlu0 %2455 }
 0x432   : > { %2546 = vperm.xlu2 %4664, %v2541_v34  }
 0x434   : > { %2526 = vperm.xlu1 %4663, %v7878_v63   ;;  %2552 = vperm.xlu0 %4699, %v2541_v34   ;;  %v6582_v0 = vpop.permute.xlu2 %2370  ;;  %v7885_v63 = vperm.slane %v7879_v16, 6  ;;  %v2762_v16 = vperm.slane %v7880_v31, 2 }
 0x436   : > { %v6618_v10 = vpop.permute.xlu1 %2377  ;;  %v6664_v4 = vpop.permute.xlu0 %2520 }
 0x43a   : > { %4666 = vset.pattern.permute.xlu2 %v7866_v19 }
 0x43c   : > { %2539 = vperm.xlu1 %4663, %v2528_v5   ;;  %2617 = vperm.xlu0 %4699, %v2606_v61   ;;  %v6589_v29 = vpop.permute.xlu2 %2383 }
 0x43e   : > { %v6675_v34 = vpop.permute.xlu0 %2585 }
 0x43f   : > { %7884 = vst [vmem:[#allocation50_spill] sm:$0xff] %v6675_v34 }
 0x442   : > { %2565 = vperm.xlu2 %4666, %v2554_v40  }
 0x444   : > { %4665 = vset.pattern.permute.xlu1 %v7869_v46  ;;  %2682 = vperm.xlu0 %4699, %v2671_v58   ;;  %v6598_v47 = vpop.permute.xlu2 %2403 }
 0x446   : > { %v6624_v36 = vpop.permute.xlu1 %2396 }
 0x44a   : > { %2578 = vperm.xlu2 %4666, %v2567_v23  }
 0x44c   : > { %2559 = vperm.xlu1 %4665, %v2554_v40   ;;  %2747 = vperm.xlu0 %4699, %v2736_v50   ;;  %v6607_v20 = vpop.permute.xlu2 %2416 }
 0x44e   : > { %v6629_v38 = vpop.permute.xlu1 %2409 }
 0x452   : > { %4668 = vset.pattern.permute.xlu2 %v7869_v46 }
 0x454   : > { %2572 = vperm.xlu1 %4665, %v2567_v23   ;;  %2812 = vperm.xlu0 %4699, %v2801_v55   ;;  %v6616_v60 = vpop.permute.xlu2 %2435  ;;  %v2749_v23 = vperm.slane %v7880_v31, 1 }
 0x45a   : > { %2598 = vperm.xlu2 %4668, %v2593_v52  }
 0x45c   : > { %4667 = vset.pattern.permute.xlu1 %v7866_v19  ;;  %2877 = vperm.xlu0 %4699, %v7753_v45   ;;  %v6621_v9 = vpop.permute.xlu2 %2448 }
 0x45e   : > { %v6635_v56 = vpop.permute.xlu1 %2429 }
 0x462   : > { %2611 = vperm.xlu2 %4668, %v2606_v61  }
 0x464   : > { %2591 = vperm.xlu1 %4667, %v7881_v14   ;;  %2942 = vperm.xlu0 %4699, %v7751_v32   ;;  %v6626_v8 = vpop.permute.xlu2 %2468 }
 0x466   : > { %v6643_v49 = vpop.permute.xlu1 %2442 }
 0x46a   : > { %4670 = vset.pattern.permute.xlu2 %v7866_v19 }
 0x46c   : > { %2604 = vperm.xlu1 %4667, %v2593_v52   ;;  %3007 = vperm.xlu0 %4699, %v7749_v39   ;;  %v6633_v13 = vpop.permute.xlu2 %2481 }
 0x472   : > { %2630 = vperm.xlu2 %4670, %v2619_v48  }
 0x474   : > { %4669 = vset.pattern.permute.xlu1 %v7869_v46  ;;  %3072 = vperm.xlu0 %4699, %v7747_v35   ;;  %v6640_v26 = vpop.permute.xlu2 %2500 }
 0x476   : > { %v6654_v3 = vpop.permute.xlu1 %2461 }
 0x47a   : > { %2643 = vperm.xlu2 %4670, %v2632_v37  }
 0x47c   : > { %2624 = vperm.xlu1 %4669, %v2619_v48   ;;  %3137 = vperm.xlu0 %4699, %v7745_v11   ;;  %v6652_v44 = vpop.permute.xlu2 %2513 }
 0x47e   : > { %v6661_v51 = vpop.permute.xlu1 %2474 }
 0x482   : > { %4672 = vset.pattern.permute.xlu2 %v7869_v46 }
 0x484   : > { %2637 = vperm.xlu1 %4669, %v2632_v37   ;;  %v6658_v1 = vpop.permute.xlu2 %2533 }
 0x48a   : > { %2663 = vperm.xlu2 %4672, %v2658_v42  }
 0x48c   : > { %4671 = vset.pattern.permute.xlu1 %v7866_v19  ;;  %v6666_v24 = vpop.permute.xlu2 %2546 }
 0x48e   : > { %v6669_v2 = vpop.permute.xlu1 %2494 }
 0x492   : > { %2676 = vperm.xlu2 %4672, %v2671_v58   ;;  %v6684_v58 = vpop.permute.xlu0 %2650 }
 0x493   : > { %7887 = vst [vmem:[#allocation16_spill] sm:$0xff] %v6684_v58 }
 0x494   : > { %2656 = vperm.xlu1 %4671, %v7882_v41  }
 0x496   : > { %v6679_v61 = vpop.permute.xlu1 %2507 }
 0x49a   : > { %4674 = vset.pattern.permute.xlu2 %v7866_v19  ;;  %v6693_v14 = vpop.permute.xlu0 %2715 }
 0x49b   : > { %7889 = vst [vmem:[#allocation15_spill] sm:$0xff] %v6693_v14  ;;  %v2853_v14 = vperm.slane %v6369_v21, 1 }
 0x49c   : > { %2669 = vperm.xlu1 %4671, %v2658_v42   ;;  %v6673_v5 = vpop.permute.xlu2 %2565 }
 0x49d   : > { %7883 = vst [vmem:[#allocation43_spill] sm:$0xff] %v6673_v5 }
 0x4a2   : > { %2695 = vperm.xlu2 %4674, %v2684_v57   ;;  %v6699_v42 = vpop.permute.xlu0 %2780 }
 0x4a4   : > { %4673 = vset.pattern.permute.xlu1 %v7869_v46  ;;  %v6682_v40 = vpop.permute.xlu2 %2578 }
 0x4a5   : > { %7886 = vst [vmem:[#allocation14_spill] sm:$0xff] %v6682_v40 }
 0x4a6   : > { %v6687_v52 = vpop.permute.xlu1 %2526 }
 0x4aa   : > { %2708 = vperm.xlu2 %4674, %v2697_v28  }
 0x4ac   : > { %2689 = vperm.xlu1 %4673, %v2684_v57   ;;  %v2788_v57 = vperm.slane %v7880_v31, 4 }
 0x4ae   : > { %v6695_v48 = vpop.permute.xlu1 %2539 }
 0x4af   : > { %7890 = vst [vmem:[#allocation47_spill] sm:$0xff] %v6695_v48 }
 0x4b2   : > { %4676 = vset.pattern.permute.xlu2 %v7869_v46 }
 0x4b4   : > { %2702 = vperm.xlu1 %4673, %v2697_v28  }
 0x4ba   : > { %2728 = vperm.xlu2 %4676, %v2723_v12  }
 0x4bc   : > { %4675 = vset.pattern.permute.xlu1 %v7866_v19 }
 0x4be   : > { %v6701_v41 = vpop.permute.xlu1 %2559 }
 0x4c2   : > { %2741 = vperm.xlu2 %4676, %v2736_v50   ;;  %v6690_v50 = vpop.permute.xlu2 %2598 }
 0x4c3   : > { %7888 = vst [vmem:[#allocation45_spill] sm:$0xff] %v6690_v50 }
 0x4c4   : > { %2721 = vperm.xlu1 %4675, %v7885_v63  }
 0x4c6   : > { %v6709_v63 = vpop.permute.xlu1 %2572 }
 0x4ca   : > { %4678 = vset.pattern.permute.xlu2 %v7866_v19  ;;  %v6697_v37 = vpop.permute.xlu2 %2611 }
 0x4cb   : > { %7891 = vst [vmem:[#allocation20_spill] sm:$0xff] %v6697_v37 }
 0x4cc   : > { %2734 = vperm.xlu1 %4675, %v2723_v12   ;;  %v6707_v12 = vpop.permute.xlu0 %2845 }
 0x4d2   : > { %2760 = vperm.xlu2 %4678, %v2749_v23   ;;  %v6705_v28 = vpop.permute.xlu2 %2630 }
 0x4d3   : > { %7892 = vst [vmem:[#allocation49_spill] sm:$0xff] %v6705_v28 }
 0x4d4   : > { %4677 = vset.pattern.permute.xlu1 %v7869_v46  ;;  %v6720_v11 = vpop.permute.xlu0 %2910 }
 0x4da   : > { %2773 = vperm.xlu2 %4678, %v2762_v16   ;;  %v6716_v33 = vpop.permute.xlu2 %2643 }
 0x4db   : > { %7894 = vst [vmem:[#allocation48_spill] sm:$0xff] %v6716_v33 }
 0x4dc   : > { %2754 = vperm.xlu1 %4677, %v2749_v23   ;;  %v6714_v23 = vpop.permute.xlu1 %2591  ;;  %v6728_v39 = vpop.permute.xlu0 %2975 }
 0x4dd   : > { %7893 = vst [vmem:[#allocation19_spill] sm:$0xff] %v6714_v23 }
 0x4e2   : > { %4680 = vset.pattern.permute.xlu2 %v7869_v46 }
 0x4e4   : > { %2767 = vperm.xlu1 %4677, %v2762_v16   ;;  %v7895_v16 = vperm.slane %v7880_v31, 3  ;;  %v6723_v15 = vpop.permute.xlu1 %2604  ;;  %v6725_v35 = vpop.permute.xlu2 %2663 }
 0x4e5   : > { %7896 = vst [vmem:[#allocation13_spill] sm:$0xff] %v6723_v15  ;;  %v6736_v32 = vpop.permute.xlu0 %3040 }
 0x4e6   : > { %7897 = vst [vmem:[#allocation35_spill] sm:$0xff] %v6725_v35  ;;  %v7908_v35 = vperm.slane %v6369_v21, 0 }
 0x4e7   : > { %7900 = vst [vmem:[#allocation18_spill] sm:$0xff] %v6736_v32 }
 0x4ea   : > { %2793 = vperm.xlu2 %4680, %v2788_v57  }
 0x4ec   : > { %4679 = vset.pattern.permute.xlu1 %v7866_v19  ;;  %v6734_v22 = vpop.permute.xlu2 %2676 }
 0x4ed   : > { %7899 = vst [vmem:[#allocation26_spill] sm:$0xff] %v6734_v22  ;;  %v6743_v45 = vpop.permute.xlu0 %3105 }
 0x4ee   : > { %7903 = vst [vmem:[#allocation38_spill] sm:$0xff] %v6743_v45 }
 0x4f2   : > { %2806 = vperm.xlu2 %4680, %v2801_v55   ;;  %v6731_v55 = vpop.permute.xlu1 %2624 }
 0x4f3   : > { %7898 = vst [vmem:[#allocation24_spill] sm:$0xff] %v6731_v55  ;;  %v7917_v55 = vperm.slane %v6369_v21, 7 }
 0x4f4   : > { %2786 = vperm.xlu1 %4679, %v7895_v16   ;;  %v2827_v16 = vperm.slane %v7880_v31, 7 }
 0x4f5   : > { %v2358_v31 = vpop.permute.xlu0 %2357 }
 0x4fa   : > { %4682 = vset.pattern.permute.xlu2 %v7866_v19 }
 0x4fc   : > { %2799 = vperm.xlu1 %4679, %v2788_v57   ;;  %v6738_v57 = vpop.permute.xlu1 %2637  ;;  %v6740_v54 = vpop.permute.xlu2 %2695 }
 0x4fd   : > { %7901 = vst [vmem:[#allocation42_spill] sm:$0xff] %v6738_v57  ;;  %v7907_v57 = vperm.slane %v6369_v21, 2  ;;  %v6757_v45 = vpop.permute.xlu0 %2422 }
 0x4fe   : > { %7902 = vst [vmem:[#allocation17_spill] sm:$0xff] %v6740_v54 }
 0x502   : > { %2825 = vperm.xlu2 %4682, %v2814_v7  }
 0x504   : > { %4681 = vset.pattern.permute.xlu1 %v7869_v46  ;;  %v6748_v22 = vpop.permute.xlu2 %2708 }
 0x505   : > { %7905 = vst [vmem:[#allocation44_spill] sm:$0xff] %v6748_v22  ;;  %v2879_v22 = vperm.slane %v6369_v21, 3  ;;  %v6765_v33 = vpop.permute.xlu0 %2487 }
 0x506   : > { %v6746_v58 = vpop.permute.xlu1 %2656 }
 0x507   : > { %7904 = vst [vmem:[#allocation23_spill] sm:$0xff] %v6746_v58 }
 0x50a   : > { %2838 = vperm.xlu2 %4682, %v2827_v16  }
 0x50c   : > { %2819 = vperm.xlu1 %4681, %v2814_v7  }
 0x50d   : > { %v6771_v15 = vpop.permute.xlu0 %2552 }
 0x50e   : > { %v6751_v7 = vpop.permute.xlu1 %2669  ;;  %7912 = vst [vmem:[#allocation37_spill] sm:$0xff] %v6771_v15  ;;  %v7918_v15 = vperm.slane %v6369_v21, 5 }
 0x50f   : > { %7906 = vst [vmem:[#allocation33_spill] sm:$0xff] %v6751_v7 }
 0x512   : > { %4684 = vset.pattern.permute.xlu2 %v7869_v46 }
 0x514   : > { %2832 = vperm.xlu1 %4681, %v2827_v16   ;;  %v6759_v16 = vpop.permute.xlu2 %2728 }
 0x515   : > { %7909 = vst [vmem:[#allocation41_spill] sm:$0xff] %v6759_v16 }
 0x51a   : > { %2858 = vperm.xlu2 %4684, %v2853_v14  }
 0x51c   : > { %4683 = vset.pattern.permute.xlu1 %v7866_v19  ;;  %v2742_v7 = vpop.permute.xlu2 %2741 }
 0x51d   : > { %v3152_v32 = vsel %vm1043_vm0, %v6638_v25, %v2742_v7 }
 0x51e   : > { %v6761_v54 = vpop.permute.xlu1 %2689 }
 0x51f   : > { %7910 = vst [vmem:[#allocation29_spill] sm:$0xff] %v6761_v54  ;;  %v6776_v54 = vpop.permute.xlu0 %2617 }
 0x520   : > { %7914 = vst [vmem:[#allocation36_spill] sm:$0xff] %v6776_v54 }
 0x522   : > { %2871 = vperm.xlu2 %4684, %v7907_v57  }
 0x524   : > { %2851 = vperm.xlu1 %4683, %v7908_v35   ;;  %v2892_v35 = vperm.slane %v6369_v21, 4 }
 0x526   : > { %v6767_v28 = vpop.permute.xlu1 %2702 }
 0x527   : > { %7911 = vst [vmem:[#allocation32_spill] sm:$0xff] %v6767_v28  ;;  %v2918_v28 = vperm.slane %v6369_v21, 6  ;;  %v6784_v37 = vpop.permute.xlu0 %2682 }
 0x528   : > { %7916 = vst [vmem:[#allocation28_spill] sm:$0xff] %v6784_v37 }
 0x52a   : > { %4686 = vset.pattern.permute.xlu2 %v7866_v19 }
 0x52c   : > { %2864 = vperm.xlu1 %4683, %v2853_v14   ;;  %v2761_v57 = vpop.permute.xlu2 %2760 }
 0x532   : > { %2890 = vperm.xlu2 %4686, %v2879_v22  }
 0x534   : > { %4685 = vset.pattern.permute.xlu1 %v7869_v46  ;;  %v2774_v14 = vpop.permute.xlu2 %2773 }
 0x536   : > { %v6773_v16 = vpop.permute.xlu1 %2721 }
 0x537   : > { %7913 = vst [vmem:[#allocation30_spill] sm:$0xff] %v6773_v16 }
 0x53a   : > { %2903 = vperm.xlu2 %4686, %v2892_v35  }
 0x53c   : > { %2884 = vperm.xlu1 %4685, %v2879_v22   ;;  %v3158_v22 = vsel %vm1043_vm0, %v6611_v53, %v6699_v42  ;;  %v7919_v53 = vld [vmem:[#allocation46_spill] sm:$0xff] }
 0x53d   : > { %v3228_v50 = vrot.slane %v3158_v22, 4 }
 0x53e   : > { %v6778_v58 = vpop.permute.xlu1 %2734 }
 0x53f   : > { %7915 = vst [vmem:[#allocation27_spill] sm:$0xff] %v6778_v58 }
 0x542   : > { %4688 = vset.pattern.permute.xlu2 %v7869_v46 }
 0x544   : > { %2897 = vperm.xlu1 %4685, %v2892_v35   ;;  %v6781_v23 = vpop.permute.xlu2 %2793 }
 0x54a   : > { %2923 = vperm.xlu2 %4688, %v2918_v28  }
 0x54c   : > { %4687 = vset.pattern.permute.xlu1 %v7866_v19  ;;  %v6796_v40 = vpop.permute.xlu2 %2806 }
 0x54e   : > { %v2755_v34 = vpop.permute.xlu1 %2754 }
 0x54f   : > { %v3154_v16 = vsel %vm1043_vm0, %v6569_v43, %v2755_v34  ;;  %v3218_v43 = vrot.slane %v3152_v32, 4 }
 0x550   : > { %v3230_v35 = vrot.slane %v3154_v16, 4  ;;  %v3229_v37 = vsel %vm1109_vm1, %v3228_v50, %v3154_v16 }
 0x551   : > { %v3235_v5 = vperm.slane %v3229_v37, %v7919_v53 }
 0x552   : > { %v3231_v58 = vsel %vm1109_vm1, %v3158_v22, %v3230_v35  ;;  %2936 = vperm.xlu2 %4688, %v7917_v55   ;;  %v2748_v55 = vpop.permute.xlu0 %2747 }
 0x553   : > { %v3239_v42 = vperm.slane %v3231_v58, %v7919_v53  ;;  %v3264_v21 = vrot.slane %v3235_v5, 4 }
 0x554   : > { %2916 = vperm.xlu1 %4687, %v7918_v15  }
 0x555   : > { %v3276_v7 = vrot.slane %v3239_v42, 4 }
 0x556   : > { %v2768_v34 = vpop.permute.xlu1 %2767 }
 0x557   : > { %v3156_v22 = vsel %vm1043_vm0, %v6576_v6, %v2768_v34  ;;  %v3157_v6 = vsel %vm1043_vm0, %v2358_v31, %v2774_v14 }
 0x558   : > { %v3216_v35 = vrot.slane %v3156_v22, 4  ;;  %v3219_v25 = vsel %vm1109_vm1, %v3156_v22, %v3218_v43  ;;  %v3153_v43 = vsel %vm1043_vm0, %v6592_v17, %v2748_v55  ;;  %v3155_v17 = vsel %vm1043_vm0, %v6604_v18, %v2761_v57 }
 0x559   : > { %v3227_v54 = vperm.slane %v3219_v25, %v7919_v53  ;;  %v3440_v25 = vrot.slane %v3157_v6, 4  ;;  %v2957_v18 = vperm.slane %v6358_v62, 1 }
 0x55a   : > { %v3217_v50 = vsel %vm1109_vm1, %v3216_v35, %v3152_v32  ;;  %4690 = vset.pattern.permute.xlu2 %v7866_v19  ;;  %v2944_v35 = vperm.slane %v6358_v62, 0  ;;  %v2813_v31 = vpop.permute.xlu0 %2812 }
 0x55b   : > { %v3223_v15 = vperm.slane %v3217_v50, %v7919_v53  ;;  %v6811_v58 = vsel %vm1109_vm1, %v3276_v7, %v3227_v54  ;;  %v3278_v37 = vrot.slane %v3227_v54, 4  ;;  %v3442_v54 = vrot.slane %v3153_v43, 4 }
 0x55c   : > { %v2826_v16 = vpop.permute.xlu2 %2825  ;;  %2929 = vperm.xlu1 %4687, %v2918_v28   ;;  %v3441_v14 = vsel %vm1109_vm1, %v3440_v25, %v3153_v43 }
 0x55d   : > { %v3266_v34 = vrot.slane %v3223_v15, 4  ;;  %v6817_v22 = vsel %vm1109_vm1, %v3264_v21, %v3223_v15  ;;  %v6820_v32 = vsel %vm1109_vm1, %v3239_v42, %v3278_v37  ;;  %v3443_v28 = vsel %vm1109_vm1, %v3157_v6, %v3442_v54 }
 0x55e   : > { %v3163_v42 = vsel %vm1043_vm0, %v6624_v36, %v2813_v31  ;;  %v3451_v50 = vperm.slane %v3443_v28, %v7919_v53  ;;  %v3454_v21 = vrot.slane %v3155_v17, 4  ;;  %v3447_v15 = vperm.slane %v3441_v14, %v7919_v53 }
 0x55f   : > { %v6824_v7 = vsel %vm1109_vm1, %v3235_v5, %v3266_v34  ;;  %v3478_v25 = vrot.slane %v3163_v42, 4 }
 0x560   : > { %v3502_v36 = vrot.slane %v3451_v50, 4  ;;  %v3490_v31 = vrot.slane %v3447_v15, 4 }
 0x562   : > { %2955 = vperm.xlu2 %4690, %v2944_v35  }
 0x564   : > { %v2839_v55 = vpop.permute.xlu2 %2838  ;;  %4689 = vset.pattern.permute.xlu1 %v7869_v46 }
 0x565   : > { %v3167_v5 = vsel %vm1043_vm0, %v6757_v45, %v2839_v55  ;;  %v3165_v45 = vsel %vm1043_vm0, %v6629_v38, %v2826_v16 }
 0x566   : > { %v3476_v37 = vrot.slane %v3167_v5, 4  ;;  %v2787_v6 = vpop.permute.xlu1 %2786  ;;  %v3479_v55 = vsel %vm1109_vm1, %v3167_v5, %v3478_v25  ;;  %v3464_v16 = vrot.slane %v3165_v45, 4 }
 0x567   : > { %v3159_v57 = vsel %vm1043_vm0, %v6582_v0, %v2787_v6 }
 0x568   : > { %v3452_v43 = vrot.slane %v3159_v57, 4  ;;  %v3455_v34 = vsel %vm1109_vm1, %v3159_v57, %v3454_v21  ;;  %v3477_v28 = vsel %vm1109_vm1, %v3476_v37, %v3163_v42  ;;  %v3487_v42 = vperm.slane %v3479_v55, %v7919_v53 }
 0x569   : > { %v3463_v54 = vperm.slane %v3455_v34, %v7919_v53  ;;  %v3483_v57 = vperm.slane %v3477_v28, %v7919_v53 }
 0x56a   : > { %v3453_v14 = vsel %vm1109_vm1, %v3452_v43, %v3155_v17  ;;  %2968 = vperm.xlu2 %4690, %v2957_v18  }
 0x56b   : > { %v3459_v0 = vperm.slane %v3453_v14, %v7919_v53  ;;  %v3500_v6 = vrot.slane %v3463_v54, 4  ;;  %v3503_v21 = vsel %vm1109_vm1, %v3463_v54, %v3502_v36  ;;  %v3512_v54 = vrot.slane %v3483_v57, 4 }
 0x56c   : > { %2949 = vperm.xlu1 %4689, %v2944_v35   ;;  %v7920_v35 = vld [vmem:[#allocation51_spill] sm:$0xff] }
 0x56d   : > { %v3488_v34 = vrot.slane %v3459_v0, 4  ;;  %v3501_v48 = vsel %vm1109_vm1, %v3500_v6, %v3451_v50  ;;  %v3491_v38 = vsel %vm1109_vm1, %v3459_v0, %v3490_v31  ;;  %v3524_v50 = vrot.slane %v3487_v42, 4 }
 0x56e   : > { %v2800_v17 = vpop.permute.xlu1 %2799  ;;  %v3507_v14 = vperm.slane %v3501_v48, %v7920_v35  ;;  %v3511_v55 = vperm.slane %v3503_v21, %v7920_v35  ;;  %v3499_v6 = vperm.slane %v3491_v38, %v7920_v35 }
 0x56f   : > { %v3161_v5 = vsel %vm1043_vm0, %v6589_v29, %v2800_v17  ;;  %v3489_v37 = vsel %vm1109_vm1, %v3488_v34, %v3447_v15 }
 0x570   : > { %v3465_v43 = vsel %vm1109_vm1, %v3464_v16, %v3161_v5  ;;  %v3466_v25 = vrot.slane %v3161_v5, 4  ;;  %v3495_v36 = vperm.slane %v3489_v37, %v7920_v35 }
 0x571   : > { %v3471_v28 = vperm.slane %v3465_v43, %v7919_v53 }
 0x572   : > { %v3467_v31 = vsel %vm1109_vm1, %v3165_v45, %v3466_v25  ;;  %4692 = vset.pattern.permute.xlu2 %v7869_v46  ;;  %v3538_v16 = vrot.slane %v3495_v36, 4  ;;  %v2983_v45 = vperm.slane %v6358_v62, 3  ;;  %v3546_v25 = vrot.slane %v3507_v14, 4 }
 0x573   : > { %v3475_v29 = vperm.slane %v3467_v31, %v7919_v53  ;;  %v3514_v15 = vrot.slane %v3471_v28, 4  ;;  %v3513_v0 = vsel %vm1109_vm1, %v3512_v54, %v3471_v28  ;;  %v3550_v28 = vrot.slane %v3511_v55, 4 }
 0x574   : > { %2962 = vperm.xlu1 %4689, %v2957_v18   ;;  %v3519_v34 = vperm.slane %v3513_v0, %v7920_v35  ;;  %v3542_v18 = vrot.slane %v3499_v6, 4 }
 0x575   : > { %v3526_v17 = vrot.slane %v3475_v29, 4  ;;  %v3525_v5 = vsel %vm1109_vm1, %v3524_v50, %v3475_v29  ;;  %v3515_v48 = vsel %vm1109_vm1, %v3483_v57, %v3514_v15 }
 0x576   : > { %v6871_v21 = vsel %vm1109_vm1, %v3519_v34, %v3538_v16  ;;  %v3536_v37 = vrot.slane %v3519_v34, 4  ;;  %v3531_v43 = vperm.slane %v3525_v5, %v7920_v35  ;;  %v3523_v38 = vperm.slane %v3515_v48, %v7920_v35  ;;  %v6886_v34 = vpop.permute.xlu2 %2858 }
 0x577   : > { %v3527_v54 = vsel %vm1109_vm1, %v3487_v42, %v3526_v17  ;;  %v3160_v17 = vsel %vm1043_vm0, %v6618_v10, %v6781_v23  ;;  %v7924_v10 = vperm.slane %v6358_v62, 4  ;;  %v3162_v23 = vsel %vm1043_vm0, %v6647_v59, %v6796_v40 }
 0x578   : > { %v6877_v31 = vsel %vm1109_vm1, %v3536_v37, %v3495_v36  ;;  %v3544_v0 = vrot.slane %v3531_v43, 4  ;;  %v3535_v50 = vperm.slane %v3527_v54, %v7920_v35  ;;  %v6881_v57 = vsel %vm1109_vm1, %v3531_v43, %v3546_v25 }
 0x579   : > { %7921 = vst [vmem:[#allocation31_spill] sm:$0xff] %v6881_v57  ;;  %v3540_v29 = vrot.slane %v3523_v38, 4  ;;  %v6884_v15 = vsel %vm1109_vm1, %v3523_v38, %v3542_v18  ;;  %v3242_v37 = vrot.slane %v3160_v17, 4  ;;  %v3287_v59 = vperm.slane %v6820_v32, %v7920_v35 }
 0x57a   : > { %2988 = vperm.xlu2 %4692, %v2983_v45   ;;  %v6889_v16 = vsel %vm1109_vm1, %v3544_v0, %v3507_v14  ;;  %v6892_v42 = vsel %vm1109_vm1, %v3535_v50, %v3550_v28  ;;  %v3548_v36 = vrot.slane %v3535_v50, 4 }
 0x57b   : > { %7922 = vst [vmem:[#allocation34_spill] sm:$0xff] %v6892_v42  ;;  %v6898_v5 = vsel %vm1109_vm1, %v3540_v29, %v3499_v6 }
 0x57c   : > { %4691 = vset.pattern.permute.xlu1 %v7866_v19  ;;  %v6902_v48 = vsel %vm1109_vm1, %v3548_v36, %v3511_v55  ;;  %v7925_v55 = vperm.slane %v6358_v62, 2 }
 0x57d   : > { %7923 = vst [vmem:[#allocation22_spill] sm:$0xff] %v6902_v48 }
 0x57e   : > { %v2820_v43 = vpop.permute.xlu1 %2819  ;;  %v6913_v6 = vpop.permute.xlu2 %2871 }
 0x57f   : > { %v3164_v14 = vsel %vm1043_vm0, %v6598_v47, %v2820_v43  ;;  %v3254_v47 = vrot.slane %v3162_v23, 4 }
 0x580   : > { %v3240_v25 = vrot.slane %v3164_v14, 4  ;;  %v3243_v38 = vsel %vm1109_vm1, %v3164_v14, %v3242_v37  ;;  %v3275_v37 = vperm.slane %v6824_v7, %v7920_v35  ;;  %v3271_v14 = vperm.slane %v6817_v22, %v7920_v35 }
 0x581   : > { %v3251_v54 = vperm.slane %v3243_v38, %v7919_v53 }
 0x582   : > { %v3241_v18 = vsel %vm1109_vm1, %v3240_v25, %v3160_v17  ;;  %3001 = vperm.xlu2 %4692, %v7924_v10  }
 0x583   : > { %v3247_v0 = vperm.slane %v3241_v18, %v7919_v53  ;;  %v3302_v40 = vrot.slane %v3251_v54, 4 }
 0x584   : > { %2981 = vperm.xlu1 %4691, %v7925_v55   ;;  %v3326_v55 = vrot.slane %v3287_v59, 4 }
 0x585   : > { %v3290_v25 = vrot.slane %v3247_v0, 4 }
 0x586   : > { %v2833_v28 = vpop.permute.xlu1 %2832 }
 0x587   : > { %v3166_v50 = vsel %vm1043_vm0, %v6607_v20, %v2833_v28  ;;  %v3283_v20 = vperm.slane %v6811_v58, %v7920_v35  ;;  %v3318_v28 = vrot.slane %v3275_v37, 4 }
 0x588   : > { %v3252_v29 = vrot.slane %v3166_v50, 4  ;;  %v3255_v36 = vsel %vm1109_vm1, %v3166_v50, %v3254_v47  ;;  %v3009_v50 = vperm.slane %v6358_v62, 5 }
 0x589   : > { %v3263_v17 = vperm.slane %v3255_v36, %v7919_v53 }
 0x58a   : > { %v3253_v43 = vsel %vm1109_vm1, %v3252_v29, %v3162_v23  ;;  %4694 = vset.pattern.permute.xlu2 %v7866_v19 }
 0x58b   : > { %v3259_v38 = vperm.slane %v3253_v43, %v7919_v53  ;;  %v3300_v32 = vrot.slane %v3263_v17, 4  ;;  %v3303_v18 = vsel %vm1109_vm1, %v3263_v17, %v3302_v40  ;;  %v3314_v17 = vrot.slane %v3271_v14, 4 }
 0x58c   : > { %v2891_v10 = vpop.permute.xlu2 %2890  ;;  %2994 = vperm.xlu1 %4691, %v2983_v45   ;;  %v3311_v7 = vperm.slane %v3303_v18, %v7920_v35  ;;  %v3322_v45 = vrot.slane %v3283_v20, 4 }
 0x58d   : > { %v3288_v23 = vrot.slane %v3259_v38, 4  ;;  %v3291_v47 = vsel %vm1109_vm1, %v3259_v38, %v3290_v25  ;;  %v3301_v22 = vsel %vm1109_vm1, %v3300_v32, %v3251_v54 }
 0x58e   : > { %v3299_v58 = vperm.slane %v3291_v47, %v7920_v35  ;;  %v3324_v29 = vrot.slane %v3311_v7, 4  ;;  %v3307_v36 = vperm.slane %v3301_v22, %v7920_v35  ;;  %v6943_v43 = vsel %vm1109_vm1, %v3311_v7, %v3326_v55  ;;  %v2878_v22 = vpop.permute.xlu0 %2877 }
 0x58f   : > { %v3289_v40 = vsel %vm1109_vm1, %v3288_v23, %v3247_v0 }
 0x590   : > { %v3316_v18 = vrot.slane %v3299_v58, 4  ;;  %v3295_v25 = vperm.slane %v3289_v40, %v7920_v35  ;;  %v6947_v38 = vsel %vm1109_vm1, %v3299_v58, %v3318_v28  ;;  %v6950_v54 = vsel %vm1109_vm1, %v3324_v29, %v3287_v59 }
 0x591   : > { %v6953_v32 = vsel %vm1109_vm1, %v3307_v36, %v3322_v45  ;;  %v3320_v47 = vrot.slane %v3307_v36, 4  ;;  %v3173_v58 = vsel %vm1043_vm0, %v6654_v3, %v2878_v22  ;;  %v3022_v36 = vperm.slane %v6358_v62, 6 }
 0x592   : > { %3020 = vperm.xlu2 %4694, %v3009_v50   ;;  %v6956_v0 = vsel %vm1109_vm1, %v3316_v18, %v3275_v37  ;;  %v6959_v7 = vsel %vm1109_vm1, %v3295_v25, %v3314_v17  ;;  %v3312_v55 = vrot.slane %v3295_v25, 4  ;;  %v3552_v40 = vrot.slane %v3173_v58, 4 }
 0x593   : > { %v6962_v23 = vsel %vm1109_vm1, %v3320_v47, %v3283_v20  ;;  %v3175_v3 = vsel %vm1043_vm0, %v6661_v51, %v2891_v10 }
 0x594   : > { %4693 = vset.pattern.permute.xlu1 %v7869_v46  ;;  %v2904_v59 = vpop.permute.xlu2 %2903  ;;  %v6966_v28 = vsel %vm1109_vm1, %v3312_v55, %v3271_v14  ;;  %v3564_v18 = vrot.slane %v3175_v3, 4 }
 0x595   : > { %7926 = vst [vmem:[#allocation25_spill] sm:$0xff] %v6966_v28  ;;  %v6972_v37 = vsel %vm1043_vm0, %v6765_v33, %v2904_v59 }
 0x596   : > { %v2852_v29 = vpop.permute.xlu1 %2851 }
 0x597   : > { %v3169_v20 = vsel %vm1043_vm0, %v6616_v60, %v2852_v29 }
 0x598   : > { %v3554_v17 = vrot.slane %v3169_v20, 4  ;;  %v3553_v45 = vsel %vm1109_vm1, %v3552_v40, %v3169_v20 }
 0x599   : > { %v3559_v33 = vperm.slane %v3553_v45, %v7919_v53 }
 0x59a   : > { %v3555_v14 = vsel %vm1109_vm1, %v3173_v58, %v3554_v17  ;;  %3033 = vperm.xlu2 %4694, %v3022_v36  }
 0x59b   : > { %v3563_v47 = vperm.slane %v3555_v14, %v7919_v53  ;;  %v3602_v59 = vrot.slane %v3559_v33, 4 }
 0x59c   : > { %3014 = vperm.xlu1 %4693, %v3009_v50  }
 0x59d   : > { %v3614_v51 = vrot.slane %v3563_v47, 4 }
 0x59e   : > { %v2865_v25 = vpop.permute.xlu1 %2864 }
 0x59f   : > { %v3171_v60 = vsel %vm1043_vm0, %v6621_v9, %v2865_v25  ;;  %v3168_v9 = vsel %vm1043_vm0, %v6635_v56, %v6707_v12  ;;  %v3170_v12 = vsel %vm1043_vm0, %v6643_v49, %v6886_v34 }
 0x5a0   : > { %v3565_v22 = vsel %vm1109_vm1, %v3564_v18, %v3171_v60  ;;  %v3566_v55 = vrot.slane %v3171_v60, 4  ;;  %v3172_v18 = vsel %vm1043_vm0, %v6656_v30, %v6913_v6  ;;  %v3178_v6 = vsel %vm1043_vm0, %v6669_v2, %v6720_v11 }
 0x5a1   : > { %v3571_v58 = vperm.slane %v3565_v22, %v7919_v53  ;;  %v3328_v60 = vrot.slane %v3172_v18, 4 }
 0x5a2   : > { %v3567_v29 = vsel %vm1109_vm1, %v3175_v3, %v3566_v55  ;;  %4696 = vset.pattern.permute.xlu2 %v7869_v46  ;;  %v3048_v3 = vperm.slane %v6395_v27, 0 }
 0x5a3   : > { %v3575_v10 = vperm.slane %v3567_v29, %v7919_v53  ;;  %v3600_v50 = vrot.slane %v3571_v58, 4  ;;  %v6991_v20 = vsel %vm1109_vm1, %v3571_v58, %v3602_v59  ;;  %v3329_v55 = vsel %vm1109_vm1, %v3328_v60, %v3168_v9 }
 0x5a4   : > { %v2924_v40 = vpop.permute.xlu2 %2923  ;;  %3027 = vperm.xlu1 %4693, %v3022_v36   ;;  %v3330_v36 = vrot.slane %v3168_v9, 4 }
 0x5a5   : > { %v3612_v17 = vrot.slane %v3575_v10, 4  ;;  %v6997_v45 = vsel %vm1109_vm1, %v3600_v50, %v3559_v33  ;;  %v7000_v14 = vsel %vm1109_vm1, %v3575_v10, %v3614_v51  ;;  %v3366_v51 = vrot.slane %v3178_v6, 4 }
 0x5a6   : > { %v3331_v56 = vsel %vm1109_vm1, %v3172_v18, %v3330_v36  ;;  %v3335_v10 = vperm.slane %v3329_v55, %v7919_v53  ;;  %v3180_v11 = vsel %vm1043_vm0, %v6679_v61, %v2924_v40 }
 0x5a7   : > { %v7007_v25 = vsel %vm1109_vm1, %v3612_v17, %v3563_v47  ;;  %v3339_v22 = vperm.slane %v3331_v56, %v7919_v53  ;;  %v3342_v47 = vrot.slane %v3170_v12, 4  ;;  %v7927_v17 = vperm.slane %v6395_v27, 1 }
 0x5a8   : > { %v7928_v56 = vperm.slane %v6358_v62, 7 }
 0x5a9   : > { %v3390_v50 = vrot.slane %v3339_v22, 4 }
 0x5aa   : > { %3053 = vperm.xlu2 %4696, %v3048_v3  }
 0x5ac   : > { %v2937_v33 = vpop.permute.xlu2 %2936  ;;  %4695 = vset.pattern.permute.xlu1 %v7866_v19 }
 0x5ad   : > { %v3182_v30 = vsel %vm1043_vm0, %v6664_v4, %v2937_v33  ;;  %v3378_v33 = vrot.slane %v3335_v10, 4 }
 0x5ae   : > { %v3364_v59 = vrot.slane %v3182_v30, 4  ;;  %v2885_v58 = vpop.permute.xlu1 %2884 }
 0x5af   : > { %v3174_v49 = vsel %vm1043_vm0, %v6626_v8, %v2885_v58  ;;  %v3367_v8 = vsel %vm1109_vm1, %v3182_v30, %v3366_v51 }
 0x5b0   : > { %v3340_v34 = vrot.slane %v3174_v49, 4  ;;  %v3343_v29 = vsel %vm1109_vm1, %v3174_v49, %v3342_v47  ;;  %v3365_v2 = vsel %vm1109_vm1, %v3364_v59, %v3178_v6  ;;  %v3352_v6 = vrot.slane %v3180_v11, 4 }
 0x5b1   : > { %v3351_v4 = vperm.slane %v3343_v29, %v7919_v53  ;;  %v3371_v61 = vperm.slane %v3365_v2, %v7919_v53 }
 0x5b2   : > { %v3341_v9 = vsel %vm1109_vm1, %v3340_v34, %v3170_v12  ;;  %3066 = vperm.xlu2 %4696, %v7927_v17   ;;  %v3375_v12 = vperm.slane %v3367_v8, %v7919_v53 }
 0x5b3   : > { %v3347_v18 = vperm.slane %v3341_v9, %v7919_v53  ;;  %v3388_v36 = vrot.slane %v3351_v4, 4  ;;  %v3391_v60 = vsel %vm1109_vm1, %v3351_v4, %v3390_v50  ;;  %v3400_v62 = vrot.slane %v3371_v61, 4 }
 0x5b4   : > { %3046 = vperm.xlu1 %4695, %v7928_v56   ;;  %v3412_v29 = vrot.slane %v3375_v12, 4 }
 0x5b5   : > { %v3389_v40 = vsel %vm1109_vm1, %v3388_v36, %v3339_v22  ;;  %v3376_v55 = vrot.slane %v3347_v18, 4  ;;  %v3379_v59 = vsel %vm1109_vm1, %v3347_v18, %v3378_v33  ;;  %v3074_v18 = vperm.slane %v6395_v27, 2 }
 0x5b6   : > { %v2898_v47 = vpop.permute.xlu1 %2897  ;;  %v7048_v22 = vperm.slane %v3379_v59, %v7920_v35  ;;  %v3395_v50 = vperm.slane %v3389_v40, %v7920_v35 }
 0x5b7   : > { %v3176_v30 = vsel %vm1043_vm0, %v6633_v13, %v2898_v47  ;;  %v3377_v2 = vsel %vm1109_vm1, %v3376_v55, %v3335_v10 }
 0x5b8   : > { %v3353_v58 = vsel %vm1109_vm1, %v3352_v6, %v3176_v30  ;;  %v3354_v49 = vrot.slane %v3176_v30, 4  ;;  %v7062_v33 = vperm.slane %v3377_v2, %v7920_v35  ;;  %v3430_v40 = vrot.slane %v7048_v22, 4 }
 0x5b9   : > { %v3359_v34 = vperm.slane %v3353_v58, %v7919_v53 }
 0x5ba   : > { %v3355_v51 = vsel %vm1109_vm1, %v3180_v11, %v3354_v49  ;;  %4698 = vset.pattern.permute.xlu2 %v7866_v19  ;;  %v3399_v11 = vperm.slane %v3391_v60, %v7920_v35  ;;  %v3434_v60 = vrot.slane %v3395_v50, 4 }
 0x5bb   : > { %v3363_v13 = vperm.slane %v3355_v51, %v7919_v53  ;;  %v3402_v4 = vrot.slane %v3359_v34, 4  ;;  %v3401_v9 = vsel %vm1109_vm1, %v3400_v62, %v3359_v34 }
 0x5bc   : > { %3059 = vperm.xlu1 %4695, %v3048_v3   ;;  %v7055_v17 = vperm.slane %v3401_v9, %v7920_v35  ;;  %v3438_v59 = vrot.slane %v3399_v11, 4 }
 0x5bd   : > { %v3414_v8 = vrot.slane %v3363_v13, 4  ;;  %v3403_v36 = vsel %vm1109_vm1, %v3371_v61, %v3402_v4  ;;  %v3413_v56 = vsel %vm1109_vm1, %v3412_v29, %v3363_v13  ;;  %v2943_v29 = vpop.permute.xlu0 %2942  ;;  %v3087_v4 = vperm.slane %v6395_v27, 3 }
 0x5be   : > { %v7065_v10 = vperm.slane %v3403_v36, %v7920_v35  ;;  %v3424_v3 = vrot.slane %v7055_v17, 4  ;;  %v3419_v6 = vperm.slane %v3413_v56, %v7920_v35  ;;  %v3183_v2 = vsel %vm1043_vm0, %v6687_v52, %v2943_v29 }
 0x5bf   : > { %v3415_v47 = vsel %vm1109_vm1, %v3375_v12, %v3414_v8  ;;  %v7098_v8 = vpop.permute.xlu2 %2955 }
 0x5c0   : > { %v7073_v61 = vsel %vm1109_vm1, %v3424_v3, %v7062_v33  ;;  %v7077_v55 = vsel %vm1109_vm1, %v7065_v10, %v3430_v40  ;;  %v3423_v30 = vperm.slane %v3415_v47, %v7920_v35  ;;  %v7081_v58 = vsel %vm1109_vm1, %v3419_v6, %v3434_v60 }
 0x5c1   : > { %v3432_v49 = vrot.slane %v3419_v6, 4  ;;  %v3578_v40 = vrot.slane %v6972_v37, 4 }
 0x5c2   : > { %3085 = vperm.xlu2 %4698, %v3074_v18   ;;  %v7084_v62 = vsel %vm1109_vm1, %v3423_v30, %v3438_v59  ;;  %v3436_v12 = vrot.slane %v3423_v30, 4  ;;  %v3607_v59 = vperm.slane %v6997_v45, %v7920_v35 }
 0x5c3   : > { %v7087_v34 = vsel %vm1109_vm1, %v3432_v49, %v3395_v50  ;;  %v3588_v50 = vrot.slane %v3183_v2, 4 }
 0x5c4   : > { %4697 = vset.pattern.permute.xlu1 %v7869_v46  ;;  %v7091_v51 = vsel %vm1109_vm1, %v3436_v12, %v3399_v11  ;;  %v3619_v12 = vperm.slane %v7007_v25, %v7920_v35 }
 0x5c6   : > { %v2917_v13 = vpop.permute.xlu1 %2916 }
 0x5c7   : > { %v3179_v9 = vsel %vm1043_vm0, %v6640_v26, %v2917_v13  ;;  %v7107_v60 = vpop.permute.xlu2 %2968  ;;  %v3623_v13 = vperm.slane %v7000_v14, %v7920_v35 }
 0x5c8   : > { %v3590_v36 = vrot.slane %v3179_v9, 4  ;;  %v3589_v3 = vsel %vm1109_vm1, %v3588_v50, %v3179_v9  ;;  %v3650_v50 = vrot.slane %v3607_v59, 4 }
 0x5c9   : > { %v3595_v52 = vperm.slane %v3589_v3, %v7919_v53 }
 0x5ca   : > { %v3591_v56 = vsel %vm1109_vm1, %v3183_v2, %v3590_v36  ;;  %3098 = vperm.xlu2 %4698, %v3087_v4  }
 0x5cb   : > { %v3599_v11 = vperm.slane %v3591_v56, %v7919_v53  ;;  %v3624_v2 = vrot.slane %v3595_v52, 4 }
 0x5cc   : > { %3079 = vperm.xlu1 %4697, %v3074_v18  }
 0x5cd   : > { %v3636_v49 = vrot.slane %v3599_v11, 4 }
 0x5ce   : > { %v2930_v6 = vpop.permute.xlu1 %2929 }
 0x5cf   : > { %v3181_v26 = vsel %vm1043_vm0, %v6652_v44, %v2930_v6  ;;  %v3611_v44 = vperm.slane %v6991_v20, %v7920_v35  ;;  %v3113_v20 = vperm.slane %v6395_v27, 5 }
 0x5d0   : > { %v3576_v47 = vrot.slane %v3181_v26, 4  ;;  %v3579_v30 = vsel %vm1109_vm1, %v3181_v26, %v3578_v40  ;;  %v3658_v40 = vrot.slane %v3619_v12, 4 }
 0x5d1   : > { %v3587_v18 = vperm.slane %v3579_v30, %v7919_v53  ;;  %v3654_v30 = vrot.slane %v3611_v44, 4 }
 0x5d2   : > { %v3577_v29 = vsel %vm1109_vm1, %v3576_v47, %v6972_v37  ;;  %4701 = vset.pattern.permute.xlu2 %v7869_v46 }
 0x5d3   : > { %v3583_v45 = vperm.slane %v3577_v29, %v7919_v53  ;;  %v3637_v9 = vsel %vm1109_vm1, %v3636_v49, %v3587_v18  ;;  %v3638_v36 = vrot.slane %v3587_v18, 4  ;;  %v3662_v49 = vrot.slane %v3623_v13, 4 }
 0x5d4   : > { %3092 = vperm.xlu1 %4697, %v3087_v4   ;;  %v3643_v25 = vperm.slane %v3637_v9, %v7920_v35 }
 0x5d5   : > { %v3626_v56 = vrot.slane %v3583_v45, 4  ;;  %v3625_v37 = vsel %vm1109_vm1, %v3624_v2, %v3583_v45  ;;  %v3639_v3 = vsel %vm1109_vm1, %v3599_v11, %v3638_v36  ;;  %v2989_v36 = vpop.permute.xlu2 %2988 }
 0x5d6   : > { %v3631_v14 = vperm.slane %v3625_v37, %v7920_v35  ;;  %v3647_v6 = vperm.slane %v3639_v3, %v7920_v35  ;;  %v3656_v26 = vrot.slane %v3643_v25, 4  ;;  %v7132_v4 = vsel %vm1109_vm1, %v3643_v25, %v3658_v40 }
 0x5d7   : > { %v3627_v47 = vsel %vm1109_vm1, %v3595_v52, %v3626_v56  ;;  %7929 = vst [vmem:[#allocation21_spill] sm:$0xff] %v7132_v4 }
 0x5d8   : > { %v3648_v18 = vrot.slane %v3631_v14, 4  ;;  %v3635_v29 = vperm.slane %v3627_v47, %v7920_v35  ;;  %v7136_v11 = vsel %vm1109_vm1, %v3631_v14, %v3650_v50  ;;  %v3660_v2 = vrot.slane %v3647_v6, 4 }
 0x5d9   : > { %v7139_v45 = vsel %vm1109_vm1, %v3656_v26, %v3619_v12  ;;  %v7142_v9 = vsel %vm1109_vm1, %v3647_v6, %v3662_v49  ;;  %v3188_v50 = vsel %vm1043_vm0, %v6701_v41, %v6728_v39  ;;  %v3190_v26 = vsel %vm1043_vm0, %v6709_v63, %v2989_v36 }
 0x5da   : > { %7930 = vst [vmem:[#allocation54_spill] sm:$0xff] %v7139_v45  ;;  %3118 = vperm.xlu2 %4701, %v3113_v20   ;;  %v7145_v52 = vsel %vm1109_vm1, %v3648_v18, %v3607_v59  ;;  %v7148_v25 = vsel %vm1109_vm1, %v3635_v29, %v3654_v30  ;;  %v3652_v56 = vrot.slane %v3635_v29, 4  ;;  %v7151_v37 = vsel %vm1109_vm1, %v3660_v2, %v3623_v13 }
 0x5db   : > { %7931 = vst [vmem:[#allocation55_spill] sm:$0xff] %v7142_v9  ;;  %v3664_v40 = vrot.slane %v3188_v50, 4  ;;  %v7933_v13 = vperm.slane %v6395_v27, 6  ;;  %v7934_v39 = vperm.slane %v6395_v27, 4 }
 0x5dc   : > { %7932 = vst [vmem:[#allocation7_spill] sm:$0xff] %v7151_v37  ;;  %4700 = vset.pattern.permute.xlu1 %v7866_v19  ;;  %v7155_v12 = vsel %vm1109_vm1, %v3652_v56, %v3611_v44 }
 0x5dd   : > { %v7167_v44 = vpop.permute.xlu2 %3001 }
 0x5de   : > { %v2950_v3 = vpop.permute.xlu1 %2949 }
 0x5df   : > { %v3184_v59 = vsel %vm1043_vm0, %v6658_v1, %v2950_v3  ;;  %v3676_v1 = vrot.slane %v3190_v26, 4 }
 0x5e0   : > { %v3666_v14 = vrot.slane %v3184_v59, 4  ;;  %v3665_v6 = vsel %vm1109_vm1, %v3664_v40, %v3184_v59 }
 0x5e1   : > { %v7173_v41 = vperm.slane %v3665_v6, %v7919_v53  ;;  %v3139_v6 = vperm.slane %v6395_v27, 7  ;;  %v3426_v27 = vrot.slane %v7062_v33, 4 }
 0x5e2   : > { %3131 = vperm.xlu2 %4701, %v7933_v13   ;;  %v3667_v47 = vsel %vm1109_vm1, %v3188_v50, %v3666_v14 }
 0x5e3   : > { %v3675_v49 = vperm.slane %v3667_v47, %v7919_v53  ;;  %v3714_v2 = vrot.slane %v7173_v41, 4 }
 0x5e4   : > { %3111 = vperm.xlu1 %4700, %v7934_v39   ;;  %v7936_v39 = vld [vmem:[#allocation36_spill] sm:$0xff] }
 0x5e5   : > { %v3726_v50 = vrot.slane %v3675_v49, 4 }
 0x5e6   : > { %v2963_v30 = vpop.permute.xlu1 %2962 }
 0x5e7   : > { %v3186_v18 = vsel %vm1043_vm0, %v6666_v24, %v2963_v30 }
 0x5e8   : > { %v3677_v29 = vsel %vm1109_vm1, %v3676_v1, %v3186_v18  ;;  %v3678_v63 = vrot.slane %v3186_v18, 4  ;;  %v7937_v18 = vld [vmem:[#allocation43_spill] sm:$0xff] }
 0x5e9   : > { %v7181_v36 = vperm.slane %v3677_v29, %v7919_v53 }
 0x5ea   : > { %v3679_v56 = vsel %vm1109_vm1, %v3190_v26, %v3678_v63  ;;  %4703 = vset.pattern.permute.xlu2 %v7866_v19  ;;  %v7935_v19 = vld [vmem:[#allocation47_spill] sm:$0xff] }
 0x5eb   : > { %v3687_v3 = vperm.slane %v3679_v56, %v7919_v53  ;;  %v7188_v59 = vsel %vm1109_vm1, %v7181_v36, %v3714_v2  ;;  %v3185_v26 = vsel %vm1043_vm0, %v7935_v19, %v7098_v8  ;;  %v3427_v8 = vsel %vm1109_vm1, %v7055_v17, %v3426_v27  ;;  %v7939_v19 = vld [vmem:[#allocation14_spill] sm:$0xff] }
 0x5ec   : > { %v7190_v24 = vpop.permute.xlu2 %3020  ;;  %3124 = vperm.xlu1 %4700, %v3113_v20   ;;  %v3890_v20 = vrot.slane %v3185_v26, 4 }
 0x5ed   : > { %v3724_v40 = vrot.slane %v3687_v3, 4  ;;  %v7193_v14 = vsel %vm1109_vm1, %v3687_v3, %v3726_v50 }
 0x5ef   : > { %v3725_v13 = vsel %vm1109_vm1, %v3724_v40, %v3675_v49 }
 0x5f2   : > { %3150 = vperm.xlu2 %4703, %v3139_v6  }
 0x5f4   : > { %v3034_v47 = vpop.permute.xlu2 %3033  ;;  %4702 = vset.pattern.permute.xlu1 %v7869_v46  ;;  %v7938_v46 = vld [vmem:[#allocation37_spill] sm:$0xff] }
 0x5f5   : > { %v7203_v1 = vsel %vm1043_vm0, %v7936_v39, %v3034_v47  ;;  %v3187_v56 = vsel %vm1043_vm0, %v7938_v46, %v7107_v60  ;;  %v7940_v46 = vld [vmem:[#allocation18_spill] sm:$0xff] }
 0x5f6   : > { %v2982_v30 = vpop.permute.xlu1 %2981  ;;  %v3902_v3 = vrot.slane %v3187_v56, 4  ;;  %v3912_v28 = vrot.slane %v7203_v1, 4 }
 0x5f7   : > { %v3189_v29 = vsel %vm1043_vm0, %v7937_v18, %v2982_v30 }
 0x5f8   : > { %v3888_v49 = vrot.slane %v3189_v29, 4  ;;  %v3891_v63 = vsel %vm1109_vm1, %v3189_v29, %v3890_v20 }
 0x5f9   : > { %v3899_v50 = vperm.slane %v3891_v63, %v7919_v53 }
 0x5fa   : > { %v3889_v2 = vsel %vm1109_vm1, %v3888_v49, %v3185_v26  ;;  %4118 = vrot.lane.b32.xlu2 %v3427_v8, %s4778_s16 }
 0x5fb   : > { %v3895_v33 = vperm.slane %v3889_v2, %v7919_v53  ;;  %v3950_v26 = vrot.slane %v3899_v50, 4 }
 0x5fc   : > { %3144 = vperm.xlu1 %4702, %v3139_v6  }
 0x5fd   : > { %v3938_v60 = vrot.slane %v3895_v33, 4 }
 0x5fe   : > { %v2995_v40 = vpop.permute.xlu1 %2994 }
 0x5ff   : > { %v3191_v47 = vsel %vm1043_vm0, %v7939_v19, %v2995_v40  ;;  %v7942_v40 = vld [vmem:[#allocation45_spill] sm:$0xff] }
 0x600   : > { %v3900_v39 = vrot.slane %v3191_v47, 4  ;;  %v3903_v17 = vsel %vm1109_vm1, %v3191_v47, %v3902_v3  ;;  %v3008_v47 = vpop.permute.xlu0 %3007 }
 0x601   : > { %v3911_v20 = vperm.slane %v3903_v17, %v7919_v53 }
 0x602   : > { %v3901_v30 = vsel %vm1109_vm1, %v3900_v39, %v3187_v56  ;;  %4132 = vrot.lane.b32.xlu2 %v6956_v0, %s4779_s19  ;;  %v7941_v56 = vld [vmem:[#allocation24_spill] sm:$0xff]  ;;  %v3712_v39 = vrot.slane %v7181_v36, 4 }
 0x603   : > { %v3907_v6 = vperm.slane %v3901_v30, %v7919_v53  ;;  %v3948_v18 = vrot.slane %v3911_v20, 4  ;;  %v7227_v29 = vsel %vm1109_vm1, %v3911_v20, %v3950_v26  ;;  %v3198_v3 = vsel %vm1043_vm0, %v7941_v56, %v7940_v46 }
 0x604   : > { %4116 = vrot.lane.b32.xlu1 %v6959_v7, %s4778_s16  ;;  %v7240_v0 = vpop.permute.xlu2 %3053  ;;  %v3700_v17 = vrot.slane %v3198_v3, 4 }
 0x605   : > { %v3936_v27 = vrot.slane %v3907_v6, 4  ;;  %v7232_v49 = vsel %vm1109_vm1, %v3907_v6, %v3938_v60  ;;  %v7235_v63 = vsel %vm1109_vm1, %v3948_v18, %v3899_v50  ;;  %v3713_v6 = vsel %vm1109_vm1, %v3712_v39, %v7173_v41 }
 0x606   : > { %v3731_v41 = vperm.slane %v3725_v13, %v7920_v35 }
 0x607   : > { %v7238_v8 = vsel %vm1109_vm1, %v3936_v27, %v3895_v33  ;;  %v7943_v33 = vld [vmem:[#allocation50_spill] sm:$0xff] }
 0x608   : > { %v3192_v26 = vsel %vm1043_vm0, %v7943_v33, %v7167_v44  ;;  %v3719_v44 = vperm.slane %v3713_v6, %v7920_v35  ;;  %v3723_v33 = vperm.slane %v7188_v59, %v7920_v35 }
 0x609   : > { %v3690_v18 = vrot.slane %v3192_v26, 4 }
 0x60a   : > { %v3762_v13 = vrot.slane %v3719_v44, 4 }
 0x60c   : > { %v7252_v20 = vpop.permute.xlu2 %3066 }
 0x60e   : > { %v3015_v2 = vpop.permute.xlu1 %3014 }
 0x60f   : > { %v3194_v7 = vsel %vm1043_vm0, %v7942_v40, %v3015_v2  ;;  %v7944_v2 = vld [vmem:[#allocation20_spill] sm:$0xff]  ;;  %v7945_v40 = vld [vmem:[#allocation19_spill] sm:$0xff] }
 0x610   : > { %v3702_v19 = vrot.slane %v3194_v7, 4  ;;  %v3701_v30 = vsel %vm1109_vm1, %v3700_v17, %v3194_v7  ;;  %v3193_v7 = vsel %vm1043_vm0, %v7945_v40, %v3008_v47 }
 0x611   : > { %v3707_v36 = vperm.slane %v3701_v30, %v7919_v53  ;;  %v3735_v30 = vperm.slane %v7193_v14, %v7920_v35  ;;  %v3770_v14 = vrot.slane %v3731_v41, 4 }
 0x612   : > { %v3703_v50 = vsel %vm1109_vm1, %v3198_v3, %v3702_v19  ;;  %v3073_v19 = vpop.permute.xlu0 %3072 }
 0x613   : > { %v3711_v60 = vperm.slane %v3703_v50, %v7919_v53 }
 0x615   : > { %v3748_v17 = vrot.slane %v3711_v60, 4 }
 0x616   : > { %v3028_v27 = vpop.permute.xlu1 %3027 }
 0x617   : > { %v3196_v46 = vsel %vm1043_vm0, %v7944_v2, %v3028_v27  ;;  %v3914_v2 = vrot.slane %v3193_v7, 4 }
 0x618   : > { %v3688_v56 = vrot.slane %v3196_v46, 4  ;;  %v3691_v3 = vsel %vm1109_vm1, %v3196_v46, %v3690_v18  ;;  %v3736_v18 = vrot.slane %v3707_v36, 4  ;;  %v7946_v46 = vld [vmem:[#allocation23_spill] sm:$0xff] }
 0x619   : > { %v3699_v50 = vperm.slane %v3691_v3, %v7919_v53  ;;  %v3203_v3 = vsel %vm1043_vm0, %v7946_v46, %v3073_v19  ;;  %v3766_v19 = vrot.slane %v3723_v33, 4  ;;  %v3774_v46 = vrot.slane %v3735_v30, 4 }
 0x61a   : > { %v3689_v39 = vsel %vm1109_vm1, %v3688_v56, %v3192_v26 }
 0x61b   : > { %v3695_v6 = vperm.slane %v3689_v39, %v7919_v53  ;;  %v3749_v27 = vsel %vm1109_vm1, %v3748_v17, %v3699_v50  ;;  %v3750_v47 = vrot.slane %v3699_v50, 4 }
 0x61c   : > { %v3086_v40 = vpop.permute.xlu2 %3085  ;;  %v3755_v26 = vperm.slane %v3749_v27, %v7920_v35 }
 0x61d   : > { %v3738_v56 = vrot.slane %v3695_v6, 4  ;;  %v3737_v59 = vsel %vm1109_vm1, %v3736_v18, %v3695_v6  ;;  %v3751_v9 = vsel %vm1109_vm1, %v3711_v60, %v3750_v47  ;;  %v3915_v47 = vsel %vm1109_vm1, %v7203_v1, %v3914_v2 }
 0x61e   : > { %v3743_v39 = vperm.slane %v3737_v59, %v7920_v35  ;;  %v3768_v17 = vrot.slane %v3755_v26, 4  ;;  %v3759_v50 = vperm.slane %v3751_v9, %v7920_v35  ;;  %v7284_v57 = vsel %vm1109_vm1, %v3755_v26, %v3770_v14  ;;  %v7947_v59 = vld [vmem:[#allocation13_spill] sm:$0xff] }
 0x61f   : > { %v3739_v48 = vsel %vm1109_vm1, %v3707_v36, %v3738_v56  ;;  %v3428_v9 = vrot.slane %v7065_v10, 4  ;;  %v3913_v56 = vsel %vm1109_vm1, %v3912_v28, %v3193_v7  ;;  %v3195_v1 = vsel %vm1043_vm0, %v7947_v59, %v7190_v24 }
 0x620   : > { %v3763_v27 = vsel %vm1109_vm1, %v3743_v39, %v3762_v13  ;;  %v7288_v18 = vsel %vm1109_vm1, %v3768_v17, %v3731_v41  ;;  %v3747_v60 = vperm.slane %v3739_v48, %v7920_v35  ;;  %v3760_v6 = vrot.slane %v3743_v39, 4  ;;  %v7948_v17 = vld [vmem:[#allocation28_spill] sm:$0xff] }
 0x621   : > { %4120 = vrot.lane.b32.xlu0 %v3763_v27, %s4778_s16  ;;  %v7296_v36 = vsel %vm1109_vm1, %v3759_v50, %v3774_v46  ;;  %v3772_v26 = vrot.slane %v3759_v50, 4  ;;  %v4014_v39 = vrot.slane %v3203_v3, 4  ;;  %v3919_v28 = vperm.slane %v3913_v56, %v7919_v53  ;;  %v7949_v27 = vld [vmem:[#allocation49_spill] sm:$0xff] }
 0x622   : > { %v7300_v13 = vsel %vm1109_vm1, %v3747_v60, %v3766_v19  ;;  %v3764_v41 = vrot.slane %v3747_v60, 4  ;;  %v7303_v48 = vsel %vm1109_vm1, %v3760_v6, %v3719_v44  ;;  %v3923_v7 = vperm.slane %v3915_v47, %v7919_v53 }
 0x623   : > { %v7309_v2 = vsel %vm1109_vm1, %v3772_v26, %v3735_v30  ;;  %v3926_v50 = vrot.slane %v3195_v1, 4  ;;  %v3429_v24 = vsel %vm1109_vm1, %v3428_v9, %v7048_v22  ;;  %v3959_v30 = vperm.slane %v7227_v29, %v7920_v35 }
 0x624   : > { %v3099_v10 = vpop.permute.xlu2 %3098  ;;  %v7312_v14 = vsel %vm1109_vm1, %v3764_v41, %v3723_v33  ;;  %v3947_v6 = vperm.slane %v7232_v49, %v7920_v35  ;;  %v3955_v47 = vperm.slane %v7235_v63, %v7920_v35  ;;  %v3943_v22 = vperm.slane %v7238_v8, %v7920_v35 }
 0x625   : > { %v3207_v44 = vsel %vm1043_vm0, %v7948_v17, %v3099_v10  ;;  %v3962_v29 = vrot.slane %v3919_v28, 4  ;;  %v3974_v9 = vrot.slane %v3923_v7, 4  ;;  %v7950_v10 = vld [vmem:[#allocation33_spill] sm:$0xff] }
 0x626   : > { %v4012_v19 = vrot.slane %v3207_v44, 4  ;;  %v3047_v46 = vpop.permute.xlu1 %3046  ;;  %v4015_v33 = vsel %vm1109_vm1, %v3207_v44, %v4014_v39  ;;  %v3205_v49 = vsel %vm1043_vm0, %v7950_v10, %v3086_v40 }
 0x627   : > { %v3199_v60 = vsel %vm1043_vm0, %v7949_v27, %v3047_v46  ;;  %v4023_v39 = vperm.slane %v4015_v33, %v7919_v53  ;;  %v3994_v46 = vrot.slane %v3955_v47, 4  ;;  %v3990_v27 = vrot.slane %v3947_v6, 4 }
 0x628   : > { %v4013_v26 = vsel %vm1109_vm1, %v4012_v19, %v3203_v3  ;;  %v3924_v56 = vrot.slane %v3199_v60, 4  ;;  %v3927_v41 = vsel %vm1109_vm1, %v3199_v60, %v3926_v50  ;;  %v3998_v3 = vrot.slane %v3959_v30, 4 }
 0x629   : > { %v3935_v59 = vperm.slane %v3927_v41, %v7919_v53  ;;  %4134 = vrot.lane.b32.xlu0 %v3429_v24, %s4779_s19  ;;  %v4019_v17 = vperm.slane %v4013_v26, %v7919_v53  ;;  %v3986_v19 = vrot.slane %v3943_v22, 4  ;;  %v4000_v60 = vrot.slane %v3205_v49, 4 }
 0x62a   : > { %v3925_v63 = vsel %vm1109_vm1, %v3924_v56, %v3195_v1  ;;  %v4060_v1 = vrot.slane %v4023_v39, 4 }
 0x62b   : > { %v3931_v44 = vperm.slane %v3925_v63, %v7919_v53  ;;  %v3972_v50 = vrot.slane %v3935_v59, 4  ;;  %v3975_v8 = vsel %vm1109_vm1, %v3935_v59, %v3974_v9  ;;  %v4048_v9 = vrot.slane %v4019_v17, 4  ;;  %v7952_v59 = vld [vmem:[#allocation48_spill] sm:$0xff] }
 0x62c   : > { %v3983_v24 = vperm.slane %v3975_v8, %v7920_v35 }
 0x62d   : > { %v3960_v41 = vrot.slane %v3931_v44, 4  ;;  %v3963_v40 = vsel %vm1109_vm1, %v3931_v44, %v3962_v29  ;;  %v3973_v33 = vsel %vm1109_vm1, %v3972_v50, %v3923_v7 }
 0x62e   : > { %v3060_v56 = vpop.permute.xlu1 %3059  ;;  %v3971_v26 = vperm.slane %v3963_v40, %v7920_v35  ;;  %v3979_v10 = vperm.slane %v3973_v33, %v7920_v35  ;;  %v7348_v63 = vsel %vm1109_vm1, %v3983_v24, %v3998_v3  ;;  %v3996_v4 = vrot.slane %v3983_v24, 4 }
 0x62f   : > { %7951 = vst [vmem:[#allocation8_spill] sm:$0xff] %v7348_v63  ;;  %v3201_v42 = vsel %vm1043_vm0, %v7952_v59, %v3060_v56  ;;  %v3961_v8 = vsel %vm1109_vm1, %v3960_v41, %v3919_v28 }
 0x630   : > { %v4001_v29 = vsel %vm1109_vm1, %v4000_v60, %v3201_v42  ;;  %v4002_v44 = vrot.slane %v3201_v42, 4  ;;  %v3988_v7 = vrot.slane %v3971_v26, 4  ;;  %v3967_v50 = vperm.slane %v3961_v8, %v7920_v35 }
 0x631   : > { %v4007_v40 = vperm.slane %v4001_v29, %v7919_v53  ;;  %4148 = vrot.lane.b32.xlu0 %v6947_v38, %s4780_s20  ;;  %v7359_v3 = vsel %vm1109_vm1, %v3979_v10, %v3994_v46  ;;  %v7362_v33 = vsel %vm1109_vm1, %v3971_v26, %v3990_v27  ;;  %v3992_v56 = vrot.slane %v3979_v10, 4 }
 0x632   : > { %7953 = vst [vmem:[#allocation53_spill] sm:$0xff] %v7362_v33  ;;  %v4003_v28 = vsel %vm1109_vm1, %v3205_v49, %v4002_v44  ;;  %v7366_v24 = vsel %vm1109_vm1, %v3988_v7, %v3947_v6  ;;  %v3984_v42 = vrot.slane %v3967_v50, 4  ;;  %v7369_v60 = vsel %vm1109_vm1, %v3967_v50, %v3986_v19  ;;  %v3138_v7 = vpop.permute.xlu0 %3137  ;;  %v7956_v50 = vld [vmem:[#allocation30_spill] sm:$0xff] }
 0x633   : > { %v4011_v41 = vperm.slane %v4003_v28, %v7919_v53  ;;  %v4049_v38 = vsel %vm1109_vm1, %v4048_v9, %v4007_v40  ;;  %v4050_v59 = vrot.slane %v4007_v40, 4  ;;  %v7374_v46 = vsel %vm1109_vm1, %v3992_v56, %v3955_v47 }
 0x634   : > { %7954 = vst [vmem:[#allocation9_spill] sm:$0xff] %v7374_v46  ;;  %v7377_v27 = vsel %vm1109_vm1, %v3984_v42, %v3943_v22  ;;  %v7380_v49 = vsel %vm1109_vm1, %v3996_v4, %v3959_v30  ;;  %v7385_v8 = vpop.permute.xlu2 %3118  ;;  %v3213_v22 = vsel %vm1043_vm0, %v7956_v50, %v3138_v7  ;;  %v7960_v50 = vld [vmem:[#allocation26_spill] sm:$0xff] }
 0x635   : > { %7955 = vst [vmem:[#allocation10_spill] sm:$0xff] %v7380_v49  ;;  %v4062_v6 = vrot.slane %v4011_v41, 4  ;;  %v4061_v26 = vsel %vm1109_vm1, %v4060_v1, %v4011_v41  ;;  %v4051_v19 = vsel %vm1109_vm1, %v4019_v17, %v4050_v59  ;;  %v4024_v30 = vrot.slane %v3213_v22, 4  ;;  %v7957_v17 = vld [vmem:[#allocation17_spill] sm:$0xff]  ;;  %v7958_v41 = vld [vmem:[#allocation27_spill] sm:$0xff] }
 0x637   : > { %v4063_v10 = vsel %vm1109_vm1, %v4023_v39, %v4062_v6  ;;  %v7959_v6 = vld [vmem:[#allocation35_spill] sm:$0xff] }
 0x63c   : > { %v3132_v9 = vpop.permute.xlu2 %3131 }
 0x63e   : > { %v3080_v29 = vpop.permute.xlu1 %3079 }
 0x63f   : > { %v7401_v7 = vsel %vm1043_vm0, %v7959_v6, %v3080_v29  ;;  %v7963_v6 = vld [vmem:[#allocation16_spill] sm:$0xff] }
 0x646   : > { %v3093_v47 = vpop.permute.xlu1 %3092 }
 0x64c   : > { %v3151_v44 = vpop.permute.xlu2 %3150 }
 0x64d   : > { %v3215_v59 = vsel %vm1043_vm0, %v7958_v41, %v3151_v44  ;;  %v4059_v41 = vperm.slane %v4051_v19, %v7920_v35 }
 0x64e   : > { %v4036_v63 = vrot.slane %v3215_v59, 4 }
 0x654   : > { %v4119_v40 = vpop.permute.xlu2 %4118 }
 0x655   : > { %v7391_v4 = vsel %vm2245_vm2, %v7073_v61, %v4119_v40  ;;  %v7406_v40 = vsel %vm1043_vm0, %v7960_v50, %v3093_v47 }
 0x656   : > { %v3112_v1 = vpop.permute.xlu1 %3111 }
 0x657   : > { %v3209_v39 = vsel %vm1043_vm0, %v7957_v17, %v3112_v1  ;;  %v7961_v17 = vld [vmem:[#allocation42_spill] sm:$0xff] }
 0x658   : > { %v4025_v56 = vsel %vm1109_vm1, %v4024_v30, %v3209_v39  ;;  %v4026_v28 = vrot.slane %v3209_v39, 4  ;;  %v4055_v30 = vperm.slane %v4049_v38, %v7920_v35  ;;  %v7962_v39 = vld [vmem:[#allocation44_spill] sm:$0xff]  ;;  %v7423_v38 = vsel %vm1043_vm0, %v7963_v6, %v7252_v20  ;;  %v7964_v20 = vld [vmem:[#allocation15_spill] sm:$0xff] }
 0x659   : > { %v4031_v61 = vperm.slane %v4025_v56, %v7919_v53  ;;  %v3776_v56 = vrot.slane %v7401_v7, 4  ;;  %v7434_v6 = vsel %vm1043_vm0, %v7964_v20, %v3132_v9 }
 0x65a   : > { %v4027_v42 = vsel %vm1109_vm1, %v3213_v22, %v4026_v28  ;;  %v7412_v22 = vsel %vm1043_vm0, %v7961_v17, %v7240_v0  ;;  %v3788_v0 = vrot.slane %v7406_v40, 4 }
 0x65b   : > { %v4035_v44 = vperm.slane %v4027_v42, %v7919_v53  ;;  %v4074_v50 = vrot.slane %v4031_v61, 4 }
 0x65e   : > { %v3125_v1 = vpop.permute.xlu1 %3124 }
 0x65f   : > { %v3211_v29 = vsel %vm1043_vm0, %v7962_v39, %v3125_v1  ;;  %v4098_v1 = vrot.slane %v4055_v30, 4  ;;  %v4067_v39 = vperm.slane %v4061_v26, %v7920_v35  ;;  %v3789_v26 = vsel %vm1109_vm1, %v3788_v0, %v7423_v38 }
 0x660   : > { %v4037_v28 = vsel %vm1109_vm1, %v4036_v63, %v3211_v29  ;;  %v4038_v47 = vrot.slane %v3211_v29, 4  ;;  %v4071_v63 = vperm.slane %v4063_v10, %v7920_v35  ;;  %v4086_v29 = vrot.slane %v4035_v44, 4 }
 0x661   : > { %v4043_v42 = vperm.slane %v4037_v28, %v7919_v53  ;;  %v3777_v28 = vsel %vm1109_vm1, %v3776_v56, %v7412_v22  ;;  %v3800_v56 = vrot.slane %v7434_v6, 4  ;;  %v4106_v33 = vrot.slane %v4067_v39, 4 }
 0x662   : > { %v4039_v17 = vsel %vm1109_vm1, %v3215_v59, %v4038_v47  ;;  %v4102_v47 = vrot.slane %v4059_v41, 4  ;;  %v4110_v46 = vrot.slane %v4071_v63, 4 }
 0x663   : > { %v4047_v19 = vperm.slane %v4039_v17, %v7919_v53  ;;  %v4072_v49 = vrot.slane %v4043_v42, 4  ;;  %v4075_v45 = vsel %vm1109_vm1, %v4043_v42, %v4074_v50 }
 0x664   : > { %v4083_v59 = vperm.slane %v4075_v45, %v7920_v35 }
 0x665   : > { %v4084_v10 = vrot.slane %v4047_v19, 4  ;;  %v4073_v37 = vsel %vm1109_vm1, %v4072_v49, %v4031_v61  ;;  %v4087_v17 = vsel %vm1109_vm1, %v4047_v19, %v4086_v29  ;;  %v3783_v29 = vperm.slane %v3777_v28, %v7919_v53 }
 0x666   : > { %v4079_v50 = vperm.slane %v4073_v37, %v7920_v35  ;;  %v4100_v42 = vrot.slane %v4083_v59, 4  ;;  %v7445_v9 = vsel %vm1109_vm1, %v4083_v59, %v4102_v47  ;;  %v4095_v20 = vperm.slane %v4087_v17, %v7920_v35  ;;  %v7966_v17 = vld [vmem:[#allocation38_spill] sm:$0xff] }
 0x667   : > { %v4085_v45 = vsel %vm1109_vm1, %v4084_v10, %v4035_v44  ;;  %v3795_v19 = vperm.slane %v3789_v26, %v7919_v53  ;;  %v3826_v26 = vrot.slane %v3783_v29, 4 }
 0x668   : > { %v7451_v0 = vsel %vm1109_vm1, %v4079_v50, %v4098_v1  ;;  %v4096_v49 = vrot.slane %v4079_v50, 4  ;;  %v4091_v61 = vperm.slane %v4085_v45, %v7920_v35  ;;  %v7455_v37 = vsel %vm1109_vm1, %v4100_v42, %v4059_v41  ;;  %v7967_v50 = vld [vmem:[#allocation29_spill] sm:$0xff] }
 0x669   : > { %v7460_v59 = vsel %vm1109_vm1, %v4095_v20, %v4110_v46  ;;  %v4108_v47 = vrot.slane %v4095_v20, 4  ;;  %v3208_v41 = vsel %vm1043_vm0, %v7967_v50, %v7966_v17  ;;  %v3824_v20 = vrot.slane %v3795_v19, 4  ;;  %v7970_v17 = vld [vmem:[#allocation32_spill] sm:$0xff] }
 0x66a   : > { %v7463_v44 = vsel %vm1109_vm1, %v4096_v49, %v4055_v30  ;;  %v4104_v10 = vrot.slane %v4091_v61, 4  ;;  %v7466_v1 = vsel %vm1109_vm1, %v4091_v61, %v4106_v33  ;;  %v3801_v28 = vsel %vm1109_vm1, %v3800_v56, %v3208_v41  ;;  %v7969_v49 = vld [vmem:[#allocation41_spill] sm:$0xff] }
 0x66b   : > { %7965 = vst [vmem:[#allocation6_spill] sm:$0xff] %v7466_v1  ;;  %v7472_v42 = vsel %vm1109_vm1, %v4108_v47, %v4071_v63  ;;  %v3807_v45 = vperm.slane %v3801_v28, %v7919_v53  ;;  %v3827_v61 = vsel %vm1109_vm1, %v3795_v19, %v3826_v26  ;;  %v3210_v63 = vsel %vm1043_vm0, %v7970_v17, %v7385_v8 }
 0x66c   : > { %7968 = vst [vmem:[#allocation11_spill] sm:$0xff] %v7472_v42  ;;  %v7476_v46 = vsel %vm1109_vm1, %v4104_v10, %v4067_v39  ;;  %v3825_v56 = vsel %vm1109_vm1, %v3824_v20, %v3783_v29  ;;  %v3835_v47 = vperm.slane %v3827_v61, %v7920_v35 }
 0x66d   : > { %v3850_v10 = vrot.slane %v3807_v45, 4  ;;  %v3831_v28 = vperm.slane %v3825_v56, %v7920_v35 }
 0x66e   : > { %v3145_v30 = vpop.permute.xlu1 %3144  ;;  %v3878_v26 = vrot.slane %v3835_v47, 4 }
 0x66f   : > { %v3214_v33 = vsel %vm1043_vm0, %v7969_v49, %v3145_v30  ;;  %v3874_v20 = vrot.slane %v3831_v28, 4  ;;  %vm7976_vm0 = vcmask 48128  }
 0x670   : > { %v3812_v1 = vrot.slane %v3214_v33, 4 }
 0x672   : > { %v3813_v39 = vsel %vm1109_vm1, %v3812_v1, %v3210_v63 }
 0x673   : > { %v3819_v50 = vperm.slane %v3813_v39, %v7919_v53 }
 0x675   : > { %v3848_v42 = vrot.slane %v3819_v50, 4  ;;  %v3851_v30 = vsel %vm1109_vm1, %v3819_v50, %v3850_v10 }
 0x676   : > { %v3859_v19 = vperm.slane %v3851_v30, %v7920_v35 }
 0x677   : > { %v3849_v49 = vsel %vm1109_vm1, %v3848_v42, %v3807_v45  ;;  %v3802_v42 = vrot.slane %v3208_v41, 4  ;;  %v3814_v45 = vrot.slane %v3210_v63, 4  ;;  %v3778_v63 = vrot.slane %v7412_v22, 4 }
 0x678   : > { %v3879_v8 = vsel %vm1109_vm1, %v3859_v19, %v3878_v26  ;;  %v3876_v29 = vrot.slane %v3859_v19, 4  ;;  %v3855_v1 = vperm.slane %v3849_v49, %v7920_v35 }
 0x679   : > { %4154 = vrot.lane.b32.xlu0 %v3879_v8, %s4780_s20  ;;  %v3803_v10 = vsel %vm1109_vm1, %v7434_v6, %v3802_v42  ;;  %v3815_v50 = vsel %vm1109_vm1, %v3214_v33, %v3814_v45  ;;  %v7983_v42 = vld [vmem:[#allocation11_spill] sm:$0xff] }
 0x67a   : > { %v3877_v61 = vsel %vm1109_vm1, %v3876_v29, %v3835_v47  ;;  %v3875_v17 = vsel %vm1109_vm1, %v3855_v1, %v3874_v20  ;;  %v3872_v56 = vrot.slane %v3855_v1, 4  ;;  %v3790_v47 = vrot.slane %v7423_v38, 4 }
 0x67b   : > { %4138 = vrot.lane.b32.xlu2 %v3877_v61, %s4779_s19  ;;  %4122 = vrot.lane.b32.xlu1 %v3875_v17, %s4778_s16  ;;  %v3823_v41 = vperm.slane %v3815_v50, %v7919_v53 }
 0x67c   : > { %v7501_v39 = vsel %vm1109_vm1, %v3872_v56, %v3831_v28  ;;  %v3791_v28 = vsel %vm1109_vm1, %v7406_v40, %v3790_v47 }
 0x67d   : > { %v3860_v6 = vrot.slane %v3823_v41, 4 }
 0x681   : > { %4168 = vrot.lane.b32.xlu0 %v7288_v18, %s4781_s21  ;;  %v3811_v18 = vperm.slane %v3803_v10, %v7919_v53 }
 0x683   : > { %4152 = vrot.lane.b32.xlu2 %v7300_v13, %s4780_s20  ;;  %4136 = vrot.lane.b32.xlu1 %v7312_v14, %s4779_s19  ;;  %v3799_v13 = vperm.slane %v3791_v28, %v7919_v53  ;;  %v3779_v14 = vsel %vm1109_vm1, %v7401_v7, %v3778_v63  ;;  %v3862_v38 = vrot.slane %v3811_v18, 4  ;;  %v3861_v30 = vsel %vm1109_vm1, %v3860_v6, %v3811_v18 }
 0x684   : > { %v3787_v40 = vperm.slane %v3779_v14, %v7919_v53 }
 0x685   : > { %v3836_v33 = vrot.slane %v3799_v13, 4  ;;  %v3863_v22 = vsel %vm1109_vm1, %v3823_v41, %v3862_v38  ;;  %v7985_v41 = vld [vmem:[#allocation25_spill] sm:$0xff] }
 0x686   : > { %v3838_v19 = vrot.slane %v3787_v40, 4 }
 0x687   : > { %v3837_v7 = vsel %vm1109_vm1, %v3836_v33, %v3787_v40 }
 0x689   : > { %4182 = vrot.lane.b32.xlu0 %v7081_v58, %s4782_s22  ;;  %v3871_v58 = vperm.slane %v3863_v22, %v7920_v35 }
 0x68b   : > { %4166 = vrot.lane.b32.xlu2 %v7087_v34, %s4781_s21  ;;  %4150 = vrot.lane.b32.xlu1 %v7077_v55, %s4780_s20  ;;  %v3867_v34 = vperm.slane %v3861_v30, %v7920_v35  ;;  %v3839_v55 = vsel %vm1109_vm1, %v3799_v13, %v3838_v19  ;;  %v3884_v49 = vrot.slane %v3871_v58, 4  ;;  %v7987_v13 = vld [vmem:[#allocation8_spill] sm:$0xff]  ;;  %v7989_v19 = vld [vmem:[#allocation55_spill] sm:$0xff] }
 0x68c   : > { %v3847_v8 = vperm.slane %v3839_v55, %v7920_v35 }
 0x68d   : > { %v3880_v29 = vrot.slane %v3867_v34, 4 }
 0x68e   : > { %v3885_v1 = vsel %vm1109_vm1, %v3884_v49, %v3847_v8 }
 0x691   : > { %4196 = vrot.lane.b32.xlu0 %v6950_v54, %s4783_s23  ;;  %v3843_v54 = vperm.slane %v3837_v7, %v7920_v35  ;;  %v3886_v35 = vrot.slane %v3847_v8, 4 }
 0x693   : > { %4180 = vrot.lane.b32.xlu2 %v6953_v32, %s4782_s22  ;;  %4164 = vrot.lane.b32.xlu1 %v6962_v23, %s4781_s21  ;;  %v4121_v53 = vpop.permute.xlu0 %4120  ;;  %v3882_v20 = vrot.slane %v3843_v54, 4  ;;  %v3881_v23 = vsel %vm1109_vm1, %v3880_v29, %v3843_v54 }
 0x694   : > { %v7542_v26 = vsel %vm2245_vm2, %v7303_v48, %v4121_v53 }
 0x695   : > { %v3883_v32 = vsel %vm1109_vm1, %v3867_v34, %v3882_v20 }
 0x699   : > { %4202 = vrot.lane.b32.xlu0 %v3885_v1, %s4783_s23 }
 0x69b   : > { %4186 = vrot.lane.b32.xlu2 %v3883_v32, %s4782_s22  ;;  %4170 = vrot.lane.b32.xlu1 %v3881_v23, %s4781_s21  ;;  %v4135_v48 = vpop.permute.xlu0 %4134 }
 0x69c   : > { %v4357_v61 = vsel %vm2250_vm4, %v7391_v4, %v4135_v48  ;;  %v7978_v4 = vld [vmem:[#allocation31_spill] sm:$0xff] }
 0x6a1   : > { %4216 = vrot.lane.b32.xlu0 %v7296_v36, %s4784_s24 }
 0x6a3   : > { %4200 = vrot.lane.b32.xlu2 %v7309_v2, %s4783_s23  ;;  %4184 = vrot.lane.b32.xlu1 %v7284_v57, %s4782_s22  ;;  %v3887_v57 = vsel %vm1109_vm1, %v3871_v58, %v3886_v35  ;;  %vm7980_vm1 = vmmov %vm7976_vm0 }
 0x6a9   : > { %4230 = vrot.lane.b32.xlu0 %v7145_v52, %s4785_s25  ;;  %v7974_v52 = vld [vmem:[#allocation54_spill] sm:$0xff] }
 0x6ab   : > { %4214 = vrot.lane.b32.xlu2 %v7084_v62, %s4784_s24  ;;  %4198 = vrot.lane.b32.xlu1 %v7091_v51, %s4783_s23  ;;  %v4117_v62 = vpop.permute.xlu1 %4116 }
 0x6ac   : > { %v4352_v63 = vsel %vm2245_vm2, %v7985_v41, %v4117_v62 }
 0x6b1   : > { %4244 = vrot.lane.b32.xlu0 %v6871_v21, %s4786_s26  ;;  %v4133_v21 = vpop.permute.xlu2 %4132 }
 0x6b2   : > { %v4356_v38 = vsel %vm2250_vm4, %v4352_v63, %v4133_v21 }
 0x6b3   : > { %4212 = vrot.lane.b32.xlu1 %v6943_v43, %s4784_s24  ;;  %4228 = vrot.lane.b32.xlu2 %v6877_v31, %s4785_s25 }
 0x6b9   : > { %4250 = vrot.lane.b32.xlu0 %v7451_v0, %s4786_s26 }
 0x6bb   : > { %4218 = vrot.lane.b32.xlu1 %v3887_v57, %s4784_s24  ;;  %4234 = vrot.lane.b32.xlu2 %v7463_v44, %s4785_s25 }
 0x6c1   : > { %4264 = vrot.lane.b32.xlu0 %v7366_v24, %s4787_s27 }
 0x6c3   : > { %4232 = vrot.lane.b32.xlu1 %v7377_v27, %s4785_s25  ;;  %4248 = vrot.lane.b32.xlu2 %v7369_v60, %s4786_s26  ;;  %v7977_v27 = vld [vmem:[#allocation34_spill] sm:$0xff] }
 0x6c9   : > { %4278 = vrot.lane.b32.xlu0 %v7148_v25, %s4788_s28  ;;  %v7975_v25 = vld [vmem:[#allocation21_spill] sm:$0xff] }
 0x6cb   : > { %4246 = vrot.lane.b32.xlu1 %v7136_v11, %s4786_s26  ;;  %4262 = vrot.lane.b32.xlu2 %v7155_v12, %s4787_s27  ;;  %v7973_v11 = vld [vmem:[#allocation7_spill] sm:$0xff] }
 0x6d1   : > { %4292 = vrot.lane.b32.xlu0 %v6889_v16, %s4789_s29  ;;  %v4149_v16 = vpop.permute.xlu0 %4148 }
 0x6d3   : > { %4260 = vrot.lane.b32.xlu1 %v6898_v5, %s4787_s27  ;;  %4276 = vrot.lane.b32.xlu2 %v6884_v15, %s4788_s28  ;;  %v7971_v5 = vld [vmem:[#allocation53_spill] sm:$0xff] }
 0x6d4   : > { %v7972_v15 = vld [vmem:[#allocation9_spill] sm:$0xff] }
 0x6d5   : > { %v4139_v31 = vpop.permute.xlu2 %4138 }
 0x6d9   : > { %4298 = vrot.lane.b32.xlu0 %v7476_v46, %s4789_s29 }
 0x6db   : > { %4266 = vrot.lane.b32.xlu1 %v7455_v37, %s4787_s27  ;;  %4282 = vrot.lane.b32.xlu2 %v7445_v9, %s4788_s28  ;;  %v7979_v9 = vld [vmem:[#allocation22_spill] sm:$0xff] }
 0x6dd   : > { %v4153_v43 = vpop.permute.xlu2 %4152 }
 0x6e1   : > { %4312 = vrot.lane.b32.xlu0 %v7359_v3, %s4790_s30 }
 0x6e3   : > { %4280 = vrot.lane.b32.xlu1 %v7971_v5, %s4788_s28  ;;  %4296 = vrot.lane.b32.xlu2 %v7972_v15, %s4789_s29 }
 0x6e5   : > { %v4167_v51 = vpop.permute.xlu2 %4166 }
 0x6e9   : > { %4326 = vrot.lane.b32.xlu0 %v7973_v11, %s4791_s2 }
 0x6eb   : > { %4294 = vrot.lane.b32.xlu1 %v7974_v52, %s4789_s29  ;;  %4310 = vrot.lane.b32.xlu2 %v7975_v25, %s4790_s30  ;;  %v4155_v12 = vpop.permute.xlu0 %4154 }
 0x6ed   : > { %v4181_v36 = vpop.permute.xlu2 %4180  ;;  %v4123_v2 = vpop.permute.xlu1 %4122 }
 0x6ee   : > { %v4355_v3 = vsel %vm2245_vm2, %v7501_v39, %v4123_v2  ;;  %v7982_v39 = vld [vmem:[#allocation6_spill] sm:$0xff]  ;;  %vm7990_vm2 = vmmov %vm7981_vm5 }
 0x6ef   : > { %v4359_v24 = vsel %vm2250_vm4, %v4355_v3, %v4139_v31 }
 0x6f0   : > { %v4363_v60 = vsel %vm7976_vm0, %v4359_v24, %v4155_v12 }
 0x6f1   : > { %4340 = vrot.lane.b32.xlu0 %v7977_v27, %s4792_s3 }
 0x6f3   : > { %4308 = vrot.lane.b32.xlu1 %v7978_v4, %s4790_s30  ;;  %4324 = vrot.lane.b32.xlu2 %v7979_v9, %s4791_s2  ;;  %v4169_v0 = vpop.permute.xlu0 %4168 }
 0x6f5   : > { %v4187_v37 = vpop.permute.xlu2 %4186  ;;  %v4137_v44 = vpop.permute.xlu1 %4136 }
 0x6f6   : > { %v4358_v46 = vsel %vm2250_vm4, %v7542_v26, %v4137_v44  ;;  %vm7991_vm4 = vcmask 244736  }
 0x6f7   : > { %v4362_v17 = vsel %vm7980_vm1, %v4358_v46, %v4153_v43  ;;  %vm7988_vm1 = vmmov %vm7976_vm0 }
 0x6f8   : > { %v4366_v56 = vsel %vm7981_vm5, %v4362_v17, %v4169_v0  ;;  %v4360_v6 = vsel %vm7988_vm1, %v4356_v38, %v4149_v16 }
 0x6f9   : > { %4346 = vrot.lane.b32.xlu0 %v7460_v59, %s4792_s3  ;;  %v7986_v59 = vld [vmem:[#allocation10_spill] sm:$0xff] }
 0x6fb   : > { %4314 = vrot.lane.b32.xlu1 %v7982_v39, %s4790_s30  ;;  %4330 = vrot.lane.b32.xlu2 %v7983_v42, %s4791_s2  ;;  %v4183_v45 = vpop.permute.xlu0 %4182 }
 0x6fd   : > { %v4151_v47 = vpop.permute.xlu1 %4150  ;;  %v4201_v10 = vpop.permute.xlu2 %4200 }
 0x6fe   : > { %v4361_v50 = vsel %vm7976_vm0, %v4357_v61, %v4151_v47 }
 0x6ff   : > { %v4365_v28 = vsel %vm7984_vm15, %v4361_v50, %v4167_v51 }
 0x700   : > { %v4369_v18 = vsel %vm2265_vm6, %v4365_v28, %v4183_v45 }
 0x703   : > { %4328 = vrot.lane.b32.xlu1 %v7986_v59, %s4791_s2  ;;  %4344 = vrot.lane.b32.xlu2 %v7987_v13, %s4792_s3  ;;  %v4197_v14 = vpop.permute.xlu0 %4196 }
 0x705   : > { %v4165_v40 = vpop.permute.xlu1 %4164  ;;  %v4215_v30 = vpop.permute.xlu2 %4214 }
 0x706   : > { %v4364_v33 = vsel %vm7981_vm5, %v4360_v6, %v4165_v40 }
 0x707   : > { %v4368_v22 = vsel %vm2265_vm6, %v4364_v33, %v4181_v36 }
 0x708   : > { %v4372_v58 = vsel %vm2270_vm7, %v4368_v22, %v4197_v14 }
 0x70b   : > { %4342 = vrot.lane.b32.xlu1 %v7989_v19, %s4792_s3  ;;  %v4203_v7 = vpop.permute.xlu0 %4202 }
 0x70d   : > { %v4171_v34 = vpop.permute.xlu1 %4170  ;;  %v4229_v49 = vpop.permute.xlu2 %4228 }
 0x70e   : > { %v4367_v53 = vsel %vm7990_vm2, %v4363_v60, %v4171_v34 }
 0x70f   : > { %v4371_v55 = vsel %vm2265_vm6, %v4367_v53, %v4187_v37 }
 0x710   : > { %v4375_v26 = vsel %vm2270_vm7, %v4371_v55, %v4203_v7 }
 0x713   : > { %v4217_v54 = vpop.permute.xlu0 %4216 }
 0x715   : > { %v4185_v8 = vpop.permute.xlu1 %4184  ;;  %v4235_v23 = vpop.permute.xlu2 %4234 }
 0x716   : > { %v4370_v29 = vsel %vm2265_vm6, %v4366_v56, %v4185_v8  ;;  %vm7992_vm6 = vmmov %vm7991_vm4 }
 0x717   : > { %v4374_v1 = vsel %vm2270_vm7, %v4370_v29, %v4201_v10 }
 0x718   : > { %v4378_v20 = vsel %vm2275_vm8, %v4374_v1, %v4217_v54 }
 0x71b   : > { %v4231_v32 = vpop.permute.xlu0 %4230 }
 0x71d   : > { %v4199_v48 = vpop.permute.xlu1 %4198  ;;  %v4249_v43 = vpop.permute.xlu2 %4248 }
 0x71e   : > { %v4373_v61 = vsel %vm2270_vm7, %v4369_v18, %v4199_v48  ;;  %vm7993_vm7 = vmmov %vm7991_vm4 }
 0x71f   : > { %v4377_v35 = vsel %vm2275_vm8, %v4373_v61, %v4215_v30 }
 0x720   : > { %v4381_v57 = vsel %vm2280_vm9, %v4377_v35, %v4231_v32 }
 0x723   : > { %v4245_v21 = vpop.permute.xlu0 %4244 }
 0x725   : > { %v4213_v31 = vpop.permute.xlu1 %4212  ;;  %v4263_v15 = vpop.permute.xlu2 %4262 }
 0x726   : > { %v4376_v9 = vsel %vm2275_vm8, %v4372_v58, %v4213_v31 }
 0x727   : > { %v4380_v37 = vsel %vm2280_vm9, %v4376_v9, %v4229_v49 }
 0x728   : > { %v4384_v17 = vsel %vm2285_vm10, %v4380_v37, %v4245_v21 }
 0x72b   : > { %v4251_v16 = vpop.permute.xlu0 %4250 }
 0x72d   : > { %v4219_v5 = vpop.permute.xlu1 %4218  ;;  %v4277_v11 = vpop.permute.xlu2 %4276 }
 0x72e   : > { %v4379_v39 = vsel %vm2275_vm8, %v4375_v26, %v4219_v5  ;;  %vm7994_vm8 = vmmov %vm7991_vm4 }
 0x72f   : > { %v4383_v47 = vsel %vm2280_vm9, %v4379_v39, %v4235_v23 }
 0x730   : > { %v4387_v18 = vsel %vm2285_vm10, %v4383_v47, %v4251_v16 }
 0x733   : > { %v4265_v62 = vpop.permute.xlu0 %4264 }
 0x735   : > { %v4233_v51 = vpop.permute.xlu1 %4232  ;;  %v4283_v36 = vpop.permute.xlu2 %4282 }
 0x736   : > { %v4382_v13 = vsel %vm2280_vm9, %v4378_v20, %v4233_v51  ;;  %vm4433_vm9 = vcmask 523520  }
 0x737   : > { %v4386_v6 = vsel %vm2285_vm10, %v4382_v13, %v4249_v43 }
 0x738   : > { %v4390_v30 = vsel %vm2290_vm11, %v4386_v6, %v4265_v62 }
 0x73b   : > { %v4279_v52 = vpop.permute.xlu0 %4278 }
 0x73d   : > { %v4247_v25 = vpop.permute.xlu1 %4246  ;;  %v4297_v60 = vpop.permute.xlu2 %4296 }
 0x73e   : > { %v4385_v53 = vsel %vm2285_vm10, %v4381_v57, %v4247_v25 }
 0x73f   : > { %v4389_v49 = vsel %vm2290_vm11, %v4385_v53, %v4263_v15 }
 0x740   : > { %v4393_v29 = vsel %vm2295_vm12, %v4389_v49, %v4279_v52 }
 0x743   : > { %v4293_v12 = vpop.permute.xlu0 %4292 }
 0x745   : > { %v4261_v2 = vpop.permute.xlu1 %4260  ;;  %v4311_v0 = vpop.permute.xlu2 %4310 }
 0x746   : > { %v4388_v56 = vsel %vm2290_vm11, %v4384_v17, %v4261_v2 }
 0x747   : > { %v4392_v42 = vsel %vm2295_vm12, %v4388_v56, %v4277_v11 }
 0x748   : > { %v4396_v28 = vsel %vm2300_vm13, %v4392_v42, %v4293_v12 }
 0x74b   : > { %v4299_v3 = vpop.permute.xlu0 %4298 }
 0x74d   : > { %v4267_v24 = vpop.permute.xlu1 %4266  ;;  %v4325_v45 = vpop.permute.xlu2 %4324 }
 0x74e   : > { %v4391_v63 = vsel %vm2290_vm11, %v4387_v18, %v4267_v24 }
 0x74f   : > { %v4395_v38 = vsel %vm2295_vm12, %v4391_v63, %v4283_v36 }
 0x750   : > { %v4399_v22 = vsel %vm2300_vm13, %v4395_v38, %v4299_v3 }
 0x753   : > { %v4313_v27 = vpop.permute.xlu0 %4312 }
 0x755   : > { %v4281_v4 = vpop.permute.xlu1 %4280  ;;  %v4331_v40 = vpop.permute.xlu2 %4330 }
 0x756   : > { %v4394_v19 = vsel %vm2295_vm12, %v4390_v30, %v4281_v4 }
 0x757   : > { %v4398_v26 = vsel %vm2300_vm13, %v4394_v19, %v4297_v60 }
 0x758   : > { %v4402_v8 = vsel %vm2305_vm14, %v4398_v26, %v4313_v27 }
 0x75b   : > { %v4327_v44 = vpop.permute.xlu0 %4326 }
 0x75d   : > { %v4295_v46 = vpop.permute.xlu1 %4294  ;;  %v4345_v1 = vpop.permute.xlu2 %4344 }
 0x75e   : > { %v4397_v32 = vsel %vm2300_vm13, %v4393_v29, %v4295_v46 }
 0x75f   : > { %v4401_v48 = vsel %vm2305_vm14, %v4397_v32, %v4311_v0 }
 0x760   : > { %v4405_v35 = vsel %vm2310_vm3, %v4401_v48, %v4327_v44 }
 0x763   : > { %v4341_v10 = vpop.permute.xlu0 %4340 }
 0x765   : > { %v4309_v50 = vpop.permute.xlu1 %4308 }
 0x766   : > { %v4400_v41 = vsel %vm2305_vm14, %v4396_v28, %v4309_v50 }
 0x767   : > { %v4404_v59 = vsel %vm2310_vm3, %v4400_v41, %v4325_v45 }
 0x768   : > { %v4408_v14 = vsel %vm7991_vm4, %v4404_v59, %v4341_v10 }
 0x769   : > { %4421 = vrot.lane.b32.xlu1 %v4408_v14, %s4793_s12 }
 0x76b   : > { %v4347_v7 = vpop.permute.xlu0 %4346 }
 0x76d   : > { %v4315_v33 = vpop.permute.xlu1 %4314 }
 0x76e   : > { %v4403_v58 = vsel %vm2305_vm14, %v4399_v22, %v4315_v33 }
 0x76f   : > { %v4407_v34 = vsel %vm2310_vm3, %v4403_v58, %v4331_v40 }
 0x770   : > { %v4411_v55 = vsel %vm7992_vm6, %v4407_v34, %v4347_v7 }
 0x771   : > { %4427 = vrot.lane.b32.xlu1 %v4411_v55, %s4793_s12 }
 0x775   : > { %v4329_v54 = vpop.permute.xlu1 %4328 }
 0x776   : > { %v4406_v20 = vsel %vm2310_vm3, %v4402_v8, %v4329_v54 }
 0x777   : > { %v4410_v23 = vsel %vm7993_vm7, %v4406_v20, %v4345_v1 }
 0x778   : > { %4425 = vrot.lane.b32.xlu0 %v4410_v23, %s4793_s12 }
 0x77d   : > { %v4343_v61 = vpop.permute.xlu1 %4342 }
 0x77e   : > { %v4409_v57 = vsel %vm7994_vm8, %v4405_v35, %v4343_v61 }
 0x77f   : > { %4423 = vrot.lane.b32.xlu2 %v4409_v57, %s4793_s12 }
 0x7d9   : > { %v4424_v21 = vpop.permute.xlu2 %4423 }
 0x7da   : > { %4435 = vst.msk [vmem:[%s6478_s6 + $0x8] sm:$0xff] %vm4433_vm9, %v4424_v21 }
 0x7db   : > { %v4422_v31 = vpop.permute.xlu1 %4421 }
 0x7dc   : > { %4434 = vst.msk [vmem:[%s6478_s6] sm:$0xff] %vm4433_vm9, %v4422_v31 }
 0x7e3   : > { %v4428_v43 = vpop.permute.xlu1 %4427 }
 0x7e4   : > { %4437 = vst.msk [vmem:[%s6478_s6 + $0x18] sm:$0xff] %vm4433_vm9, %v4428_v43 }
 0x7ea   : > { %v4426_v16 = vpop.permute.xlu0 %4425 }
 0x7eb   : > { %4436 = vst.msk [vmem:[%s6478_s6 + $0x10] sm:$0xff] %vm4433_vm9, %v4426_v16 }
 0x7ec PF: > { %p11_p7 = scmp.ge.s32.totalorder %s4824_s11, 10   ;;  %s7995_s6 = smov %s4764_s7 }
 0x7ed   : > { %s7996_s7 = smov %s4768_s8  ;;  %s7997_s8 = smov %s4834_s14 }
 0x7ee   : > { %s7998_s9 = smov %s4824_s11  ;;  %13 = sbr.rel (!%p11_p7) target bundleno = 3 (0x3), region = 67 }
 0x7f3   :  { %4462 = vsyncpa [#allocation3], 1 }
 0x7f4   :  { %4464 = vsyncpa [#allocation3 + $0x1], 1 }

</bundles_post_ra>
